<compile_context>
chip_gen: v6e
topology: v6e:2x2x1
jax: 0.10.0
libtpu: 0.0.40
codegen_flags: <defaults>
</compile_context>

<pallas_src>
import functools

import jax
import jax.numpy as jnp
import numpy as np
from jax.experimental import pallas as pl
from jax.experimental.pallas import tpu as pltpu


def _round_up(x, m):
    return ((x + m - 1) // m) * m


# ----------------------------- fused Pallas kernel ----------------------------

def _fused_encoder_kernel(x_ref, m5_ref, w0_ref, b0_ref, wb_ref, bb_ref,
                          wf_ref, bf_ref, o_ref, patch_ref, *, W):
    """One-shot fused DvmarkEncoder forward.

    x_ref  : (Cin0p, N) f32        lane-dense network input, N = B*H*W = 128
    m5_ref : (25, N)    f32        5x5 per-tap border masks (0/1)
    w0_ref : (C, 25*Cin0p) bf16    merged 3x3+5x5 weights (0.5 average folded)
    b0_ref : (C, N)     f32        0.5*(b3+b5), lane-broadcast
    wb_ref : (nblk, C, 9*C) bf16   block weights, BN scale folded in
    bb_ref : (nblk, C, N) f32      block biases, BN folded in, lane-broadcast
    wf_ref : (8, C)     bf16       final 1x1 weight (row 0 real, rest zero)
    bf_ref : (8, N)     f32        final bias (row 0 real), lane-broadcast
    o_ref  : (8, N)     f32        output; row 0 is the single output channel
    patch_ref: (rows, N) bf16      reusable im2col patch scratch
    """
    n = x_ref.shape[1]
    cin0p = x_ref.shape[0]
    ch = b0_ref.shape[0]

    # Per-tap (lane offset, (1, n) border mask) pairs, hoisted so each mask row
    # is sliced exactly once.  The 3x3/pad-1 taps are the center taps of the
    # 5x5/pad-2 window (masks depend only on (dh, dw)), so they share rows.
    taps5 = []
    for kh in range(5):
        for kw in range(5):
            r = kh * 5 + kw
            taps5.append(((kh - 2) * W + (kw - 2), m5_ref[r:r + 1, :]))
    taps3 = [taps5[(kh + 1) * 5 + (kw + 1)]
             for kh in range(3) for kw in range(3)]

    def fill_patches(v, taps):
        # im2col via XLU lane rotation: no halo scratch, no concat copies.
        # pltpu.roll wraps around the full B*H*W lane axis; the wrapped lanes
        # are exactly the out-of-image taps that the masks zero out.
        c = v.shape[0]
        for t, (off, m) in enumerate(taps):
            shifted = pltpu.roll(v, (-off) % n, 1) if off != 0 else v
            patch_ref[t * c:(t + 1) * c, :] = (shifted * m).astype(patch_ref.dtype)

    x = x_ref[...]

    # --- multi-scale stage: 0.5*(conv3x3(x) + conv5x5(x)); the 3x3 weights are
    #     folded into the 5x5 center taps host-side -> one 25-tap im2col + dot.
    fill_patches(x, taps5)
    h = jnp.dot(w0_ref[...], patch_ref[:25 * cin0p, :],
                preferred_element_type=jnp.float32) + b0_ref[...]

    # --- ConvBNRelu blocks (eval-mode BN folded into weight/bias host-side) ---
    for i in range(wb_ref.shape[0]):
        fill_patches(h, taps3)
        h = jnp.dot(wb_ref[i], patch_ref[:9 * ch, :],
                    preferred_element_type=jnp.float32) + bb_ref[i]
        h = jnp.maximum(h, 0.0)

    # --- final 1x1 conv + tanh -------------------------------------------------
    o = jnp.dot(wf_ref[...], h.astype(jnp.bfloat16),
                preferred_element_type=jnp.float32) + bf_ref[...]
    o_ref[...] = jnp.tanh(o)


# ----------------------------- host-side (one-time) preparation ---------------

def _tap_masks_5x5(B, H, W):
    """(25, B*H*W) 0/1 masks marking taps that stay inside the padded image."""
    n = np.arange(B * H * W)
    oh = (n % (H * W)) // W
    ow = n % W
    masks = np.zeros((25, B * H * W), np.float32)
    for kh in range(5):
        for kw in range(5):
            dh, dw = kh - 2, kw - 2
            ok = (oh + dh >= 0) & (oh + dh < H) & (ow + dw >= 0) & (ow + dw < W)
            masks[kh * 5 + kw] = ok.astype(np.float32)
    return jnp.asarray(masks)


def _flatten_weight(w):
    # (Cout, Cin, KH, KW) -> (Cout, KH*KW*Cin), columns ordered (tap, cin).
    co, ci, kh, kw = w.shape
    return jnp.transpose(w, (0, 2, 3, 1)).reshape(co, kh * kw * ci)


def prepare_encoder_params(params, B, H, W, eps=1e-5):
    """One-time packing of model params into kernel-ready device arrays."""
    N = B * H * W
    assert N == 128, "kernel layout assumes B*H*W == 128 (one vreg lane row)"
    assert 2 * (W + 1) < N, "tap offsets must stay within one lane row"

    ch, cin0 = params["scale3"][0].shape[0], params["scale3"][0].shape[1]
    cin0p = _round_up(cin0, 8)                     # pad 31 -> 32 channels

    # Merge the 3x3 kernel into the center taps of the 5x5 kernel (identical
    # per-tap border masks), fold the 0.5 multi-scale average, pad Cin.
    w3, b3 = params["scale3"]
    w5, b5 = params["scale5"]
    w5m = jnp.pad(w5, ((0, 0), (0, cin0p - cin0), (0, 0), (0, 0)))
    w3p = jnp.pad(w3, ((0, 0), (0, cin0p - cin0), (0, 0), (0, 0)))
    w5m = w5m.at[:, :, 1:4, 1:4].add(w3p)
    w0 = (0.5 * _flatten_weight(w5m)).astype(jnp.bfloat16)      # (ch, 25*cin0p)
    b0 = jnp.broadcast_to((0.5 * (b3 + b5))[:, None], (ch, N)).astype(jnp.float32)

    # ConvBNRelu blocks: fold eval-mode BN into the conv weight / bias.
    wb_list, bb_list = [], []
    for (w, b, gamma, beta, rmean, rvar) in params["blocks"]:
        s = gamma / jnp.sqrt(rvar + eps)
        wb_list.append((_flatten_weight(w) * s[:, None]).astype(jnp.bfloat16))
        bias = (b - rmean) * s + beta
        bb_list.append(jnp.broadcast_to(bias[:, None], (ch, N)).astype(jnp.float32))
    wb = jnp.stack(wb_list)                         # (nblk, ch, 9*ch) bf16
    bb = jnp.stack(bb_list)                         # (nblk, ch, N)    f32

    # Final 1x1 conv, padded to 8 output rows for a clean full-tile store.
    wf, bf = params["final"]
    wf_p = jnp.zeros((8, ch), jnp.float32).at[0].set(wf.reshape(-1))
    wf_p = wf_p.astype(jnp.bfloat16)
    bf_p = jnp.zeros((8, N), jnp.float32).at[0].set(jnp.broadcast_to(bf, (N,)))

    m5 = _tap_masks_5x5(B, H, W)

    return dict(w0=w0, b0=b0, wb=wb, bb=bb, wf=wf_p, bf=bf_p, m5=m5)


# ----------------------------- per-call forward (jitted) ----------------------

def dvmark_encoder_forward(packed, x, watermark):
    B, _, H, W = x.shape
    nbits = watermark.shape[1]
    N = B * H * W
    ch = packed["w0"].shape[0]
    cin0p = packed["w0"].shape[1] // 25
    cin0 = 1 + nbits

    # Only per-call data prep: concat watermark channels, pad channels,
    # flatten to lane-dense (C, B*H*W).  Everything else is pre-packed.
    wm = jnp.broadcast_to(watermark[:, :, None, None].astype(jnp.float32),
                          (B, nbits, H, W))
    xcat = jnp.concatenate([x.astype(jnp.float32), wm], axis=1)
    xcat = jnp.pad(xcat, ((0, 0), (0, cin0p - cin0), (0, 0), (0, 0)))
    x_flat = jnp.transpose(xcat, (1, 0, 2, 3)).reshape(cin0p, N)

    patch_rows = max(25 * cin0p, 9 * ch)
    vmem = pl.BlockSpec(memory_space=pltpu.MemorySpace.VMEM)
    kernel = functools.partial(_fused_encoder_kernel, W=W)
    out = pl.pallas_call(
        kernel,
        out_shape=jax.ShapeDtypeStruct((8, N), jnp.float32),
        in_specs=[vmem] * 8,
        out_specs=vmem,
        scratch_shapes=[pltpu.VMEM((patch_rows, N), jnp.bfloat16)],
    )(x_flat, packed["m5"], packed["w0"], packed["b0"],
      packed["wb"], packed["bb"], packed["wf"], packed["bf"])

    return out[0].reshape(B, H, W)[:, None, :, :]


# ----------------------------- parameters -------------------------------------

def init_params(key, num_blocks=4, num_bits=30, channels=32):
    def conv_init(k, cout, cin, kh, kw):
        k1, k2 = jax.random.split(k)
        w = jax.random.normal(k1, (cout, cin, kh, kw), jnp.float32) * 0.05
        b = jax.random.normal(k2, (cout,), jnp.float32) * 0.05
        return w, b

    keys = jax.random.split(key, 3 + num_blocks)
    cin0 = 1 + num_bits
    params = {
        "scale3": conv_init(keys[0], channels, cin0, 3, 3),
        "scale5": conv_init(keys[1], channels, cin0, 5, 5),
        "final": conv_init(keys[2], 1, channels, 1, 1),
    }
    blocks = []
    for i in range(num_blocks):
        kconv, kbn = jax.random.split(keys[3 + i])
        w, b = conv_init(kconv, channels, channels, 3, 3)
        k1, k2, k3, k4 = jax.random.split(kbn, 4)
        gamma = 1.0 + 0.1 * jax.random.normal(k1, (channels,), jnp.float32)
        beta = 0.1 * jax.random.normal(k2, (channels,), jnp.float32)
        rmean = 0.1 * jax.random.normal(k3, (channels,), jnp.float32)
        rvar = 1.0 + 0.1 * jnp.abs(jax.random.normal(k4, (channels,), jnp.float32))
        blocks.append((w, b, gamma, beta, rmean, rvar))
    params["blocks"] = blocks
    return params


# ----------------------------- reference (plain JAX, f32) ----------------------

def _conv_ref(x, w, b, pad):
    y = jax.lax.conv_general_dilated(
        x, w, window_strides=(1, 1), padding=[pad, pad],
        dimension_numbers=("NCHW", "OIHW", "NCHW"))
    return y + b[None, :, None, None]


def dvmark_encoder_ref(params, x, watermark, eps=1e-5):
    B, _, H, W = x.shape
    nbits = watermark.shape[1]
    wm = jnp.broadcast_to(watermark[:, :, None, None].astype(jnp.float32),
                          (B, nbits, H, W))
    h = jnp.concatenate([x.astype(jnp.float32), wm], axis=1)
    w3, b3 = params["scale3"]
    w5, b5 = params["scale5"]
    h = 0.5 * (_conv_ref(h, w3, b3, (1, 1)) + _conv_ref(h, w5, b5, (2, 2)))
    for (w, b, gamma, beta, rmean, rvar) in params["blocks"]:
        y = _conv_ref(h, w, b, (1, 1))
        y = (y - rmean[None, :, None, None]) / jnp.sqrt(rvar + eps)[None, :, None, None]
        y = y * gamma[None, :, None, None] + beta[None, :, None, None]
        h = jnp.maximum(y, 0.0)
    wf, bf = params["final"]
    return jnp.tanh(_conv_ref(h, wf, bf, (0, 0)))


# ----------------------------- main -------------------------------------------

if __name__ == "__main__":
    key = jax.random.PRNGKey(0)
    k_param, k_x, k_w = jax.random.split(key, 3)

    B, C, T = 2, 8, 8          # x is (B, 1, C, T); B*C*T = 128 = one vreg width
    NUM_BITS, CHANNELS, NUM_BLOCKS = 30, 32, 4

    params = init_params(k_param, num_blocks=NUM_BLOCKS,
                         num_bits=NUM_BITS, channels=CHANNELS)
    x = jax.random.normal(k_x, (B, 1, C, T), jnp.float32)
    watermark = jax.random.bernoulli(k_w, 0.5, (B, NUM_BITS)).astype(jnp.float32)

    # One-time parameter packing (hoisted out of the per-call jitted path).
    packed = prepare_encoder_params(params, B, C, T)

    fwd = jax.jit(dvmark_encoder_forward)
    out = jax.block_until_ready(fwd(packed, x, watermark))
    assert out.shape == (B, 1, C, T), out.shape

    ref = jax.block_until_ready(dvmark_encoder_ref(params, x, watermark))
    max_err = float(jnp.max(jnp.abs(out - ref)))
    # bf16 MXU inputs with f32 accumulation; f32 reference -> ~1e-3 deviation.
    assert max_err < 1e-2, max_err

    print("KERNEL_OK")
</pallas_src>

<mosaic_0001>
module attributes {stable_mosaic.version = 11 : i64} {
  func.func @_fused_encoder_kernel(%arg0: memref<32x128xf32, #tpu.memory_space<vmem>>, %arg1: memref<25x128xf32, #tpu.memory_space<vmem>>, %arg2: memref<32x800xbf16, #tpu.memory_space<vmem>>, %arg3: memref<32x128xf32, #tpu.memory_space<vmem>>, %arg4: memref<4x32x288xbf16, #tpu.memory_space<vmem>>, %arg5: memref<4x32x128xf32, #tpu.memory_space<vmem>>, %arg6: memref<8x32xbf16, #tpu.memory_space<vmem>>, %arg7: memref<8x128xf32, #tpu.memory_space<vmem>>, %arg8: memref<8x128xf32, #tpu.memory_space<vmem>>, %arg9: memref<800x128xbf16, #tpu.memory_space<vmem>>) attributes {dimension_semantics = [], scalar_prefetch = 0 : i64, scratch_operands = 1 : i64, tpu.core_type = #tpu.core_type<tc>} {
    %c0 = arith.constant 0 : index
    %c0_0 = arith.constant 0 : index
    %0 = vector.load %arg1[%c0, %c0_0] : memref<25x128xf32, #tpu.memory_space<vmem>>, vector<1x128xf32>
    %c1 = arith.constant 1 : index
    %c0_1 = arith.constant 0 : index
    %1 = vector.load %arg1[%c1, %c0_1] : memref<25x128xf32, #tpu.memory_space<vmem>>, vector<1x128xf32>
    %c2 = arith.constant 2 : index
    %c0_2 = arith.constant 0 : index
    %2 = vector.load %arg1[%c2, %c0_2] : memref<25x128xf32, #tpu.memory_space<vmem>>, vector<1x128xf32>
    %c3 = arith.constant 3 : index
    %c0_3 = arith.constant 0 : index
    %3 = vector.load %arg1[%c3, %c0_3] : memref<25x128xf32, #tpu.memory_space<vmem>>, vector<1x128xf32>
    %c4 = arith.constant 4 : index
    %c0_4 = arith.constant 0 : index
    %4 = vector.load %arg1[%c4, %c0_4] : memref<25x128xf32, #tpu.memory_space<vmem>>, vector<1x128xf32>
    %c5 = arith.constant 5 : index
    %c0_5 = arith.constant 0 : index
    %5 = vector.load %arg1[%c5, %c0_5] : memref<25x128xf32, #tpu.memory_space<vmem>>, vector<1x128xf32>
    %c6 = arith.constant 6 : index
    %c0_6 = arith.constant 0 : index
    %6 = vector.load %arg1[%c6, %c0_6] : memref<25x128xf32, #tpu.memory_space<vmem>>, vector<1x128xf32>
    %c7 = arith.constant 7 : index
    %c0_7 = arith.constant 0 : index
    %7 = vector.load %arg1[%c7, %c0_7] : memref<25x128xf32, #tpu.memory_space<vmem>>, vector<1x128xf32>
    %c8 = arith.constant 8 : index
    %c0_8 = arith.constant 0 : index
    %8 = vector.load %arg1[%c8, %c0_8] : memref<25x128xf32, #tpu.memory_space<vmem>>, vector<1x128xf32>
    %c9 = arith.constant 9 : index
    %c0_9 = arith.constant 0 : index
    %9 = vector.load %arg1[%c9, %c0_9] : memref<25x128xf32, #tpu.memory_space<vmem>>, vector<1x128xf32>
    %c10 = arith.constant 10 : index
    %c0_10 = arith.constant 0 : index
    %10 = vector.load %arg1[%c10, %c0_10] : memref<25x128xf32, #tpu.memory_space<vmem>>, vector<1x128xf32>
    %c11 = arith.constant 11 : index
    %c0_11 = arith.constant 0 : index
    %11 = vector.load %arg1[%c11, %c0_11] : memref<25x128xf32, #tpu.memory_space<vmem>>, vector<1x128xf32>
    %c12 = arith.constant 12 : index
    %c0_12 = arith.constant 0 : index
    %12 = vector.load %arg1[%c12, %c0_12] : memref<25x128xf32, #tpu.memory_space<vmem>>, vector<1x128xf32>
    %c13 = arith.constant 13 : index
    %c0_13 = arith.constant 0 : index
    %13 = vector.load %arg1[%c13, %c0_13] : memref<25x128xf32, #tpu.memory_space<vmem>>, vector<1x128xf32>
    %c14 = arith.constant 14 : index
    %c0_14 = arith.constant 0 : index
    %14 = vector.load %arg1[%c14, %c0_14] : memref<25x128xf32, #tpu.memory_space<vmem>>, vector<1x128xf32>
    %c15 = arith.constant 15 : index
    %c0_15 = arith.constant 0 : index
    %15 = vector.load %arg1[%c15, %c0_15] : memref<25x128xf32, #tpu.memory_space<vmem>>, vector<1x128xf32>
    %c16 = arith.constant 16 : index
    %c0_16 = arith.constant 0 : index
    %16 = vector.load %arg1[%c16, %c0_16] : memref<25x128xf32, #tpu.memory_space<vmem>>, vector<1x128xf32>
    %c17 = arith.constant 17 : index
    %c0_17 = arith.constant 0 : index
    %17 = vector.load %arg1[%c17, %c0_17] : memref<25x128xf32, #tpu.memory_space<vmem>>, vector<1x128xf32>
    %c18 = arith.constant 18 : index
    %c0_18 = arith.constant 0 : index
    %18 = vector.load %arg1[%c18, %c0_18] : memref<25x128xf32, #tpu.memory_space<vmem>>, vector<1x128xf32>
    %c19 = arith.constant 19 : index
    %c0_19 = arith.constant 0 : index
    %19 = vector.load %arg1[%c19, %c0_19] : memref<25x128xf32, #tpu.memory_space<vmem>>, vector<1x128xf32>
    %c20 = arith.constant 20 : index
    %c0_20 = arith.constant 0 : index
    %20 = vector.load %arg1[%c20, %c0_20] : memref<25x128xf32, #tpu.memory_space<vmem>>, vector<1x128xf32>
    %c21 = arith.constant 21 : index
    %c0_21 = arith.constant 0 : index
    %21 = vector.load %arg1[%c21, %c0_21] : memref<25x128xf32, #tpu.memory_space<vmem>>, vector<1x128xf32>
    %c22 = arith.constant 22 : index
    %c0_22 = arith.constant 0 : index
    %22 = vector.load %arg1[%c22, %c0_22] : memref<25x128xf32, #tpu.memory_space<vmem>>, vector<1x128xf32>
    %c23 = arith.constant 23 : index
    %c0_23 = arith.constant 0 : index
    %23 = vector.load %arg1[%c23, %c0_23] : memref<25x128xf32, #tpu.memory_space<vmem>>, vector<1x128xf32>
    %c24 = arith.constant 24 : index
    %c0_24 = arith.constant 0 : index
    %24 = vector.load %arg1[%c24, %c0_24] : memref<25x128xf32, #tpu.memory_space<vmem>>, vector<1x128xf32>
    %c0_25 = arith.constant 0 : index
    %c0_26 = arith.constant 0 : index
    %25 = vector.load %arg0[%c0_25, %c0_26] : memref<32x128xf32, #tpu.memory_space<vmem>>, vector<32x128xf32>
    %c18_i32 = arith.constant 18 : i32
    %26 = tpu.dynamic_rotate %25 by %c18_i32 dim 1 : vector<32x128xf32>, i32 -> vector<32x128xf32>
    %27 = vector.broadcast %0 : vector<1x128xf32> to vector<32x128xf32>
    %28 = arith.mulf %26, %27 : vector<32x128xf32>
    %29 = arith.truncf %28 : vector<32x128xf32> to vector<32x128xbf16>
    %c0_27 = arith.constant 0 : index
    %c0_28 = arith.constant 0 : index
    %30 = vector.load %arg9[%c0_27, %c0_28] : memref<800x128xbf16, #tpu.memory_space<vmem>>, vector<32x128xbf16>
    tpu.vector_store %arg9[%c0_27, %c0_28], %29 {strides = array<i32>} : memref<800x128xbf16, #tpu.memory_space<vmem>>, vector<32x128xbf16>,
    %c17_i32 = arith.constant 17 : i32
    %31 = tpu.dynamic_rotate %25 by %c17_i32 dim 1 : vector<32x128xf32>, i32 -> vector<32x128xf32>
    %32 = vector.broadcast %1 : vector<1x128xf32> to vector<32x128xf32>
    %33 = arith.mulf %31, %32 : vector<32x128xf32>
    %34 = arith.truncf %33 : vector<32x128xf32> to vector<32x128xbf16>
    %c32 = arith.constant 32 : index
    %c0_29 = arith.constant 0 : index
    %35 = vector.load %arg9[%c32, %c0_29] : memref<800x128xbf16, #tpu.memory_space<vmem>>, vector<32x128xbf16>
    tpu.vector_store %arg9[%c32, %c0_29], %34 {strides = array<i32>} : memref<800x128xbf16, #tpu.memory_space<vmem>>, vector<32x128xbf16>,
    %c16_i32 = arith.constant 16 : i32
    %36 = tpu.dynamic_rotate %25 by %c16_i32 dim 1 : vector<32x128xf32>, i32 -> vector<32x128xf32>
    %37 = vector.broadcast %2 : vector<1x128xf32> to vector<32x128xf32>
    %38 = arith.mulf %36, %37 : vector<32x128xf32>
    %39 = arith.truncf %38 : vector<32x128xf32> to vector<32x128xbf16>
    %c64 = arith.constant 64 : index
    %c0_30 = arith.constant 0 : index
    %40 = vector.load %arg9[%c64, %c0_30] : memref<800x128xbf16, #tpu.memory_space<vmem>>, vector<32x128xbf16>
    tpu.vector_store %arg9[%c64, %c0_30], %39 {strides = array<i32>} : memref<800x128xbf16, #tpu.memory_space<vmem>>, vector<32x128xbf16>,
    %c15_i32 = arith.constant 15 : i32
    %41 = tpu.dynamic_rotate %25 by %c15_i32 dim 1 : vector<32x128xf32>, i32 -> vector<32x128xf32>
    %42 = vector.broadcast %3 : vector<1x128xf32> to vector<32x128xf32>
    %43 = arith.mulf %41, %42 : vector<32x128xf32>
    %44 = arith.truncf %43 : vector<32x128xf32> to vector<32x128xbf16>
    %c96 = arith.constant 96 : index
    %c0_31 = arith.constant 0 : index
    %45 = vector.load %arg9[%c96, %c0_31] : memref<800x128xbf16, #tpu.memory_space<vmem>>, vector<32x128xbf16>
    tpu.vector_store %arg9[%c96, %c0_31], %44 {strides = array<i32>} : memref<800x128xbf16, #tpu.memory_space<vmem>>, vector<32x128xbf16>,
    %c14_i32 = arith.constant 14 : i32
    %46 = tpu.dynamic_rotate %25 by %c14_i32 dim 1 : vector<32x128xf32>, i32 -> vector<32x128xf32>
    %47 = vector.broadcast %4 : vector<1x128xf32> to vector<32x128xf32>
    %48 = arith.mulf %46, %47 : vector<32x128xf32>
    %49 = arith.truncf %48 : vector<32x128xf32> to vector<32x128xbf16>
    %c128 = arith.constant 128 : index
    %c0_32 = arith.constant 0 : index
    %50 = vector.load %arg9[%c128, %c0_32] : memref<800x128xbf16, #tpu.memory_space<vmem>>, vector<32x128xbf16>
    tpu.vector_store %arg9[%c128, %c0_32], %49 {strides = array<i32>} : memref<800x128xbf16, #tpu.memory_space<vmem>>, vector<32x128xbf16>,
    %c10_i32 = arith.constant 10 : i32
    %51 = tpu.dynamic_rotate %25 by %c10_i32 dim 1 : vector<32x128xf32>, i32 -> vector<32x128xf32>
    %52 = vector.broadcast %5 : vector<1x128xf32> to vector<32x128xf32>
    %53 = arith.mulf %51, %52 : vector<32x128xf32>
    %54 = arith.truncf %53 : vector<32x128xf32> to vector<32x128xbf16>
    %c160 = arith.constant 160 : index
    %c0_33 = arith.constant 0 : index
    %55 = vector.load %arg9[%c160, %c0_33] : memref<800x128xbf16, #tpu.memory_space<vmem>>, vector<32x128xbf16>
    tpu.vector_store %arg9[%c160, %c0_33], %54 {strides = array<i32>} : memref<800x128xbf16, #tpu.memory_space<vmem>>, vector<32x128xbf16>,
    %c9_i32 = arith.constant 9 : i32
    %56 = tpu.dynamic_rotate %25 by %c9_i32 dim 1 : vector<32x128xf32>, i32 -> vector<32x128xf32>
    %57 = vector.broadcast %6 : vector<1x128xf32> to vector<32x128xf32>
    %58 = arith.mulf %56, %57 : vector<32x128xf32>
    %59 = arith.truncf %58 : vector<32x128xf32> to vector<32x128xbf16>
    %c192 = arith.constant 192 : index
    %c0_34 = arith.constant 0 : index
    %60 = vector.load %arg9[%c192, %c0_34] : memref<800x128xbf16, #tpu.memory_space<vmem>>, vector<32x128xbf16>
    tpu.vector_store %arg9[%c192, %c0_34], %59 {strides = array<i32>} : memref<800x128xbf16, #tpu.memory_space<vmem>>, vector<32x128xbf16>,
    %c8_i32 = arith.constant 8 : i32
    %61 = tpu.dynamic_rotate %25 by %c8_i32 dim 1 : vector<32x128xf32>, i32 -> vector<32x128xf32>
    %62 = vector.broadcast %7 : vector<1x128xf32> to vector<32x128xf32>
    %63 = arith.mulf %61, %62 : vector<32x128xf32>
    %64 = arith.truncf %63 : vector<32x128xf32> to vector<32x128xbf16>
    %c224 = arith.constant 224 : index
    %c0_35 = arith.constant 0 : index
    %65 = vector.load %arg9[%c224, %c0_35] : memref<800x128xbf16, #tpu.memory_space<vmem>>, vector<32x128xbf16>
    tpu.vector_store %arg9[%c224, %c0_35], %64 {strides = array<i32>} : memref<800x128xbf16, #tpu.memory_space<vmem>>, vector<32x128xbf16>,
    %c7_i32 = arith.constant 7 : i32
    %66 = tpu.dynamic_rotate %25 by %c7_i32 dim 1 : vector<32x128xf32>, i32 -> vector<32x128xf32>
    %67 = vector.broadcast %8 : vector<1x128xf32> to vector<32x128xf32>
    %68 = arith.mulf %66, %67 : vector<32x128xf32>
    %69 = arith.truncf %68 : vector<32x128xf32> to vector<32x128xbf16>
    %c256 = arith.constant 256 : index
    %c0_36 = arith.constant 0 : index
    %70 = vector.load %arg9[%c256, %c0_36] : memref<800x128xbf16, #tpu.memory_space<vmem>>, vector<32x128xbf16>
    tpu.vector_store %arg9[%c256, %c0_36], %69 {strides = array<i32>} : memref<800x128xbf16, #tpu.memory_space<vmem>>, vector<32x128xbf16>,
    %c6_i32 = arith.constant 6 : i32
    %71 = tpu.dynamic_rotate %25 by %c6_i32 dim 1 : vector<32x128xf32>, i32 -> vector<32x128xf32>
    %72 = vector.broadcast %9 : vector<1x128xf32> to vector<32x128xf32>
    %73 = arith.mulf %71, %72 : vector<32x128xf32>
    %74 = arith.truncf %73 : vector<32x128xf32> to vector<32x128xbf16>
    %c288 = arith.constant 288 : index
    %c0_37 = arith.constant 0 : index
    %75 = vector.load %arg9[%c288, %c0_37] : memref<800x128xbf16, #tpu.memory_space<vmem>>, vector<32x128xbf16>
    tpu.vector_store %arg9[%c288, %c0_37], %74 {strides = array<i32>} : memref<800x128xbf16, #tpu.memory_space<vmem>>, vector<32x128xbf16>,
    %c2_i32 = arith.constant 2 : i32
    %76 = tpu.dynamic_rotate %25 by %c2_i32 dim 1 : vector<32x128xf32>, i32 -> vector<32x128xf32>
    %77 = vector.broadcast %10 : vector<1x128xf32> to vector<32x128xf32>
    %78 = arith.mulf %76, %77 : vector<32x128xf32>
    %79 = arith.truncf %78 : vector<32x128xf32> to vector<32x128xbf16>
    %c320 = arith.constant 320 : index
    %c0_38 = arith.constant 0 : index
    %80 = vector.load %arg9[%c320, %c0_38] : memref<800x128xbf16, #tpu.memory_space<vmem>>, vector<32x128xbf16>
    tpu.vector_store %arg9[%c320, %c0_38], %79 {strides = array<i32>} : memref<800x128xbf16, #tpu.memory_space<vmem>>, vector<32x128xbf16>,
    %c1_i32 = arith.constant 1 : i32
    %81 = tpu.dynamic_rotate %25 by %c1_i32 dim 1 : vector<32x128xf32>, i32 -> vector<32x128xf32>
    %82 = vector.broadcast %11 : vector<1x128xf32> to vector<32x128xf32>
    %83 = arith.mulf %81, %82 : vector<32x128xf32>
    %84 = arith.truncf %83 : vector<32x128xf32> to vector<32x128xbf16>
    %c352 = arith.constant 352 : index
    %c0_39 = arith.constant 0 : index
    %85 = vector.load %arg9[%c352, %c0_39] : memref<800x128xbf16, #tpu.memory_space<vmem>>, vector<32x128xbf16>
    tpu.vector_store %arg9[%c352, %c0_39], %84 {strides = array<i32>} : memref<800x128xbf16, #tpu.memory_space<vmem>>, vector<32x128xbf16>,
    %86 = vector.broadcast %12 : vector<1x128xf32> to vector<32x128xf32>
    %87 = arith.mulf %25, %86 : vector<32x128xf32>
    %88 = arith.truncf %87 : vector<32x128xf32> to vector<32x128xbf16>
    %c384 = arith.constant 384 : index
    %c0_40 = arith.constant 0 : index
    %89 = vector.load %arg9[%c384, %c0_40] : memref<800x128xbf16, #tpu.memory_space<vmem>>, vector<32x128xbf16>
    tpu.vector_store %arg9[%c384, %c0_40], %88 {strides = array<i32>} : memref<800x128xbf16, #tpu.memory_space<vmem>>, vector<32x128xbf16>,
    %c127_i32 = arith.constant 127 : i32
    %90 = tpu.dynamic_rotate %25 by %c127_i32 dim 1 : vector<32x128xf32>, i32 -> vector<32x128xf32>
    %91 = vector.broadcast %13 : vector<1x128xf32> to vector<32x128xf32>
    %92 = arith.mulf %90, %91 : vector<32x128xf32>
    %93 = arith.truncf %92 : vector<32x128xf32> to vector<32x128xbf16>
    %c416 = arith.constant 416 : index
    %c0_41 = arith.constant 0 : index
    %94 = vector.load %arg9[%c416, %c0_41] : memref<800x128xbf16, #tpu.memory_space<vmem>>, vector<32x128xbf16>
    tpu.vector_store %arg9[%c416, %c0_41], %93 {strides = array<i32>} : memref<800x128xbf16, #tpu.memory_space<vmem>>, vector<32x128xbf16>,
    %c126_i32 = arith.constant 126 : i32
    %95 = tpu.dynamic_rotate %25 by %c126_i32 dim 1 : vector<32x128xf32>, i32 -> vector<32x128xf32>
    %96 = vector.broadcast %14 : vector<1x128xf32> to vector<32x128xf32>
    %97 = arith.mulf %95, %96 : vector<32x128xf32>
    %98 = arith.truncf %97 : vector<32x128xf32> to vector<32x128xbf16>
    %c448 = arith.constant 448 : index
    %c0_42 = arith.constant 0 : index
    %99 = vector.load %arg9[%c448, %c0_42] : memref<800x128xbf16, #tpu.memory_space<vmem>>, vector<32x128xbf16>
    tpu.vector_store %arg9[%c448, %c0_42], %98 {strides = array<i32>} : memref<800x128xbf16, #tpu.memory_space<vmem>>, vector<32x128xbf16>,
    %c122_i32 = arith.constant 122 : i32
    %100 = tpu.dynamic_rotate %25 by %c122_i32 dim 1 : vector<32x128xf32>, i32 -> vector<32x128xf32>
    %101 = vector.broadcast %15 : vector<1x128xf32> to vector<32x128xf32>
    %102 = arith.mulf %100, %101 : vector<32x128xf32>
    %103 = arith.truncf %102 : vector<32x128xf32> to vector<32x128xbf16>
    %c480 = arith.constant 480 : index
    %c0_43 = arith.constant 0 : index
    %104 = vector.load %arg9[%c480, %c0_43] : memref<800x128xbf16, #tpu.memory_space<vmem>>, vector<32x128xbf16>
    tpu.vector_store %arg9[%c480, %c0_43], %103 {strides = array<i32>} : memref<800x128xbf16, #tpu.memory_space<vmem>>, vector<32x128xbf16>,
    %c121_i32 = arith.constant 121 : i32
    %105 = tpu.dynamic_rotate %25 by %c121_i32 dim 1 : vector<32x128xf32>, i32 -> vector<32x128xf32>
    %106 = vector.broadcast %16 : vector<1x128xf32> to vector<32x128xf32>
    %107 = arith.mulf %105, %106 : vector<32x128xf32>
    %108 = arith.truncf %107 : vector<32x128xf32> to vector<32x128xbf16>
    %c512 = arith.constant 512 : index
    %c0_44 = arith.constant 0 : index
    %109 = vector.load %arg9[%c512, %c0_44] : memref<800x128xbf16, #tpu.memory_space<vmem>>, vector<32x128xbf16>
    tpu.vector_store %arg9[%c512, %c0_44], %108 {strides = array<i32>} : memref<800x128xbf16, #tpu.memory_space<vmem>>, vector<32x128xbf16>,
    %c120_i32 = arith.constant 120 : i32
    %110 = tpu.dynamic_rotate %25 by %c120_i32 dim 1 : vector<32x128xf32>, i32 -> vector<32x128xf32>
    %111 = vector.broadcast %17 : vector<1x128xf32> to vector<32x128xf32>
    %112 = arith.mulf %110, %111 : vector<32x128xf32>
    %113 = arith.truncf %112 : vector<32x128xf32> to vector<32x128xbf16>
    %c544 = arith.constant 544 : index
    %c0_45 = arith.constant 0 : index
    %114 = vector.load %arg9[%c544, %c0_45] : memref<800x128xbf16, #tpu.memory_space<vmem>>, vector<32x128xbf16>
    tpu.vector_store %arg9[%c544, %c0_45], %113 {strides = array<i32>} : memref<800x128xbf16, #tpu.memory_space<vmem>>, vector<32x128xbf16>,
    %c119_i32 = arith.constant 119 : i32
    %115 = tpu.dynamic_rotate %25 by %c119_i32 dim 1 : vector<32x128xf32>, i32 -> vector<32x128xf32>
    %116 = vector.broadcast %18 : vector<1x128xf32> to vector<32x128xf32>
    %117 = arith.mulf %115, %116 : vector<32x128xf32>
    %118 = arith.truncf %117 : vector<32x128xf32> to vector<32x128xbf16>
    %c576 = arith.constant 576 : index
    %c0_46 = arith.constant 0 : index
    %119 = vector.load %arg9[%c576, %c0_46] : memref<800x128xbf16, #tpu.memory_space<vmem>>, vector<32x128xbf16>
    tpu.vector_store %arg9[%c576, %c0_46], %118 {strides = array<i32>} : memref<800x128xbf16, #tpu.memory_space<vmem>>, vector<32x128xbf16>,
    %c118_i32 = arith.constant 118 : i32
    %120 = tpu.dynamic_rotate %25 by %c118_i32 dim 1 : vector<32x128xf32>, i32 -> vector<32x128xf32>
    %121 = vector.broadcast %19 : vector<1x128xf32> to vector<32x128xf32>
    %122 = arith.mulf %120, %121 : vector<32x128xf32>
    %123 = arith.truncf %122 : vector<32x128xf32> to vector<32x128xbf16>
    %c608 = arith.constant 608 : index
    %c0_47 = arith.constant 0 : index
    %124 = vector.load %arg9[%c608, %c0_47] : memref<800x128xbf16, #tpu.memory_space<vmem>>, vector<32x128xbf16>
    tpu.vector_store %arg9[%c608, %c0_47], %123 {strides = array<i32>} : memref<800x128xbf16, #tpu.memory_space<vmem>>, vector<32x128xbf16>,
    %c114_i32 = arith.constant 114 : i32
    %125 = tpu.dynamic_rotate %25 by %c114_i32 dim 1 : vector<32x128xf32>, i32 -> vector<32x128xf32>
    %126 = vector.broadcast %20 : vector<1x128xf32> to vector<32x128xf32>
    %127 = arith.mulf %125, %126 : vector<32x128xf32>
    %128 = arith.truncf %127 : vector<32x128xf32> to vector<32x128xbf16>
    %c640 = arith.constant 640 : index
    %c0_48 = arith.constant 0 : index
    %129 = vector.load %arg9[%c640, %c0_48] : memref<800x128xbf16, #tpu.memory_space<vmem>>, vector<32x128xbf16>
    tpu.vector_store %arg9[%c640, %c0_48], %128 {strides = array<i32>} : memref<800x128xbf16, #tpu.memory_space<vmem>>, vector<32x128xbf16>,
    %c113_i32 = arith.constant 113 : i32
    %130 = tpu.dynamic_rotate %25 by %c113_i32 dim 1 : vector<32x128xf32>, i32 -> vector<32x128xf32>
    %131 = vector.broadcast %21 : vector<1x128xf32> to vector<32x128xf32>
    %132 = arith.mulf %130, %131 : vector<32x128xf32>
    %133 = arith.truncf %132 : vector<32x128xf32> to vector<32x128xbf16>
    %c672 = arith.constant 672 : index
    %c0_49 = arith.constant 0 : index
    %134 = vector.load %arg9[%c672, %c0_49] : memref<800x128xbf16, #tpu.memory_space<vmem>>, vector<32x128xbf16>
    tpu.vector_store %arg9[%c672, %c0_49], %133 {strides = array<i32>} : memref<800x128xbf16, #tpu.memory_space<vmem>>, vector<32x128xbf16>,
    %c112_i32 = arith.constant 112 : i32
    %135 = tpu.dynamic_rotate %25 by %c112_i32 dim 1 : vector<32x128xf32>, i32 -> vector<32x128xf32>
    %136 = vector.broadcast %22 : vector<1x128xf32> to vector<32x128xf32>
    %137 = arith.mulf %135, %136 : vector<32x128xf32>
    %138 = arith.truncf %137 : vector<32x128xf32> to vector<32x128xbf16>
    %c704 = arith.constant 704 : index
    %c0_50 = arith.constant 0 : index
    %139 = vector.load %arg9[%c704, %c0_50] : memref<800x128xbf16, #tpu.memory_space<vmem>>, vector<32x128xbf16>
    tpu.vector_store %arg9[%c704, %c0_50], %138 {strides = array<i32>} : memref<800x128xbf16, #tpu.memory_space<vmem>>, vector<32x128xbf16>,
    %c111_i32 = arith.constant 111 : i32
    %140 = tpu.dynamic_rotate %25 by %c111_i32 dim 1 : vector<32x128xf32>, i32 -> vector<32x128xf32>
    %141 = vector.broadcast %23 : vector<1x128xf32> to vector<32x128xf32>
    %142 = arith.mulf %140, %141 : vector<32x128xf32>
    %143 = arith.truncf %142 : vector<32x128xf32> to vector<32x128xbf16>
    %c736 = arith.constant 736 : index
    %c0_51 = arith.constant 0 : index
    %144 = vector.load %arg9[%c736, %c0_51] : memref<800x128xbf16, #tpu.memory_space<vmem>>, vector<32x128xbf16>
    tpu.vector_store %arg9[%c736, %c0_51], %143 {strides = array<i32>} : memref<800x128xbf16, #tpu.memory_space<vmem>>, vector<32x128xbf16>,
    %c110_i32 = arith.constant 110 : i32
    %145 = tpu.dynamic_rotate %25 by %c110_i32 dim 1 : vector<32x128xf32>, i32 -> vector<32x128xf32>
    %146 = vector.broadcast %24 : vector<1x128xf32> to vector<32x128xf32>
    %147 = arith.mulf %145, %146 : vector<32x128xf32>
    %148 = arith.truncf %147 : vector<32x128xf32> to vector<32x128xbf16>
    %c768 = arith.constant 768 : index
    %c0_52 = arith.constant 0 : index
    %149 = vector.load %arg9[%c768, %c0_52] : memref<800x128xbf16, #tpu.memory_space<vmem>>, vector<32x128xbf16>
    tpu.vector_store %arg9[%c768, %c0_52], %148 {strides = array<i32>} : memref<800x128xbf16, #tpu.memory_space<vmem>>, vector<32x128xbf16>,
    %c0_53 = arith.constant 0 : index
    %c0_54 = arith.constant 0 : index
    %150 = vector.load %arg2[%c0_53, %c0_54] : memref<32x800xbf16, #tpu.memory_space<vmem>>, vector<32x800xbf16>
    %c0_55 = arith.constant 0 : index
    %c0_56 = arith.constant 0 : index
    %151 = vector.load %arg9[%c0_55, %c0_56] : memref<800x128xbf16, #tpu.memory_space<vmem>>, vector<800x128xbf16>
    %cst = arith.constant dense<0.000000e+00> : vector<32x128xf32>
    %152 = tpu.matmul %150, %151, %cst {dimension_numbers = #tpu.dot_dimension_numbers<[1], [0], [0], [1], [0, 0, 1, 1], [], []>} : vector<32x800xbf16>, vector<800x128xbf16>, vector<32x128xf32> -> vector<32x128xf32>
    %c0_57 = arith.constant 0 : index
    %c0_58 = arith.constant 0 : index
    %153 = vector.load %arg3[%c0_57, %c0_58] : memref<32x128xf32, #tpu.memory_space<vmem>>, vector<32x128xf32>
    %154 = arith.addf %152, %153 : vector<32x128xf32>
    %c9_i32_59 = arith.constant 9 : i32
    %155 = tpu.dynamic_rotate %154 by %c9_i32_59 dim 1 : vector<32x128xf32>, i32 -> vector<32x128xf32>
    %156 = vector.broadcast %6 : vector<1x128xf32> to vector<32x128xf32>
    %157 = arith.mulf %155, %156 : vector<32x128xf32>
    %158 = arith.truncf %157 : vector<32x128xf32> to vector<32x128xbf16>
    %c0_60 = arith.constant 0 : index
    %c0_61 = arith.constant 0 : index
    %159 = vector.load %arg9[%c0_60, %c0_61] : memref<800x128xbf16, #tpu.memory_space<vmem>>, vector<32x128xbf16>
    tpu.vector_store %arg9[%c0_60, %c0_61], %158 {strides = array<i32>} : memref<800x128xbf16, #tpu.memory_space<vmem>>, vector<32x128xbf16>,
    %c8_i32_62 = arith.constant 8 : i32
    %160 = tpu.dynamic_rotate %154 by %c8_i32_62 dim 1 : vector<32x128xf32>, i32 -> vector<32x128xf32>
    %161 = vector.broadcast %7 : vector<1x128xf32> to vector<32x128xf32>
    %162 = arith.mulf %160, %161 : vector<32x128xf32>
    %163 = arith.truncf %162 : vector<32x128xf32> to vector<32x128xbf16>
    %c32_63 = arith.constant 32 : index
    %c0_64 = arith.constant 0 : index
    %164 = vector.load %arg9[%c32_63, %c0_64] : memref<800x128xbf16, #tpu.memory_space<vmem>>, vector<32x128xbf16>
    tpu.vector_store %arg9[%c32_63, %c0_64], %163 {strides = array<i32>} : memref<800x128xbf16, #tpu.memory_space<vmem>>, vector<32x128xbf16>,
    %c7_i32_65 = arith.constant 7 : i32
    %165 = tpu.dynamic_rotate %154 by %c7_i32_65 dim 1 : vector<32x128xf32>, i32 -> vector<32x128xf32>
    %166 = vector.broadcast %8 : vector<1x128xf32> to vector<32x128xf32>
    %167 = arith.mulf %165, %166 : vector<32x128xf32>
    %168 = arith.truncf %167 : vector<32x128xf32> to vector<32x128xbf16>
    %c64_66 = arith.constant 64 : index
    %c0_67 = arith.constant 0 : index
    %169 = vector.load %arg9[%c64_66, %c0_67] : memref<800x128xbf16, #tpu.memory_space<vmem>>, vector<32x128xbf16>
    tpu.vector_store %arg9[%c64_66, %c0_67], %168 {strides = array<i32>} : memref<800x128xbf16, #tpu.memory_space<vmem>>, vector<32x128xbf16>,
    %c1_i32_68 = arith.constant 1 : i32
    %170 = tpu.dynamic_rotate %154 by %c1_i32_68 dim 1 : vector<32x128xf32>, i32 -> vector<32x128xf32>
    %171 = vector.broadcast %11 : vector<1x128xf32> to vector<32x128xf32>
    %172 = arith.mulf %170, %171 : vector<32x128xf32>
    %173 = arith.truncf %172 : vector<32x128xf32> to vector<32x128xbf16>
    %c96_69 = arith.constant 96 : index
    %c0_70 = arith.constant 0 : index
    %174 = vector.load %arg9[%c96_69, %c0_70] : memref<800x128xbf16, #tpu.memory_space<vmem>>, vector<32x128xbf16>
    tpu.vector_store %arg9[%c96_69, %c0_70], %173 {strides = array<i32>} : memref<800x128xbf16, #tpu.memory_space<vmem>>, vector<32x128xbf16>,
    %175 = vector.broadcast %12 : vector<1x128xf32> to vector<32x128xf32>
    %176 = arith.mulf %154, %175 : vector<32x128xf32>
    %177 = arith.truncf %176 : vector<32x128xf32> to vector<32x128xbf16>
    %c128_71 = arith.constant 128 : index
    %c0_72 = arith.constant 0 : index
    %178 = vector.load %arg9[%c128_71, %c0_72] : memref<800x128xbf16, #tpu.memory_space<vmem>>, vector<32x128xbf16>
    tpu.vector_store %arg9[%c128_71, %c0_72], %177 {strides = array<i32>} : memref<800x128xbf16, #tpu.memory_space<vmem>>, vector<32x128xbf16>,
    %c127_i32_73 = arith.constant 127 : i32
    %179 = tpu.dynamic_rotate %154 by %c127_i32_73 dim 1 : vector<32x128xf32>, i32 -> vector<32x128xf32>
    %180 = vector.broadcast %13 : vector<1x128xf32> to vector<32x128xf32>
    %181 = arith.mulf %179, %180 : vector<32x128xf32>
    %182 = arith.truncf %181 : vector<32x128xf32> to vector<32x128xbf16>
    %c160_74 = arith.constant 160 : index
    %c0_75 = arith.constant 0 : index
    %183 = vector.load %arg9[%c160_74, %c0_75] : memref<800x128xbf16, #tpu.memory_space<vmem>>, vector<32x128xbf16>
    tpu.vector_store %arg9[%c160_74, %c0_75], %182 {strides = array<i32>} : memref<800x128xbf16, #tpu.memory_space<vmem>>, vector<32x128xbf16>,
    %c121_i32_76 = arith.constant 121 : i32
    %184 = tpu.dynamic_rotate %154 by %c121_i32_76 dim 1 : vector<32x128xf32>, i32 -> vector<32x128xf32>
    %185 = vector.broadcast %16 : vector<1x128xf32> to vector<32x128xf32>
    %186 = arith.mulf %184, %185 : vector<32x128xf32>
    %187 = arith.truncf %186 : vector<32x128xf32> to vector<32x128xbf16>
    %c192_77 = arith.constant 192 : index
    %c0_78 = arith.constant 0 : index
    %188 = vector.load %arg9[%c192_77, %c0_78] : memref<800x128xbf16, #tpu.memory_space<vmem>>, vector<32x128xbf16>
    tpu.vector_store %arg9[%c192_77, %c0_78], %187 {strides = array<i32>} : memref<800x128xbf16, #tpu.memory_space<vmem>>, vector<32x128xbf16>,
    %c120_i32_79 = arith.constant 120 : i32
    %189 = tpu.dynamic_rotate %154 by %c120_i32_79 dim 1 : vector<32x128xf32>, i32 -> vector<32x128xf32>
    %190 = vector.broadcast %17 : vector<1x128xf32> to vector<32x128xf32>
    %191 = arith.mulf %189, %190 : vector<32x128xf32>
    %192 = arith.truncf %191 : vector<32x128xf32> to vector<32x128xbf16>
    %c224_80 = arith.constant 224 : index
    %c0_81 = arith.constant 0 : index
    %193 = vector.load %arg9[%c224_80, %c0_81] : memref<800x128xbf16, #tpu.memory_space<vmem>>, vector<32x128xbf16>
    tpu.vector_store %arg9[%c224_80, %c0_81], %192 {strides = array<i32>} : memref<800x128xbf16, #tpu.memory_space<vmem>>, vector<32x128xbf16>,
    %c119_i32_82 = arith.constant 119 : i32
    %194 = tpu.dynamic_rotate %154 by %c119_i32_82 dim 1 : vector<32x128xf32>, i32 -> vector<32x128xf32>
    %195 = vector.broadcast %18 : vector<1x128xf32> to vector<32x128xf32>
    %196 = arith.mulf %194, %195 : vector<32x128xf32>
    %197 = arith.truncf %196 : vector<32x128xf32> to vector<32x128xbf16>
    %c256_83 = arith.constant 256 : index
    %c0_84 = arith.constant 0 : index
    %198 = vector.load %arg9[%c256_83, %c0_84] : memref<800x128xbf16, #tpu.memory_space<vmem>>, vector<32x128xbf16>
    tpu.vector_store %arg9[%c256_83, %c0_84], %197 {strides = array<i32>} : memref<800x128xbf16, #tpu.memory_space<vmem>>, vector<32x128xbf16>,
    %c0_85 = arith.constant 0 : index
    %c0_86 = arith.constant 0 : index
    %c0_87 = arith.constant 0 : index
    %199 = vector.load %arg4[%c0_85, %c0_86, %c0_87] : memref<4x32x288xbf16, #tpu.memory_space<vmem>>, vector<1x32x288xbf16>
    %200 = vector.shape_cast %199 : vector<1x32x288xbf16> to vector<32x288xbf16>
    %c0_88 = arith.constant 0 : index
    %c0_89 = arith.constant 0 : index
    %201 = vector.load %arg9[%c0_88, %c0_89] : memref<800x128xbf16, #tpu.memory_space<vmem>>, vector<288x128xbf16>
    %cst_90 = arith.constant dense<0.000000e+00> : vector<32x128xf32>
    %202 = tpu.matmul %200, %201, %cst_90 {dimension_numbers = #tpu.dot_dimension_numbers<[1], [0], [0], [1], [0, 0, 1, 1], [], []>} : vector<32x288xbf16>, vector<288x128xbf16>, vector<32x128xf32> -> vector<32x128xf32>
    %c0_91 = arith.constant 0 : index
    %c0_92 = arith.constant 0 : index
    %c0_93 = arith.constant 0 : index
    %203 = vector.load %arg5[%c0_91, %c0_92, %c0_93] : memref<4x32x128xf32, #tpu.memory_space<vmem>>, vector<1x32x128xf32>
    %204 = vector.shape_cast %203 : vector<1x32x128xf32> to vector<32x128xf32>
    %205 = arith.addf %202, %204 : vector<32x128xf32>
    %cst_94 = arith.constant 0.000000e+00 : f32
    %206 = vector.broadcast %cst_94 : f32 to vector<32x128xf32>
    %207 = arith.maximumf %205, %206 : vector<32x128xf32>
    %c9_i32_95 = arith.constant 9 : i32
    %208 = tpu.dynamic_rotate %207 by %c9_i32_95 dim 1 : vector<32x128xf32>, i32 -> vector<32x128xf32>
    %209 = vector.broadcast %6 : vector<1x128xf32> to vector<32x128xf32>
    %210 = arith.mulf %208, %209 : vector<32x128xf32>
    %211 = arith.truncf %210 : vector<32x128xf32> to vector<32x128xbf16>
    %c0_96 = arith.constant 0 : index
    %c0_97 = arith.constant 0 : index
    %212 = vector.load %arg9[%c0_96, %c0_97] : memref<800x128xbf16, #tpu.memory_space<vmem>>, vector<32x128xbf16>
    tpu.vector_store %arg9[%c0_96, %c0_97], %211 {strides = array<i32>} : memref<800x128xbf16, #tpu.memory_space<vmem>>, vector<32x128xbf16>,
    %c8_i32_98 = arith.constant 8 : i32
    %213 = tpu.dynamic_rotate %207 by %c8_i32_98 dim 1 : vector<32x128xf32>, i32 -> vector<32x128xf32>
    %214 = vector.broadcast %7 : vector<1x128xf32> to vector<32x128xf32>
    %215 = arith.mulf %213, %214 : vector<32x128xf32>
    %216 = arith.truncf %215 : vector<32x128xf32> to vector<32x128xbf16>
    %c32_99 = arith.constant 32 : index
    %c0_100 = arith.constant 0 : index
    %217 = vector.load %arg9[%c32_99, %c0_100] : memref<800x128xbf16, #tpu.memory_space<vmem>>, vector<32x128xbf16>
    tpu.vector_store %arg9[%c32_99, %c0_100], %216 {strides = array<i32>} : memref<800x128xbf16, #tpu.memory_space<vmem>>, vector<32x128xbf16>,
    %c7_i32_101 = arith.constant 7 : i32
    %218 = tpu.dynamic_rotate %207 by %c7_i32_101 dim 1 : vector<32x128xf32>, i32 -> vector<32x128xf32>
    %219 = vector.broadcast %8 : vector<1x128xf32> to vector<32x128xf32>
    %220 = arith.mulf %218, %219 : vector<32x128xf32>
    %221 = arith.truncf %220 : vector<32x128xf32> to vector<32x128xbf16>
    %c64_102 = arith.constant 64 : index
    %c0_103 = arith.constant 0 : index
    %222 = vector.load %arg9[%c64_102, %c0_103] : memref<800x128xbf16, #tpu.memory_space<vmem>>, vector<32x128xbf16>
    tpu.vector_store %arg9[%c64_102, %c0_103], %221 {strides = array<i32>} : memref<800x128xbf16, #tpu.memory_space<vmem>>, vector<32x128xbf16>,
    %c1_i32_104 = arith.constant 1 : i32
    %223 = tpu.dynamic_rotate %207 by %c1_i32_104 dim 1 : vector<32x128xf32>, i32 -> vector<32x128xf32>
    %224 = vector.broadcast %11 : vector<1x128xf32> to vector<32x128xf32>
    %225 = arith.mulf %223, %224 : vector<32x128xf32>
    %226 = arith.truncf %225 : vector<32x128xf32> to vector<32x128xbf16>
    %c96_105 = arith.constant 96 : index
    %c0_106 = arith.constant 0 : index
    %227 = vector.load %arg9[%c96_105, %c0_106] : memref<800x128xbf16, #tpu.memory_space<vmem>>, vector<32x128xbf16>
    tpu.vector_store %arg9[%c96_105, %c0_106], %226 {strides = array<i32>} : memref<800x128xbf16, #tpu.memory_space<vmem>>, vector<32x128xbf16>,
    %228 = vector.broadcast %12 : vector<1x128xf32> to vector<32x128xf32>
    %229 = arith.mulf %207, %228 : vector<32x128xf32>
    %230 = arith.truncf %229 : vector<32x128xf32> to vector<32x128xbf16>
    %c128_107 = arith.constant 128 : index
    %c0_108 = arith.constant 0 : index
    %231 = vector.load %arg9[%c128_107, %c0_108] : memref<800x128xbf16, #tpu.memory_space<vmem>>, vector<32x128xbf16>
    tpu.vector_store %arg9[%c128_107, %c0_108], %230 {strides = array<i32>} : memref<800x128xbf16, #tpu.memory_space<vmem>>, vector<32x128xbf16>,
    %c127_i32_109 = arith.constant 127 : i32
    %232 = tpu.dynamic_rotate %207 by %c127_i32_109 dim 1 : vector<32x128xf32>, i32 -> vector<32x128xf32>
    %233 = vector.broadcast %13 : vector<1x128xf32> to vector<32x128xf32>
    %234 = arith.mulf %232, %233 : vector<32x128xf32>
    %235 = arith.truncf %234 : vector<32x128xf32> to vector<32x128xbf16>
    %c160_110 = arith.constant 160 : index
    %c0_111 = arith.constant 0 : index
    %236 = vector.load %arg9[%c160_110, %c0_111] : memref<800x128xbf16, #tpu.memory_space<vmem>>, vector<32x128xbf16>
    tpu.vector_store %arg9[%c160_110, %c0_111], %235 {strides = array<i32>} : memref<800x128xbf16, #tpu.memory_space<vmem>>, vector<32x128xbf16>,
    %c121_i32_112 = arith.constant 121 : i32
    %237 = tpu.dynamic_rotate %207 by %c121_i32_112 dim 1 : vector<32x128xf32>, i32 -> vector<32x128xf32>
    %238 = vector.broadcast %16 : vector<1x128xf32> to vector<32x128xf32>
    %239 = arith.mulf %237, %238 : vector<32x128xf32>
    %240 = arith.truncf %239 : vector<32x128xf32> to vector<32x128xbf16>
    %c192_113 = arith.constant 192 : index
    %c0_114 = arith.constant 0 : index
    %241 = vector.load %arg9[%c192_113, %c0_114] : memref<800x128xbf16, #tpu.memory_space<vmem>>, vector<32x128xbf16>
    tpu.vector_store %arg9[%c192_113, %c0_114], %240 {strides = array<i32>} : memref<800x128xbf16, #tpu.memory_space<vmem>>, vector<32x128xbf16>,
    %c120_i32_115 = arith.constant 120 : i32
    %242 = tpu.dynamic_rotate %207 by %c120_i32_115 dim 1 : vector<32x128xf32>, i32 -> vector<32x128xf32>
    %243 = vector.broadcast %17 : vector<1x128xf32> to vector<32x128xf32>
    %244 = arith.mulf %242, %243 : vector<32x128xf32>
    %245 = arith.truncf %244 : vector<32x128xf32> to vector<32x128xbf16>
    %c224_116 = arith.constant 224 : index
    %c0_117 = arith.constant 0 : index
    %246 = vector.load %arg9[%c224_116, %c0_117] : memref<800x128xbf16, #tpu.memory_space<vmem>>, vector<32x128xbf16>
    tpu.vector_store %arg9[%c224_116, %c0_117], %245 {strides = array<i32>} : memref<800x128xbf16, #tpu.memory_space<vmem>>, vector<32x128xbf16>,
    %c119_i32_118 = arith.constant 119 : i32
    %247 = tpu.dynamic_rotate %207 by %c119_i32_118 dim 1 : vector<32x128xf32>, i32 -> vector<32x128xf32>
    %248 = vector.broadcast %18 : vector<1x128xf32> to vector<32x128xf32>
    %249 = arith.mulf %247, %248 : vector<32x128xf32>
    %250 = arith.truncf %249 : vector<32x128xf32> to vector<32x128xbf16>
    %c256_119 = arith.constant 256 : index
    %c0_120 = arith.constant 0 : index
    %251 = vector.load %arg9[%c256_119, %c0_120] : memref<800x128xbf16, #tpu.memory_space<vmem>>, vector<32x128xbf16>
    tpu.vector_store %arg9[%c256_119, %c0_120], %250 {strides = array<i32>} : memref<800x128xbf16, #tpu.memory_space<vmem>>, vector<32x128xbf16>,
    %c1_121 = arith.constant 1 : index
    %c0_122 = arith.constant 0 : index
    %c0_123 = arith.constant 0 : index
    %252 = vector.load %arg4[%c1_121, %c0_122, %c0_123] : memref<4x32x288xbf16, #tpu.memory_space<vmem>>, vector<1x32x288xbf16>
    %253 = vector.shape_cast %252 : vector<1x32x288xbf16> to vector<32x288xbf16>
    %c0_124 = arith.constant 0 : index
    %c0_125 = arith.constant 0 : index
    %254 = vector.load %arg9[%c0_124, %c0_125] : memref<800x128xbf16, #tpu.memory_space<vmem>>, vector<288x128xbf16>
    %cst_126 = arith.constant dense<0.000000e+00> : vector<32x128xf32>
    %255 = tpu.matmul %253, %254, %cst_126 {dimension_numbers = #tpu.dot_dimension_numbers<[1], [0], [0], [1], [0, 0, 1, 1], [], []>} : vector<32x288xbf16>, vector<288x128xbf16>, vector<32x128xf32> -> vector<32x128xf32>
    %c1_127 = arith.constant 1 : index
    %c0_128 = arith.constant 0 : index
    %c0_129 = arith.constant 0 : index
    %256 = vector.load %arg5[%c1_127, %c0_128, %c0_129] : memref<4x32x128xf32, #tpu.memory_space<vmem>>, vector<1x32x128xf32>
    %257 = vector.shape_cast %256 : vector<1x32x128xf32> to vector<32x128xf32>
    %258 = arith.addf %255, %257 : vector<32x128xf32>
    %cst_130 = arith.constant 0.000000e+00 : f32
    %259 = vector.broadcast %cst_130 : f32 to vector<32x128xf32>
    %260 = arith.maximumf %258, %259 : vector<32x128xf32>
    %c9_i32_131 = arith.constant 9 : i32
    %261 = tpu.dynamic_rotate %260 by %c9_i32_131 dim 1 : vector<32x128xf32>, i32 -> vector<32x128xf32>
    %262 = vector.broadcast %6 : vector<1x128xf32> to vector<32x128xf32>
    %263 = arith.mulf %261, %262 : vector<32x128xf32>
    %264 = arith.truncf %263 : vector<32x128xf32> to vector<32x128xbf16>
    %c0_132 = arith.constant 0 : index
    %c0_133 = arith.constant 0 : index
    %265 = vector.load %arg9[%c0_132, %c0_133] : memref<800x128xbf16, #tpu.memory_space<vmem>>, vector<32x128xbf16>
    tpu.vector_store %arg9[%c0_132, %c0_133], %264 {strides = array<i32>} : memref<800x128xbf16, #tpu.memory_space<vmem>>, vector<32x128xbf16>,
    %c8_i32_134 = arith.constant 8 : i32
    %266 = tpu.dynamic_rotate %260 by %c8_i32_134 dim 1 : vector<32x128xf32>, i32 -> vector<32x128xf32>
    %267 = vector.broadcast %7 : vector<1x128xf32> to vector<32x128xf32>
    %268 = arith.mulf %266, %267 : vector<32x128xf32>
    %269 = arith.truncf %268 : vector<32x128xf32> to vector<32x128xbf16>
    %c32_135 = arith.constant 32 : index
    %c0_136 = arith.constant 0 : index
    %270 = vector.load %arg9[%c32_135, %c0_136] : memref<800x128xbf16, #tpu.memory_space<vmem>>, vector<32x128xbf16>
    tpu.vector_store %arg9[%c32_135, %c0_136], %269 {strides = array<i32>} : memref<800x128xbf16, #tpu.memory_space<vmem>>, vector<32x128xbf16>,
    %c7_i32_137 = arith.constant 7 : i32
    %271 = tpu.dynamic_rotate %260 by %c7_i32_137 dim 1 : vector<32x128xf32>, i32 -> vector<32x128xf32>
    %272 = vector.broadcast %8 : vector<1x128xf32> to vector<32x128xf32>
    %273 = arith.mulf %271, %272 : vector<32x128xf32>
    %274 = arith.truncf %273 : vector<32x128xf32> to vector<32x128xbf16>
    %c64_138 = arith.constant 64 : index
    %c0_139 = arith.constant 0 : index
    %275 = vector.load %arg9[%c64_138, %c0_139] : memref<800x128xbf16, #tpu.memory_space<vmem>>, vector<32x128xbf16>
    tpu.vector_store %arg9[%c64_138, %c0_139], %274 {strides = array<i32>} : memref<800x128xbf16, #tpu.memory_space<vmem>>, vector<32x128xbf16>,
    %c1_i32_140 = arith.constant 1 : i32
    %276 = tpu.dynamic_rotate %260 by %c1_i32_140 dim 1 : vector<32x128xf32>, i32 -> vector<32x128xf32>
    %277 = vector.broadcast %11 : vector<1x128xf32> to vector<32x128xf32>
    %278 = arith.mulf %276, %277 : vector<32x128xf32>
    %279 = arith.truncf %278 : vector<32x128xf32> to vector<32x128xbf16>
    %c96_141 = arith.constant 96 : index
    %c0_142 = arith.constant 0 : index
    %280 = vector.load %arg9[%c96_141, %c0_142] : memref<800x128xbf16, #tpu.memory_space<vmem>>, vector<32x128xbf16>
    tpu.vector_store %arg9[%c96_141, %c0_142], %279 {strides = array<i32>} : memref<800x128xbf16, #tpu.memory_space<vmem>>, vector<32x128xbf16>,
    %281 = vector.broadcast %12 : vector<1x128xf32> to vector<32x128xf32>
    %282 = arith.mulf %260, %281 : vector<32x128xf32>
    %283 = arith.truncf %282 : vector<32x128xf32> to vector<32x128xbf16>
    %c128_143 = arith.constant 128 : index
    %c0_144 = arith.constant 0 : index
    %284 = vector.load %arg9[%c128_143, %c0_144] : memref<800x128xbf16, #tpu.memory_space<vmem>>, vector<32x128xbf16>
    tpu.vector_store %arg9[%c128_143, %c0_144], %283 {strides = array<i32>} : memref<800x128xbf16, #tpu.memory_space<vmem>>, vector<32x128xbf16>,
    %c127_i32_145 = arith.constant 127 : i32
    %285 = tpu.dynamic_rotate %260 by %c127_i32_145 dim 1 : vector<32x128xf32>, i32 -> vector<32x128xf32>
    %286 = vector.broadcast %13 : vector<1x128xf32> to vector<32x128xf32>
    %287 = arith.mulf %285, %286 : vector<32x128xf32>
    %288 = arith.truncf %287 : vector<32x128xf32> to vector<32x128xbf16>
    %c160_146 = arith.constant 160 : index
    %c0_147 = arith.constant 0 : index
    %289 = vector.load %arg9[%c160_146, %c0_147] : memref<800x128xbf16, #tpu.memory_space<vmem>>, vector<32x128xbf16>
    tpu.vector_store %arg9[%c160_146, %c0_147], %288 {strides = array<i32>} : memref<800x128xbf16, #tpu.memory_space<vmem>>, vector<32x128xbf16>,
    %c121_i32_148 = arith.constant 121 : i32
    %290 = tpu.dynamic_rotate %260 by %c121_i32_148 dim 1 : vector<32x128xf32>, i32 -> vector<32x128xf32>
    %291 = vector.broadcast %16 : vector<1x128xf32> to vector<32x128xf32>
    %292 = arith.mulf %290, %291 : vector<32x128xf32>
    %293 = arith.truncf %292 : vector<32x128xf32> to vector<32x128xbf16>
    %c192_149 = arith.constant 192 : index
    %c0_150 = arith.constant 0 : index
    %294 = vector.load %arg9[%c192_149, %c0_150] : memref<800x128xbf16, #tpu.memory_space<vmem>>, vector<32x128xbf16>
    tpu.vector_store %arg9[%c192_149, %c0_150], %293 {strides = array<i32>} : memref<800x128xbf16, #tpu.memory_space<vmem>>, vector<32x128xbf16>,
    %c120_i32_151 = arith.constant 120 : i32
    %295 = tpu.dynamic_rotate %260 by %c120_i32_151 dim 1 : vector<32x128xf32>, i32 -> vector<32x128xf32>
    %296 = vector.broadcast %17 : vector<1x128xf32> to vector<32x128xf32>
    %297 = arith.mulf %295, %296 : vector<32x128xf32>
    %298 = arith.truncf %297 : vector<32x128xf32> to vector<32x128xbf16>
    %c224_152 = arith.constant 224 : index
    %c0_153 = arith.constant 0 : index
    %299 = vector.load %arg9[%c224_152, %c0_153] : memref<800x128xbf16, #tpu.memory_space<vmem>>, vector<32x128xbf16>
    tpu.vector_store %arg9[%c224_152, %c0_153], %298 {strides = array<i32>} : memref<800x128xbf16, #tpu.memory_space<vmem>>, vector<32x128xbf16>,
    %c119_i32_154 = arith.constant 119 : i32
    %300 = tpu.dynamic_rotate %260 by %c119_i32_154 dim 1 : vector<32x128xf32>, i32 -> vector<32x128xf32>
    %301 = vector.broadcast %18 : vector<1x128xf32> to vector<32x128xf32>
    %302 = arith.mulf %300, %301 : vector<32x128xf32>
    %303 = arith.truncf %302 : vector<32x128xf32> to vector<32x128xbf16>
    %c256_155 = arith.constant 256 : index
    %c0_156 = arith.constant 0 : index
    %304 = vector.load %arg9[%c256_155, %c0_156] : memref<800x128xbf16, #tpu.memory_space<vmem>>, vector<32x128xbf16>
    tpu.vector_store %arg9[%c256_155, %c0_156], %303 {strides = array<i32>} : memref<800x128xbf16, #tpu.memory_space<vmem>>, vector<32x128xbf16>,
    %c2_157 = arith.constant 2 : index
    %c0_158 = arith.constant 0 : index
    %c0_159 = arith.constant 0 : index
    %305 = vector.load %arg4[%c2_157, %c0_158, %c0_159] : memref<4x32x288xbf16, #tpu.memory_space<vmem>>, vector<1x32x288xbf16>
    %306 = vector.shape_cast %305 : vector<1x32x288xbf16> to vector<32x288xbf16>
    %c0_160 = arith.constant 0 : index
    %c0_161 = arith.constant 0 : index
    %307 = vector.load %arg9[%c0_160, %c0_161] : memref<800x128xbf16, #tpu.memory_space<vmem>>, vector<288x128xbf16>
    %cst_162 = arith.constant dense<0.000000e+00> : vector<32x128xf32>
    %308 = tpu.matmul %306, %307, %cst_162 {dimension_numbers = #tpu.dot_dimension_numbers<[1], [0], [0], [1], [0, 0, 1, 1], [], []>} : vector<32x288xbf16>, vector<288x128xbf16>, vector<32x128xf32> -> vector<32x128xf32>
    %c2_163 = arith.constant 2 : index
    %c0_164 = arith.constant 0 : index
    %c0_165 = arith.constant 0 : index
    %309 = vector.load %arg5[%c2_163, %c0_164, %c0_165] : memref<4x32x128xf32, #tpu.memory_space<vmem>>, vector<1x32x128xf32>
    %310 = vector.shape_cast %309 : vector<1x32x128xf32> to vector<32x128xf32>
    %311 = arith.addf %308, %310 : vector<32x128xf32>
    %cst_166 = arith.constant 0.000000e+00 : f32
    %312 = vector.broadcast %cst_166 : f32 to vector<32x128xf32>
    %313 = arith.maximumf %311, %312 : vector<32x128xf32>
    %c9_i32_167 = arith.constant 9 : i32
    %314 = tpu.dynamic_rotate %313 by %c9_i32_167 dim 1 : vector<32x128xf32>, i32 -> vector<32x128xf32>
    %315 = vector.broadcast %6 : vector<1x128xf32> to vector<32x128xf32>
    %316 = arith.mulf %314, %315 : vector<32x128xf32>
    %317 = arith.truncf %316 : vector<32x128xf32> to vector<32x128xbf16>
    %c0_168 = arith.constant 0 : index
    %c0_169 = arith.constant 0 : index
    %318 = vector.load %arg9[%c0_168, %c0_169] : memref<800x128xbf16, #tpu.memory_space<vmem>>, vector<32x128xbf16>
    tpu.vector_store %arg9[%c0_168, %c0_169], %317 {strides = array<i32>} : memref<800x128xbf16, #tpu.memory_space<vmem>>, vector<32x128xbf16>,
    %c8_i32_170 = arith.constant 8 : i32
    %319 = tpu.dynamic_rotate %313 by %c8_i32_170 dim 1 : vector<32x128xf32>, i32 -> vector<32x128xf32>
    %320 = vector.broadcast %7 : vector<1x128xf32> to vector<32x128xf32>
    %321 = arith.mulf %319, %320 : vector<32x128xf32>
    %322 = arith.truncf %321 : vector<32x128xf32> to vector<32x128xbf16>
    %c32_171 = arith.constant 32 : index
    %c0_172 = arith.constant 0 : index
    %323 = vector.load %arg9[%c32_171, %c0_172] : memref<800x128xbf16, #tpu.memory_space<vmem>>, vector<32x128xbf16>
    tpu.vector_store %arg9[%c32_171, %c0_172], %322 {strides = array<i32>} : memref<800x128xbf16, #tpu.memory_space<vmem>>, vector<32x128xbf16>,
    %c7_i32_173 = arith.constant 7 : i32
    %324 = tpu.dynamic_rotate %313 by %c7_i32_173 dim 1 : vector<32x128xf32>, i32 -> vector<32x128xf32>
    %325 = vector.broadcast %8 : vector<1x128xf32> to vector<32x128xf32>
    %326 = arith.mulf %324, %325 : vector<32x128xf32>
    %327 = arith.truncf %326 : vector<32x128xf32> to vector<32x128xbf16>
    %c64_174 = arith.constant 64 : index
    %c0_175 = arith.constant 0 : index
    %328 = vector.load %arg9[%c64_174, %c0_175] : memref<800x128xbf16, #tpu.memory_space<vmem>>, vector<32x128xbf16>
    tpu.vector_store %arg9[%c64_174, %c0_175], %327 {strides = array<i32>} : memref<800x128xbf16, #tpu.memory_space<vmem>>, vector<32x128xbf16>,
    %c1_i32_176 = arith.constant 1 : i32
    %329 = tpu.dynamic_rotate %313 by %c1_i32_176 dim 1 : vector<32x128xf32>, i32 -> vector<32x128xf32>
    %330 = vector.broadcast %11 : vector<1x128xf32> to vector<32x128xf32>
    %331 = arith.mulf %329, %330 : vector<32x128xf32>
    %332 = arith.truncf %331 : vector<32x128xf32> to vector<32x128xbf16>
    %c96_177 = arith.constant 96 : index
    %c0_178 = arith.constant 0 : index
    %333 = vector.load %arg9[%c96_177, %c0_178] : memref<800x128xbf16, #tpu.memory_space<vmem>>, vector<32x128xbf16>
    tpu.vector_store %arg9[%c96_177, %c0_178], %332 {strides = array<i32>} : memref<800x128xbf16, #tpu.memory_space<vmem>>, vector<32x128xbf16>,
    %334 = vector.broadcast %12 : vector<1x128xf32> to vector<32x128xf32>
    %335 = arith.mulf %313, %334 : vector<32x128xf32>
    %336 = arith.truncf %335 : vector<32x128xf32> to vector<32x128xbf16>
    %c128_179 = arith.constant 128 : index
    %c0_180 = arith.constant 0 : index
    %337 = vector.load %arg9[%c128_179, %c0_180] : memref<800x128xbf16, #tpu.memory_space<vmem>>, vector<32x128xbf16>
    tpu.vector_store %arg9[%c128_179, %c0_180], %336 {strides = array<i32>} : memref<800x128xbf16, #tpu.memory_space<vmem>>, vector<32x128xbf16>,
    %c127_i32_181 = arith.constant 127 : i32
    %338 = tpu.dynamic_rotate %313 by %c127_i32_181 dim 1 : vector<32x128xf32>, i32 -> vector<32x128xf32>
    %339 = vector.broadcast %13 : vector<1x128xf32> to vector<32x128xf32>
    %340 = arith.mulf %338, %339 : vector<32x128xf32>
    %341 = arith.truncf %340 : vector<32x128xf32> to vector<32x128xbf16>
    %c160_182 = arith.constant 160 : index
    %c0_183 = arith.constant 0 : index
    %342 = vector.load %arg9[%c160_182, %c0_183] : memref<800x128xbf16, #tpu.memory_space<vmem>>, vector<32x128xbf16>
    tpu.vector_store %arg9[%c160_182, %c0_183], %341 {strides = array<i32>} : memref<800x128xbf16, #tpu.memory_space<vmem>>, vector<32x128xbf16>,
    %c121_i32_184 = arith.constant 121 : i32
    %343 = tpu.dynamic_rotate %313 by %c121_i32_184 dim 1 : vector<32x128xf32>, i32 -> vector<32x128xf32>
    %344 = vector.broadcast %16 : vector<1x128xf32> to vector<32x128xf32>
    %345 = arith.mulf %343, %344 : vector<32x128xf32>
    %346 = arith.truncf %345 : vector<32x128xf32> to vector<32x128xbf16>
    %c192_185 = arith.constant 192 : index
    %c0_186 = arith.constant 0 : index
    %347 = vector.load %arg9[%c192_185, %c0_186] : memref<800x128xbf16, #tpu.memory_space<vmem>>, vector<32x128xbf16>
    tpu.vector_store %arg9[%c192_185, %c0_186], %346 {strides = array<i32>} : memref<800x128xbf16, #tpu.memory_space<vmem>>, vector<32x128xbf16>,
    %c120_i32_187 = arith.constant 120 : i32
    %348 = tpu.dynamic_rotate %313 by %c120_i32_187 dim 1 : vector<32x128xf32>, i32 -> vector<32x128xf32>
    %349 = vector.broadcast %17 : vector<1x128xf32> to vector<32x128xf32>
    %350 = arith.mulf %348, %349 : vector<32x128xf32>
    %351 = arith.truncf %350 : vector<32x128xf32> to vector<32x128xbf16>
    %c224_188 = arith.constant 224 : index
    %c0_189 = arith.constant 0 : index
    %352 = vector.load %arg9[%c224_188, %c0_189] : memref<800x128xbf16, #tpu.memory_space<vmem>>, vector<32x128xbf16>
    tpu.vector_store %arg9[%c224_188, %c0_189], %351 {strides = array<i32>} : memref<800x128xbf16, #tpu.memory_space<vmem>>, vector<32x128xbf16>,
    %c119_i32_190 = arith.constant 119 : i32
    %353 = tpu.dynamic_rotate %313 by %c119_i32_190 dim 1 : vector<32x128xf32>, i32 -> vector<32x128xf32>
    %354 = vector.broadcast %18 : vector<1x128xf32> to vector<32x128xf32>
    %355 = arith.mulf %353, %354 : vector<32x128xf32>
    %356 = arith.truncf %355 : vector<32x128xf32> to vector<32x128xbf16>
    %c256_191 = arith.constant 256 : index
    %c0_192 = arith.constant 0 : index
    %357 = vector.load %arg9[%c256_191, %c0_192] : memref<800x128xbf16, #tpu.memory_space<vmem>>, vector<32x128xbf16>
    tpu.vector_store %arg9[%c256_191, %c0_192], %356 {strides = array<i32>} : memref<800x128xbf16, #tpu.memory_space<vmem>>, vector<32x128xbf16>,
    %c3_193 = arith.constant 3 : index
    %c0_194 = arith.constant 0 : index
    %c0_195 = arith.constant 0 : index
    %358 = vector.load %arg4[%c3_193, %c0_194, %c0_195] : memref<4x32x288xbf16, #tpu.memory_space<vmem>>, vector<1x32x288xbf16>
    %359 = vector.shape_cast %358 : vector<1x32x288xbf16> to vector<32x288xbf16>
    %c0_196 = arith.constant 0 : index
    %c0_197 = arith.constant 0 : index
    %360 = vector.load %arg9[%c0_196, %c0_197] : memref<800x128xbf16, #tpu.memory_space<vmem>>, vector<288x128xbf16>
    %cst_198 = arith.constant dense<0.000000e+00> : vector<32x128xf32>
    %361 = tpu.matmul %359, %360, %cst_198 {dimension_numbers = #tpu.dot_dimension_numbers<[1], [0], [0], [1], [0, 0, 1, 1], [], []>} : vector<32x288xbf16>, vector<288x128xbf16>, vector<32x128xf32> -> vector<32x128xf32>
    %c3_199 = arith.constant 3 : index
    %c0_200 = arith.constant 0 : index
    %c0_201 = arith.constant 0 : index
    %362 = vector.load %arg5[%c3_199, %c0_200, %c0_201] : memref<4x32x128xf32, #tpu.memory_space<vmem>>, vector<1x32x128xf32>
    %363 = vector.shape_cast %362 : vector<1x32x128xf32> to vector<32x128xf32>
    %364 = arith.addf %361, %363 : vector<32x128xf32>
    %cst_202 = arith.constant 0.000000e+00 : f32
    %365 = vector.broadcast %cst_202 : f32 to vector<32x128xf32>
    %366 = arith.maximumf %364, %365 : vector<32x128xf32>
    %c0_203 = arith.constant 0 : index
    %c0_204 = arith.constant 0 : index
    %367 = vector.load %arg6[%c0_203, %c0_204] : memref<8x32xbf16, #tpu.memory_space<vmem>>, vector<8x32xbf16>
    %368 = arith.truncf %366 : vector<32x128xf32> to vector<32x128xbf16>
    %cst_205 = arith.constant dense<0.000000e+00> : vector<8x128xf32>
    %369 = tpu.matmul %367, %368, %cst_205 {dimension_numbers = #tpu.dot_dimension_numbers<[1], [0], [0], [1], [0, 0, 1, 1], [], []>} : vector<8x32xbf16>, vector<32x128xbf16>, vector<8x128xf32> -> vector<8x128xf32>
    %c0_206 = arith.constant 0 : index
    %c0_207 = arith.constant 0 : index
    %370 = vector.load %arg7[%c0_206, %c0_207] : memref<8x128xf32, #tpu.memory_space<vmem>>, vector<8x128xf32>
    %371 = arith.addf %369, %370 : vector<8x128xf32>
    %372 = math.tanh %371 : vector<8x128xf32>
    %c0_208 = arith.constant 0 : index
    %c0_209 = arith.constant 0 : index
    %373 = vector.load %arg8[%c0_208, %c0_209] : memref<8x128xf32, #tpu.memory_space<vmem>>, vector<8x128xf32>
    tpu.vector_store %arg8[%c0_208, %c0_209], %372 {strides = array<i32>} : memref<8x128xf32, #tpu.memory_space<vmem>>, vector<8x128xf32>,
    return
  }
}

</mosaic_0001>

<bundles_post_ra>
// kernel: squeeze.1
= control target key start
LH: loop header
LB: loop body
LE: loop exit
PB: predicated region body
PF: predicated region fallthrough
CT: control target
= control target key end

     0   :  { %s197_s0 = inlined_call_operand.vmem [shape: f32[128], index: 0, kind: input, shape index: {}]   ;;  %s198_s1 = inlined_call_operand.hbm [shape: f32[2,1,8,8], index: 1, kind: output, shape index: {}]  }
   0x1   :  { %v6_v0 = vld [vmem:[%s197_s0] sm:$0x1] }
   0x2   :  { %7 = vst [vmem:[#allocation2] sm:$0x1] %v6_v0 }
   0x3   :  { %2 = vsyncpa [#allocation1], 0  ;;  %s149_s0 = smov 120   ;;  %s150_s8 = smov 104   ;;  %vm9_vm0 = vcmask 64512  }
   0x4   :  { %s151_s9 = smov 112   ;;  %s152_s10 = smov 96  }
   0x5   :  { %s153_s11 = smov 88   ;;  %s154_s12 = smov 80  }
   0x6   :  { %s155_s13 = smov 72   ;;  %s156_s14 = smov 64  }
   0x7   :  { %s157_s15 = smov 56   ;;  %s158_s16 = smov 48  }
   0x8   :  { %s159_s17 = smov 40   ;;  %s160_s18 = smov 32  }
   0x9   :  { %v11_v1 = vld [vmem:[#allocation2] sm:$0x1]   ;;  %s161_s19 = smov 24   ;;  %s162_s20 = smov 16  }
   0xa   :  { %v23_v2 = vld [vmem:[#allocation2] sm:$0x1]   ;;  %12 = vrot.lane.b32.xlu0 %v11_v1, %s149_s0  ;;  %s163_s21 = smov 8   ;;  %s164_s22 = smov [#allocation0]  }
   0xb   :  { %24 = vrot.lane.b32.xlu1 %v23_v2, %s150_s8  ;;  %v17_v3 = vld [vmem:[#allocation2] sm:$0x1]   ;;  %s105_s23 = sshll.u32 %s164_s22, 4  ;;  %s106_s23 = int_to_ptr.vmem [resolvable:$true] %s105_s23 }
   0xc   :  { %v29_v4 = vld [vmem:[#allocation2] sm:$0x1]   ;;  %s127_s24 = scalar_lea.vmem %s106_s23, 256  ;;  %p132_p1 = scmp.lt.s32.totalorder %s106_s23, %s106_s23 }
   0xd   :  { %v35_v5 = vld [vmem:[#allocation2] sm:$0x1]   ;;  %p128_p0 = scmp.ne.s32.totalorder %s106_s23, %s127_s24  ;;  %p133_p2 = scmp.lt.s32.totalorder %s127_s24, %s127_s24 }
   0xe   :  { %18 = vrot.lane.b32.xlu0 %v17_v3, %s151_s9  ;;  %v41_v6 = vld [vmem:[#allocation2] sm:$0x1]  }
   0xf   :  { %30 = vrot.lane.b32.xlu1 %v29_v4, %s152_s10  ;;  %v47_v7 = vld [vmem:[#allocation2] sm:$0x1]   ;;  %p134_p3 = por %p133_p2, %p132_p1 }
  0x10   :  { %v53_v8 = vld [vmem:[#allocation2] sm:$0x1]  }
  0x11   :  { %v59_v9 = vld [vmem:[#allocation2] sm:$0x1]   ;;  %p135_p4 = pnand %p134_p3, %p128_p0 }
  0x12   :  { %36 = vrot.lane.b32.xlu0 %v35_v5, %s153_s11  ;;  %v65_v10 = vld [vmem:[#allocation2] sm:$0x1]  }
  0x13   :  { %42 = vrot.lane.b32.xlu1 %v41_v6, %s154_s12  ;;  %v8_v11 = vld [vmem:[#allocation2] sm:$0x1]  }
  0x14   :  { %10 = vst.msk [vmem:[#allocation0] sm:$0x1] %vm9_vm0, %v8_v11   ;;  %v71_v12 = vld [vmem:[#allocation2] sm:$0x1]  }
  0x15   :  { %v77_v13 = vld [vmem:[#allocation2] sm:$0x1]  }
  0x16   :  { %48 = vrot.lane.b32.xlu0 %v47_v7, %s155_s13  ;;  %v83_v14 = vld [vmem:[#allocation2] sm:$0x1]  }
  0x17   :  { %54 = vrot.lane.b32.xlu1 %v53_v8, %s156_s14  ;;  %v89_v15 = vld [vmem:[#allocation2] sm:$0x1]  }
  0x18   :  { %v95_v16 = vld [vmem:[#allocation2] sm:$0x1]  }
  0x1a   :  { %60 = vrot.lane.b32.xlu0 %v59_v9, %s157_s15 }
  0x1b   :  { %66 = vrot.lane.b32.xlu1 %v65_v10, %s158_s16 }
  0x1e   :  { %72 = vrot.lane.b32.xlu0 %v71_v12, %s159_s17 }
  0x1f   :  { %78 = vrot.lane.b32.xlu1 %v77_v13, %s160_s18 }
  0x22   :  { %84 = vrot.lane.b32.xlu0 %v83_v14, %s161_s19 }
  0x23   :  { %90 = vrot.lane.b32.xlu1 %v89_v15, %s162_s20 }
  0x26   :  { %96 = vrot.lane.b32.xlu0 %v95_v16, %s163_s21 }
  0x7c   :  { %v13_v17 = vpop.permute.xlu0 %12  }
  0x7d   :  { %v25_v18 = vpop.permute.xlu1 %24   ;;  %16 = vst.msk [vmem:[#allocation0 + $0x1] sm:$0x1] %vm9_vm0, %v13_v17  }
  0x7e   :  { %28 = vst.msk [vmem:[#allocation0 + $0x3] sm:$0x1] %vm9_vm0, %v25_v18  }
  0x80   :  { %v19_v19 = vpop.permute.xlu0 %18  }
  0x81   :  { %v31_v20 = vpop.permute.xlu1 %30   ;;  %22 = vst.msk [vmem:[#allocation0 + $0x2] sm:$0x1] %vm9_vm0, %v19_v19  }
  0x82   :  { %34 = vst.msk [vmem:[#allocation0 + $0x4] sm:$0x1] %vm9_vm0, %v31_v20  }
  0x84   :  { %v37_v21 = vpop.permute.xlu0 %36  }
  0x85   :  { %v43_v22 = vpop.permute.xlu1 %42   ;;  %40 = vst.msk [vmem:[#allocation0 + $0x5] sm:$0x1] %vm9_vm0, %v37_v21  }
  0x86   :  { %46 = vst.msk [vmem:[#allocation0 + $0x6] sm:$0x1] %vm9_vm0, %v43_v22  }
  0x88   :  { %v49_v23 = vpop.permute.xlu0 %48  }
  0x89   :  { %v55_v24 = vpop.permute.xlu1 %54   ;;  %52 = vst.msk [vmem:[#allocation0 + $0x7] sm:$0x1] %vm9_vm0, %v49_v23  }
  0x8a   :  { %58 = vst.msk [vmem:[#allocation0 + $0x8] sm:$0x1] %vm9_vm0, %v55_v24  }
  0x8c   :  { %v61_v25 = vpop.permute.xlu0 %60  }
  0x8d   :  { %v67_v26 = vpop.permute.xlu1 %66   ;;  %64 = vst.msk [vmem:[#allocation0 + $0x9] sm:$0x1] %vm9_vm0, %v61_v25  }
  0x8e   :  { %70 = vst.msk [vmem:[#allocation0 + $0xa] sm:$0x1] %vm9_vm0, %v67_v26  }
  0x90   :  { %v73_v27 = vpop.permute.xlu0 %72  }
  0x91   :  { %v79_v28 = vpop.permute.xlu1 %78   ;;  %76 = vst.msk [vmem:[#allocation0 + $0xb] sm:$0x1] %vm9_vm0, %v73_v27  }
  0x92   :  { %82 = vst.msk [vmem:[#allocation0 + $0xc] sm:$0x1] %vm9_vm0, %v79_v28  }
  0x94   :  { %v85_v29 = vpop.permute.xlu0 %84  }
  0x95   :  { %v91_v30 = vpop.permute.xlu1 %90   ;;  %88 = vst.msk [vmem:[#allocation0 + $0xd] sm:$0x1] %vm9_vm0, %v85_v29  }
  0x96   :  { %94 = vst.msk [vmem:[#allocation0 + $0xe] sm:$0x1] %vm9_vm0, %v91_v30  }
  0x98   :  { %v97_v31 = vpop.permute.xlu0 %96  }
  0x99   :  { %100 = vst.msk [vmem:[#allocation0 + $0xf] sm:$0x1] %vm9_vm0, %v97_v31  }
  0x9a   :  { %138 = shalt.err (!%p135_p4)
}
  0x9b   :  { %108 = dma.vmem_to_hbm [thread:$0]  %s106_s23, 256, %s198_s1, [#allocation1]  }
  0x9c   :  { %147 = dma.done.wait [#allocation1], 256  }
  0x9d   :  { %148 = vsyncadd [#allocation1], 4294967040 }
  0x9e   :  { %110 = vsyncpa [#allocation1], 1 }

// kernel: dvmark_encoder_forward.1
= control target key start
LH: loop header
LB: loop body
LE: loop exit
PB: predicated region body
PF: predicated region fallthrough
CT: control target
= control target key end

     0   :  { %s5932_s29 = smov 15   ;;  %s5933_s30 = smov 8   ;;  %vm1441_vm0 = vcmask 261120   ;;  %vm5957_vm1 = vmmov 0   ;;  %s6805_s0 = inlined_call_operand.vmem [shape: f32[32,128], index: 0, kind: input, shape index: {}]   ;;  %s6806_s2 = inlined_call_operand.vmem [shape: bf16[32,800], index: 2, kind: input, shape index: {}]   ;;  %s6807_s1 = inlined_call_operand.vmem [shape: f32[25,128], index: 1, kind: input, shape index: {}]   ;;  %s6808_s3 = inlined_call_operand.vmem [shape: f32[32,128], index: 3, kind: input, shape index: {}]   ;;  %s6809_s4 = inlined_call_operand.vmem [shape: bf16[4,32,288], index: 4, kind: input, shape index: {}]   ;;  %s6810_s5 = inlined_call_operand.vmem [shape: f32[4,32,128], index: 5, kind: input, shape index: {}]   ;;  %s6811_s6 = inlined_call_operand.vmem [shape: bf16[8,32], index: 6, kind: input, shape index: {}]   ;;  %s6812_s7 = inlined_call_operand.vmem [shape: f32[8,128], index: 7, kind: input, shape index: {}]   ;;  %s6813_s8 = inlined_call_operand.vmem [shape: f32[8,128], index: 8, kind: output, shape index: {}]  }
   0x1   :  { %v6006_v0 = vld [vmem:[%s6805_s0 + $0x10] sm:$0xff]  ;;  %v6014_v1 = vld [vmem:[%s6805_s0 + $0x18] sm:$0xff]  ;;  %v6022_v2 = vld [vmem:[%s6805_s0 + $0x8] sm:$0xff]  ;;  %s5934_s15 = smov 9   ;;  %s5935_s16 = smov 16  }
   0x2   :  { %171 = vrot.lane.b32.xlu1 %v6006_v0, %s5932_s29  ;;  %315 = vrot.lane.b32.xlu0 %v6006_v0, %s5933_s30  ;;  %v6027_v3 = vld [vmem:[%s6805_s0] sm:$0xff]  ;;  %s5936_s0 = smov 10   ;;  %s5937_s17 = smov 17   ;;  %v4059_v60 = vld [vmem:[%s6807_s1 + $0xc] ss:$0 sm:$0xff] }
   0x3   :  { %s5938_s18 = smov 14   ;;  %s5939_s19 = smov 18   ;;  %v5760_v4 = vld [vmem:[%s6806_s2 + $0x4] ss:$28 sps:$4 sm:$0xff]   ;;  %v497_v62 = vmul.f32 %v4059_v60, %v6006_v0  ;;  %v498_v63 = vmul.f32 %v4059_v60, %v6014_v1 }
   0x4   :  { %s5940_s20 = smov 122   ;;  %s5941_s21 = smov 1   ;;  %1480 = vmatprep.mubr.bf16.mxu0 %v5760_v4  ;;  %v4014_v7 = vld [vmem:[%s6807_s1 + $0x3] ss:$0 sm:$0xff]  ;;  %v4034_v8 = vld [vmem:[%s6807_s1 + $0x7] ss:$0 sm:$0xff] }
   0x5   :  { %s5942_s22 = smov 111   ;;  %s5943_s25 = smov 118   ;;  %v4029_v26 = vld [vmem:[%s6807_s1 + $0x6] ss:$0 sm:$0xff]  ;;  %v4009_v34 = vld [vmem:[%s6807_s1 + $0x2] ss:$0 sm:$0xff] }
   0x6   :  { %173 = vrot.lane.b32.xlu1 %v6014_v1, %s5932_s29  ;;  %317 = vrot.lane.b32.xlu0 %v6014_v1, %s5933_s30  ;;  %s5944_s26 = smov 126   ;;  %s5945_s27 = smov 2   ;;  %v4024_v53 = vld [vmem:[%s6807_s1 + $0x5] ss:$0 sm:$0xff]  ;;  %v4004_v61 = vld [vmem:[%s6807_s1 + $0x1] ss:$0 sm:$0xff] }
   0x7   :  { %s5946_s28 = smov 112   ;;  %s5948_s13 = smov 127  }
   0x8   :  { %s5953_s11 = smov 114   ;;  %s5955_s24 = smov 110  }
   0xa   :  { %313 = vrot.lane.b32.xlu1 %v6022_v2, %s5933_s30  ;;  %311 = vrot.lane.b32.xlu0 %v6027_v3, %s5933_s30 }
   0xe   :  { %169 = vrot.lane.b32.xlu1 %v6022_v2, %s5932_s29  ;;  %167 = vrot.lane.b32.xlu0 %v6027_v3, %s5932_s29  ;;  %s5947_s29 = smov 119  }
  0x12   :  { %281 = vrot.lane.b32.xlu1 %v6014_v1, %s5934_s15  ;;  %279 = vrot.lane.b32.xlu0 %v6006_v0, %s5934_s15 }
  0x16   :  { %137 = vrot.lane.b32.xlu1 %v6014_v1, %s5935_s16  ;;  %135 = vrot.lane.b32.xlu0 %v6006_v0, %s5935_s16 }
  0x1a   :  { %277 = vrot.lane.b32.xlu1 %v6022_v2, %s5934_s15  ;;  %275 = vrot.lane.b32.xlu0 %v6027_v3, %s5934_s15 }
  0x1e   :  { %133 = vrot.lane.b32.xlu1 %v6022_v2, %s5935_s16  ;;  %131 = vrot.lane.b32.xlu0 %v6027_v3, %s5935_s16  ;;  %s5954_s16 = smov 121  }
  0x22   :  { %245 = vrot.lane.b32.xlu1 %v6014_v1, %s5936_s0  ;;  %243 = vrot.lane.b32.xlu0 %v6006_v0, %s5936_s0 }
  0x26   :  { %101 = vrot.lane.b32.xlu1 %v6014_v1, %s5937_s17  ;;  %99 = vrot.lane.b32.xlu0 %v6006_v0, %s5937_s17 }
  0x2a   :  { %241 = vrot.lane.b32.xlu1 %v6022_v2, %s5936_s0  ;;  %239 = vrot.lane.b32.xlu0 %v6027_v3, %s5936_s0  ;;  %s5949_s0 = smov 6  }
  0x2e   :  { %97 = vrot.lane.b32.xlu1 %v6022_v2, %s5937_s17  ;;  %95 = vrot.lane.b32.xlu0 %v6027_v3, %s5937_s17 }
  0x32   :  { %209 = vrot.lane.b32.xlu1 %v6014_v1, %s5938_s18  ;;  %207 = vrot.lane.b32.xlu0 %v6006_v0, %s5938_s18 }
  0x36   :  { %65 = vrot.lane.b32.xlu1 %v6014_v1, %s5939_s19  ;;  %63 = vrot.lane.b32.xlu0 %v6006_v0, %s5939_s19 }
  0x3a   :  { %205 = vrot.lane.b32.xlu1 %v6022_v2, %s5938_s18  ;;  %203 = vrot.lane.b32.xlu0 %v6027_v3, %s5938_s18 }
  0x3e   :  { %61 = vrot.lane.b32.xlu1 %v6022_v2, %s5939_s19  ;;  %59 = vrot.lane.b32.xlu0 %v6027_v3, %s5939_s19  ;;  %s5950_s19 = smov 113  }
  0x42   :  { %597 = vrot.lane.b32.xlu1 %v6014_v1, %s5940_s20  ;;  %595 = vrot.lane.b32.xlu0 %v6006_v0, %s5940_s20 }
  0x46   :  { %461 = vrot.lane.b32.xlu1 %v6014_v1, %s5941_s21  ;;  %459 = vrot.lane.b32.xlu0 %v6006_v0, %s5941_s21 }
  0x4a   :  { %885 = vrot.lane.b32.xlu1 %v6014_v1, %s5942_s22  ;;  %883 = vrot.lane.b32.xlu0 %v6006_v0, %s5942_s22 }
  0x4e   :  { %741 = vrot.lane.b32.xlu1 %v6014_v1, %s5943_s25  ;;  %739 = vrot.lane.b32.xlu0 %v6006_v0, %s5943_s25 }
  0x52   :  { %593 = vrot.lane.b32.xlu1 %v6022_v2, %s5940_s20  ;;  %591 = vrot.lane.b32.xlu0 %v6027_v3, %s5940_s20  ;;  %s5951_s20 = smov 120  }
  0x56   :  { %457 = vrot.lane.b32.xlu1 %v6022_v2, %s5941_s21  ;;  %455 = vrot.lane.b32.xlu0 %v6027_v3, %s5941_s21 }
  0x5a   :  { %881 = vrot.lane.b32.xlu1 %v6022_v2, %s5942_s22  ;;  %879 = vrot.lane.b32.xlu0 %v6027_v3, %s5942_s22 }
  0x5e   :  { %737 = vrot.lane.b32.xlu1 %v6022_v2, %s5943_s25  ;;  %735 = vrot.lane.b32.xlu0 %v6027_v3, %s5943_s25 }
  0x62   :  { %561 = vrot.lane.b32.xlu1 %v6014_v1, %s5944_s26  ;;  %559 = vrot.lane.b32.xlu0 %v6006_v0, %s5944_s26 }
  0x66   :  { %425 = vrot.lane.b32.xlu1 %v6014_v1, %s5945_s27  ;;  %423 = vrot.lane.b32.xlu0 %v6006_v0, %s5945_s27 }
  0x6a   :  { %849 = vrot.lane.b32.xlu1 %v6014_v1, %s5946_s28  ;;  %847 = vrot.lane.b32.xlu0 %v6006_v0, %s5946_s28 }
  0x6e   :  { %705 = vrot.lane.b32.xlu1 %v6014_v1, %s5947_s29  ;;  %703 = vrot.lane.b32.xlu0 %v6006_v0, %s5947_s29 }
  0x72   :  { %557 = vrot.lane.b32.xlu1 %v6022_v2, %s5944_s26  ;;  %555 = vrot.lane.b32.xlu0 %v6027_v3, %s5944_s26 }
  0x74   :  { %v172_v5 = vpop.permute.xlu1 %171  ;;  %v316_v6 = vpop.permute.xlu0 %315 }
  0x75   :  { %v181_v11 = vmul.f32 %v4014_v7, %v172_v5  ;;  %v325_v12 = vmul.f32 %v4034_v8, %v316_v6 }
  0x76   :  { %421 = vrot.lane.b32.xlu1 %v6022_v2, %s5945_s27  ;;  %419 = vrot.lane.b32.xlu0 %v6027_v3, %s5945_s27 }
  0x78   :  { %v174_v9 = vpop.permute.xlu1 %173  ;;  %v318_v10 = vpop.permute.xlu0 %317 }
  0x79   :  { %v182_v13 = vmul.f32 %v4014_v7, %v174_v9  ;;  %v326_v14 = vmul.f32 %v4034_v8, %v318_v10 }
  0x7a   :  { %845 = vrot.lane.b32.xlu1 %v6022_v2, %s5946_s28  ;;  %843 = vrot.lane.b32.xlu0 %v6027_v3, %s5946_s28  ;;  %s5952_s28 = smov 7  }
  0x7b   :  { %v4757_v15 = vpack.c.bf16 %v182_v13, %v181_v11  ;;  %v4797_v16 = vpack.c.bf16 %v326_v14, %v325_v12 }
  0x7c   :  { %v314_v17 = vpop.permute.xlu1 %313  ;;  %v312_v18 = vpop.permute.xlu0 %311 }
  0x7d   :  { %5335 = vst [vmem:[#allocation2 + $0x38] sm:$0xff] %v4757_v15   ;;  %5343 = vst [vmem:[#allocation2 + $0x78] sm:$0xff] %v4797_v16   ;;  %v324_v19 = vmul.f32 %v4034_v8, %v314_v17  ;;  %v323_v20 = vmul.f32 %v4034_v8, %v312_v18  ;;  %v4847_v8 = vpack.c.bf16 %v498_v63, %v497_v62 }
  0x7e   :  { %701 = vrot.lane.b32.xlu1 %v6022_v2, %s5947_s29  ;;  %699 = vrot.lane.b32.xlu0 %v6027_v3, %s5947_s29 }
  0x7f   :  { %v4792_v21 = vpack.c.bf16 %v324_v19, %v323_v20  ;;  %5353 = vst [vmem:[#allocation2 + $0xc8] sm:$0xff] %v4847_v8  }
  0x80   :  { %v170_v22 = vpop.permute.xlu1 %169  ;;  %v168_v23 = vpop.permute.xlu0 %167 }
  0x81   :  { %5342 = vst [vmem:[#allocation2 + $0x70] sm:$0xff] %v4792_v21   ;;  %v180_v24 = vmul.f32 %v4014_v7, %v170_v22  ;;  %v179_v25 = vmul.f32 %v4014_v7, %v168_v23  ;;  %v495_v23 = vmul.f32 %v4059_v60, %v6027_v3 }
  0x82   :  { %525 = vrot.lane.b32.xlu1 %v6014_v1, %s5948_s13  ;;  %523 = vrot.lane.b32.xlu0 %v6006_v0, %s5948_s13 }
  0x83   :  { %v4752_v27 = vpack.c.bf16 %v180_v24, %v179_v25  ;;  %v496_v24 = vmul.f32 %v4059_v60, %v6022_v2  ;;  %v4019_v25 = vld [vmem:[%s6807_s1 + $0x4] ss:$0 sm:$0xff]  ;;  %v4054_v60 = vld [vmem:[%s6807_s1 + $0xb] ss:$0 sm:$0xff] }
  0x84   :  { %v282_v28 = vpop.permute.xlu1 %281  ;;  %v280_v29 = vpop.permute.xlu0 %279  ;;  %v5739_v30 = vld [vmem:[#allocation2 + $0x78] sm:$0xff]  }
  0x85   :  { %5334 = vst [vmem:[#allocation2 + $0x30] sm:$0xff] %v4752_v27   ;;  %v290_v31 = vmul.f32 %v4029_v26, %v282_v28  ;;  %v289_v32 = vmul.f32 %v4029_v26, %v280_v29  ;;  %v5740_v33 = vld [vmem:[#allocation2 + $0x38] sm:$0xff]   ;;  %5446 = vmatprep.subr.bf16.mxu0 %v5739_v30  ;;  %v4842_v27 = vpack.c.bf16 %v496_v24, %v495_v23 }
  0x86   :  { %389 = vrot.lane.b32.xlu1 %v6014_v1, %s5949_s0  ;;  %387 = vrot.lane.b32.xlu0 %v6006_v0, %s5949_s0 }
  0x87   :  { %v4787_v35 = vpack.c.bf16 %v290_v31, %v289_v32  ;;  %5447 = vmatpush3.bf16.msra.mxu0 %v5740_v33  ;;  %5352 = vst [vmem:[#allocation2 + $0xc0] sm:$0xff] %v4842_v27   ;;  %v3999_v33 = vld [vmem:[%s6807_s1] ss:$0 sm:$0xff]  ;;  %v5800_v27 = vld [vmem:[%s6806_s2 + $0x14] ss:$28 sps:$4 sm:$0xff]  }
  0x88   :  { %v138_v36 = vpop.permute.xlu1 %137  ;;  %v136_v37 = vpop.permute.xlu0 %135  ;;  %v5741_v38 = vld [vmem:[#allocation2 + $0x70] sm:$0xff]  }
  0x89   :  { %5341 = vst [vmem:[#allocation2 + $0x68] sm:$0xff] %v4787_v35   ;;  %v146_v39 = vmul.f32 %v4009_v34, %v138_v36  ;;  %v145_v40 = vmul.f32 %v4009_v34, %v136_v37  ;;  %5448 = vmatprep.subr.bf16.mxu0 %v5741_v38 }
  0x8a   :  { %813 = vrot.lane.b32.xlu1 %v6014_v1, %s5950_s19  ;;  %811 = vrot.lane.b32.xlu0 %v6006_v0, %s5950_s19 }
  0x8b   :  { %v4747_v41 = vpack.c.bf16 %v146_v39, %v145_v40 }
  0x8c   :  { %v278_v42 = vpop.permute.xlu1 %277  ;;  %v276_v43 = vpop.permute.xlu0 %275  ;;  %v5742_v44 = vld [vmem:[#allocation2 + $0x30] sm:$0xff]  }
  0x8d   :  { %5333 = vst [vmem:[#allocation2 + $0x28] sm:$0xff] %v4747_v41   ;;  %v288_v45 = vmul.f32 %v4029_v26, %v278_v42  ;;  %v287_v46 = vmul.f32 %v4029_v26, %v276_v43  ;;  %5449 = vmatpush3.bf16.msra.mxu0 %v5742_v44 }
  0x8e   :  { %669 = vrot.lane.b32.xlu1 %v6014_v1, %s5951_s20  ;;  %667 = vrot.lane.b32.xlu0 %v6006_v0, %s5951_s20 }
  0x8f   :  { %v4782_v47 = vpack.c.bf16 %v288_v45, %v287_v46 }
  0x90   :  { %v134_v48 = vpop.permute.xlu1 %133  ;;  %v132_v49 = vpop.permute.xlu0 %131  ;;  %v5743_v50 = vld [vmem:[#allocation2 + $0x68] sm:$0xff]  }
  0x91   :  { %5340 = vst [vmem:[#allocation2 + $0x60] sm:$0xff] %v4782_v47   ;;  %v144_v51 = vmul.f32 %v4009_v34, %v134_v48  ;;  %v143_v52 = vmul.f32 %v4009_v34, %v132_v49  ;;  %5450 = vmatprep.subr.bf16.mxu0 %v5743_v50  ;;  %v5793_v47 = vld [vmem:[%s6806_s2 + $0xc] ss:$28 sps:$4 sm:$0xff]  }
  0x92   :  { %521 = vrot.lane.b32.xlu1 %v6022_v2, %s5948_s13  ;;  %519 = vrot.lane.b32.xlu0 %v6027_v3, %s5948_s13 }
  0x93   :  { %v4742_v54 = vpack.c.bf16 %v144_v51, %v143_v52  ;;  %1529 = vmatprep.mubr.bf16.mxu1 %v5793_v47 }
  0x94   :  { %v246_v55 = vpop.permute.xlu1 %245  ;;  %v244_v56 = vpop.permute.xlu0 %243  ;;  %v5744_v57 = vld [vmem:[#allocation2 + $0x28] sm:$0xff]  }
  0x95   :  { %5332 = vst [vmem:[#allocation2 + $0x20] sm:$0xff] %v4742_v54   ;;  %v254_v58 = vmul.f32 %v4024_v53, %v246_v55  ;;  %v253_v59 = vmul.f32 %v4024_v53, %v244_v56  ;;  %5451 = vmatpush3.bf16.msra.mxu0 %v5744_v57 }
  0x96   :  { %385 = vrot.lane.b32.xlu1 %v6022_v2, %s5949_s0  ;;  %383 = vrot.lane.b32.xlu0 %v6027_v3, %s5949_s0 }
  0x97   :  { %v4777_v4 = vpack.c.bf16 %v254_v58, %v253_v59 }
  0x98   :  { %v102_v5 = vpop.permute.xlu1 %101  ;;  %v100_v6 = vpop.permute.xlu0 %99  ;;  %v5745_v7 = vld [vmem:[#allocation2 + $0x60] sm:$0xff]  }
  0x99   :  { %5339 = vst [vmem:[#allocation2 + $0x58] sm:$0xff] %v4777_v4   ;;  %v110_v9 = vmul.f32 %v4004_v61, %v102_v5  ;;  %v109_v10 = vmul.f32 %v4004_v61, %v100_v6  ;;  %5452 = vmatprep.subr.bf16.mxu0 %v5745_v7  ;;  %v4114_v7 = vld [vmem:[%s6807_s1 + $0x17] ss:$0 sm:$0xff] }
  0x9a   :  { %809 = vrot.lane.b32.xlu1 %v6022_v2, %s5950_s19  ;;  %807 = vrot.lane.b32.xlu0 %v6027_v3, %s5950_s19 }
  0x9b   :  { %v4737_v11 = vpack.c.bf16 %v110_v9, %v109_v10 }
  0x9c   :  { %v242_v12 = vpop.permute.xlu1 %241  ;;  %v240_v13 = vpop.permute.xlu0 %239  ;;  %v5746_v14 = vld [vmem:[#allocation2 + $0x20] sm:$0xff]  }
  0x9d   :  { %5331 = vst [vmem:[#allocation2 + $0x18] sm:$0xff] %v4737_v11   ;;  %v252_v15 = vmul.f32 %v4024_v53, %v242_v12  ;;  %v251_v16 = vmul.f32 %v4024_v53, %v240_v13  ;;  %5453 = vmatpush3.bf16.msra.mxu0 %v5746_v14  ;;  %v4074_v53 = vld [vmem:[%s6807_s1 + $0xf] ss:$0 sm:$0xff] }
  0x9e   :  { %665 = vrot.lane.b32.xlu1 %v6022_v2, %s5951_s20  ;;  %663 = vrot.lane.b32.xlu0 %v6027_v3, %s5951_s20 }
  0x9f   :  { %v4772_v17 = vpack.c.bf16 %v252_v15, %v251_v16  ;;  %v5788_v15 = vld [vmem:[%s6806_s2 + $0x3c] ss:$28 sps:$4 sm:$0xff]  }
  0xa0   :  { %v98_v18 = vpop.permute.xlu1 %97  ;;  %v96_v19 = vpop.permute.xlu0 %95  ;;  %v5747_v20 = vld [vmem:[#allocation2 + $0x58] sm:$0xff]  }
  0xa1   :  { %5338 = vst [vmem:[#allocation2 + $0x50] sm:$0xff] %v4772_v17   ;;  %v108_v21 = vmul.f32 %v4004_v61, %v98_v18  ;;  %v107_v22 = vmul.f32 %v4004_v61, %v96_v19  ;;  %5454 = vmatprep.subr.bf16.mxu0 %v5747_v20 }
  0xa2   :  { %353 = vrot.lane.b32.xlu1 %v6014_v1, %s5952_s28  ;;  %351 = vrot.lane.b32.xlu0 %v6006_v0, %s5952_s28 }
  0xa3   :  { %v4732_v26 = vpack.c.bf16 %v108_v21, %v107_v22 }
  0xa4   :  { %v210_v28 = vpop.permute.xlu1 %209  ;;  %v208_v29 = vpop.permute.xlu0 %207  ;;  %v5748_v30 = vld [vmem:[#allocation2 + $0x18] sm:$0xff]  }
  0xa5   :  { %5330 = vst [vmem:[#allocation2 + $0x10] sm:$0xff] %v4732_v26   ;;  %v218_v31 = vmul.f32 %v4019_v25, %v210_v28  ;;  %v217_v32 = vmul.f32 %v4019_v25, %v208_v29  ;;  %5455 = vmatpush3.bf16.msra.mxu0 %v5748_v30 }
  0xa6   :  { %777 = vrot.lane.b32.xlu1 %v6014_v1, %s5953_s11  ;;  %775 = vrot.lane.b32.xlu0 %v6006_v0, %s5953_s11 }
  0xa7   :  { %v4767_v34 = vpack.c.bf16 %v218_v31, %v217_v32 }
  0xa8   :  { %v66_v35 = vpop.permute.xlu1 %65  ;;  %v64_v36 = vpop.permute.xlu0 %63  ;;  %v5749_v37 = vld [vmem:[#allocation2 + $0x50] sm:$0xff]  }
  0xa9   :  { %5337 = vst [vmem:[#allocation2 + $0x48] sm:$0xff] %v4767_v34   ;;  %v74_v38 = vmul.f32 %v3999_v33, %v66_v35  ;;  %v73_v39 = vmul.f32 %v3999_v33, %v64_v36  ;;  %5456 = vmatprep.subr.bf16.mxu0 %v5749_v37 }
  0xaa   :  { %633 = vrot.lane.b32.xlu1 %v6014_v1, %s5954_s16  ;;  %631 = vrot.lane.b32.xlu0 %v6006_v0, %s5954_s16 }
  0xab   :  { %v4727_v40 = vpack.c.bf16 %v74_v38, %v73_v39 }
  0xac   :  { %v206_v41 = vpop.permute.xlu1 %205  ;;  %v204_v42 = vpop.permute.xlu0 %203  ;;  %v5750_v43 = vld [vmem:[#allocation2 + $0x10] sm:$0xff]  }
  0xad   :  { %5329 = vst [vmem:[#allocation2 + $0x8] sm:$0xff] %v4727_v40   ;;  %v216_v44 = vmul.f32 %v4019_v25, %v206_v41  ;;  %v215_v45 = vmul.f32 %v4019_v25, %v204_v42  ;;  %5457 = vmatpush3.bf16.msra.mxu0 %v5750_v43  ;;  %v5790_v25 = vld [vmem:[%s6806_s2 + $0x38] ss:$28 sps:$4 sm:$0xff]  }
  0xae   :  { %349 = vrot.lane.b32.xlu1 %v6022_v2, %s5952_s28  ;;  %347 = vrot.lane.b32.xlu0 %v6027_v3, %s5952_s28 }
  0xaf   :  { %v4762_v46 = vpack.c.bf16 %v216_v44, %v215_v45  ;;  %v4069_v45 = vld [vmem:[%s6807_s1 + $0xe] ss:$0 sm:$0xff] }
  0xb0   :  { %v62_v48 = vpop.permute.xlu1 %61  ;;  %v60_v49 = vpop.permute.xlu0 %59  ;;  %v5751_v50 = vld [vmem:[#allocation2 + $0x48] sm:$0xff]  }
  0xb1   :  { %5336 = vst [vmem:[#allocation2 + $0x40] sm:$0xff] %v4762_v46   ;;  %v72_v51 = vmul.f32 %v3999_v33, %v62_v48  ;;  %v71_v52 = vmul.f32 %v3999_v33, %v60_v49  ;;  %5458 = vmatprep.subr.bf16.mxu0 %v5751_v50 }
  0xb2   :  { %773 = vrot.lane.b32.xlu1 %v6022_v2, %s5953_s11  ;;  %771 = vrot.lane.b32.xlu0 %v6027_v3, %s5953_s11 }
  0xb3   :  { %v4722_v54 = vpack.c.bf16 %v72_v51, %v71_v52  ;;  %v4049_v52 = vld [vmem:[%s6807_s1 + $0xa] ss:$0 sm:$0xff] }
  0xb4   :  { %v598_v55 = vpop.permute.xlu1 %597  ;;  %v596_v56 = vpop.permute.xlu0 %595  ;;  %v5752_v57 = vld [vmem:[#allocation2 + $0x8] sm:$0xff]  }
  0xb5   :  { %4723 = vst [vmem:[#allocation2] sm:$0xff] %v4722_v54   ;;  %v606_v58 = vmul.f32 %v4074_v53, %v598_v55  ;;  %v605_v59 = vmul.f32 %v4074_v53, %v596_v56  ;;  %5459 = vmatpush3.bf16.msra.mxu0 %v5752_v57 }
  0xb6   :  { %629 = vrot.lane.b32.xlu1 %v6022_v2, %s5954_s16  ;;  %627 = vrot.lane.b32.xlu0 %v6027_v3, %s5954_s16 }
  0xb7   :  { %v4877_v61 = vpack.c.bf16 %v606_v58, %v605_v59  ;;  %v4109_v59 = vld [vmem:[%s6807_s1 + $0x16] ss:$0 sm:$0xff] }
  0xb8   :  { %v462_v62 = vpop.permute.xlu1 %461  ;;  %v460_v63 = vpop.permute.xlu0 %459  ;;  %v5753_v4 = vld [vmem:[#allocation2 + $0x40] sm:$0xff]  }
  0xb9   :  { %5359 = vst [vmem:[#allocation2 + $0xf8] sm:$0xff] %v4877_v61   ;;  %v470_v5 = vmul.f32 %v4054_v60, %v462_v62  ;;  %v469_v6 = vmul.f32 %v4054_v60, %v460_v63  ;;  %5460 = vmatprep.subr.bf16.mxu0 %v5753_v4 }
  0xba   :  { %921 = vrot.lane.b32.xlu1 %v6014_v1, %s5955_s24  ;;  %919 = vrot.lane.b32.xlu0 %v6006_v0, %s5955_s24  ;;  %v4094_v0 = vld [vmem:[%s6807_s1 + $0x13] ss:$0 sm:$0xff]  ;;  %v5758_v1 = vld [vmem:[%s6806_s2] ss:$28 sps:$4 sm:$0xff]  }
  0xbb   :  { %v4837_v8 = vpack.c.bf16 %v470_v5, %v469_v6  ;;  %v4089_v6 = vld [vmem:[%s6807_s1 + $0x12] ss:$0 sm:$0xff] }
  0xbc   :  { %v886_v9 = vpop.permute.xlu1 %885  ;;  %v884_v10 = vpop.permute.xlu0 %883  ;;  %v5754_v11 = vld [vmem:[#allocation2] sm:$0xff]  }
  0xbd   :  { %5351 = vst [vmem:[#allocation2 + $0xb8] sm:$0xff] %v4837_v8   ;;  %v894_v12 = vmul.f32 %v4114_v7, %v886_v9  ;;  %v893_v13 = vmul.f32 %v4114_v7, %v884_v10  ;;  %5461 = vmatpush3.bf16.msra.mxu0 %v5754_v11 }
  0xbe   :  { %917 = vrot.lane.b32.xlu1 %v6022_v2, %s5955_s24  ;;  %915 = vrot.lane.b32.xlu0 %v6027_v3, %s5955_s24 }
  0xbf   :  { %v4957_v14 = vpack.c.bf16 %v894_v12, %v893_v13 }
  0xc0   :  { %v742_v16 = vpop.permute.xlu1 %741  ;;  %v740_v17 = vpop.permute.xlu0 %739  ;;  %v5755_v18 = vld [vmem:[#allocation2 + $0xf8] sm:$0xff]   ;;  %1481 = vmatmul.mubr.bf16.vlgmr.msra.gmra.mxu0 %v5758_v1 }
  0xc1   :  { %5375 = vst [vmem:[#allocation2 + $0x178] sm:$0xff] %v4957_v14   ;;  %v750_v2 = vmul.f32 %v4094_v0, %v742_v16  ;;  %v749_v3 = vmul.f32 %v4094_v0, %v740_v17  ;;  %5474 = vmatprep.subr.bf16.mxu1 %v5755_v18  ;;  %1488 = vmatprep.mubr.bf16.mxu0 %v5788_v15 }
  0xc3   :  { %v4917_v19 = vpack.c.bf16 %v750_v2, %v749_v3 }
  0xc4   :  { %v594_v20 = vpop.permute.xlu1 %593  ;;  %v592_v21 = vpop.permute.xlu0 %591  ;;  %v5756_v22 = vld [vmem:[#allocation2 + $0xb8] sm:$0xff]  }
  0xc5   :  { %5367 = vst [vmem:[#allocation2 + $0x138] sm:$0xff] %v4917_v19   ;;  %v604_v23 = vmul.f32 %v4074_v53, %v594_v20  ;;  %v603_v24 = vmul.f32 %v4074_v53, %v592_v21  ;;  %5475 = vmatpush3.bf16.msra.mxu1 %v5756_v22 }
  0xc7   :  { %v4872_v26 = vpack.c.bf16 %v604_v23, %v603_v24 }
  0xc8   :  { %v458_v28 = vpop.permute.xlu1 %457  ;;  %v456_v29 = vpop.permute.xlu0 %455  ;;  %v5757_v30 = vld [vmem:[#allocation2 + $0x178] sm:$0xff]   ;;  %1489 = vmatmul.mubr.bf16.gmra.mxu0 %v5790_v25 }
  0xc9   :  { %5358 = vst [vmem:[#allocation2 + $0xf0] sm:$0xff] %v4872_v26   ;;  %v468_v31 = vmul.f32 %v4054_v60, %v458_v28  ;;  %v467_v32 = vmul.f32 %v4054_v60, %v456_v29  ;;  %5502 = vmatprep.subr.bf16.mxu0 %v5757_v30  ;;  %1578 = vmatprep.mubr.bf16.mxu0 %v5800_v27 }
  0xcb   :  { %v4832_v33 = vpack.c.bf16 %v468_v31, %v467_v32 }
  0xcc   :  { %v882_v34 = vpop.permute.xlu1 %881  ;;  %v880_v35 = vpop.permute.xlu0 %879  ;;  %v5761_v36 = vld [vmem:[#allocation2 + $0x138] sm:$0xff]  }
  0xcd   :  { %5350 = vst [vmem:[#allocation2 + $0xb0] sm:$0xff] %v4832_v33   ;;  %v892_v37 = vmul.f32 %v4114_v7, %v882_v34  ;;  %v891_v38 = vmul.f32 %v4114_v7, %v880_v35  ;;  %5503 = vmatpush3.bf16.msra.mxu0 %v5761_v36  ;;  %v6239_v33 = vld [vmem:[%s6807_s1 + $0xd] ss:$0 sm:$0xff] }
  0xcf   :  { %v4952_v39 = vpack.c.bf16 %v892_v37, %v891_v38 }
  0xd0   :  { %v738_v40 = vpop.permute.xlu1 %737  ;;  %v736_v41 = vpop.permute.xlu0 %735  ;;  %v5762_v42 = vld [vmem:[#allocation2 + $0xf0] sm:$0xff]  }
  0xd1   :  { %5374 = vst [vmem:[#allocation2 + $0x170] sm:$0xff] %v4952_v39   ;;  %v748_v43 = vmul.f32 %v4094_v0, %v738_v40  ;;  %v747_v44 = vmul.f32 %v4094_v0, %v736_v41  ;;  %5476 = vmatprep.subr.bf16.mxu1 %v5762_v42  ;;  %v4044_v40 = vld [vmem:[%s6807_s1 + $0x9] ss:$0 sm:$0xff] }
  0xd3   :  { %v4912_v46 = vpack.c.bf16 %v748_v43, %v747_v44 }
  0xd4   :  { %v562_v47 = vpop.permute.xlu1 %561  ;;  %v560_v48 = vpop.permute.xlu0 %559  ;;  %v5763_v49 = vld [vmem:[#allocation2 + $0xb0] sm:$0xff]  }
  0xd5   :  { %5366 = vst [vmem:[#allocation2 + $0x130] sm:$0xff] %v4912_v46   ;;  %v570_v50 = vmul.f32 %v4069_v45, %v562_v47  ;;  %v569_v51 = vmul.f32 %v4069_v45, %v560_v48  ;;  %5477 = vmatpush3.bf16.msra.mxu1 %v5763_v49  ;;  %v4104_v47 = vld [vmem:[%s6807_s1 + $0x15] ss:$0 sm:$0xff] }
  0xd7   :  { %v4867_v53 = vpack.c.bf16 %v570_v50, %v569_v51 }
  0xd8   :  { %v426_v54 = vpop.permute.xlu1 %425  ;;  %v424_v55 = vpop.permute.xlu0 %423  ;;  %v5764_v56 = vld [vmem:[#allocation2 + $0x170] sm:$0xff]  }
  0xd9   :  { %5357 = vst [vmem:[#allocation2 + $0xe8] sm:$0xff] %v4867_v53   ;;  %v434_v57 = vmul.f32 %v4049_v52, %v426_v54  ;;  %v433_v58 = vmul.f32 %v4049_v52, %v424_v55  ;;  %5504 = vmatprep.subr.bf16.mxu0 %v5764_v56  ;;  %v6252_v54 = vld [vmem:[%s6807_s1 + $0x11] ss:$0 sm:$0xff] }
  0xdb   :  { %v4827_v60 = vpack.c.bf16 %v434_v57, %v433_v58 }
  0xdc   :  { %v850_v61 = vpop.permute.xlu1 %849  ;;  %v848_v62 = vpop.permute.xlu0 %847  ;;  %v5765_v63 = vld [vmem:[#allocation2 + $0x130] sm:$0xff]  }
  0xdd   :  { %5349 = vst [vmem:[#allocation2 + $0xa8] sm:$0xff] %v4827_v60   ;;  %v858_v4 = vmul.f32 %v4109_v59, %v850_v61  ;;  %v857_v5 = vmul.f32 %v4109_v59, %v848_v62  ;;  %5505 = vmatpush3.bf16.msra.mxu0 %v5765_v63 }
  0xdf   :  { %v4947_v7 = vpack.c.bf16 %v858_v4, %v857_v5 }
  0xe0   :  { %v706_v8 = vpop.permute.xlu1 %705  ;;  %v704_v9 = vpop.permute.xlu0 %703  ;;  %v5766_v10 = vld [vmem:[#allocation2 + $0xe8] sm:$0xff]  }
  0xe1   :  { %5373 = vst [vmem:[#allocation2 + $0x168] sm:$0xff] %v4947_v7   ;;  %v714_v11 = vmul.f32 %v4089_v6, %v706_v8  ;;  %v713_v12 = vmul.f32 %v4089_v6, %v704_v9  ;;  %5478 = vmatprep.subr.bf16.mxu1 %v5766_v10 }
  0xe3   :  { %v4907_v13 = vpack.c.bf16 %v714_v11, %v713_v12 }
  0xe4   :  { %v558_v0 = vpop.permute.xlu1 %557  ;;  %v556_v1 = vpop.permute.xlu0 %555  ;;  %v5767_v14 = vld [vmem:[#allocation2 + $0xa8] sm:$0xff]  }
  0xe5   :  { %5365 = vst [vmem:[#allocation2 + $0x128] sm:$0xff] %v4907_v13   ;;  %v568_v15 = vmul.f32 %v4069_v45, %v558_v0  ;;  %v567_v16 = vmul.f32 %v4069_v45, %v556_v1  ;;  %5479 = vmatpush3.bf16.msra.mxu1 %v5767_v14 }
  0xe7   :  { %v4862_v17 = vpack.c.bf16 %v568_v15, %v567_v16 }
  0xe8   :  { %v422_v18 = vpop.permute.xlu1 %421  ;;  %v420_v2 = vpop.permute.xlu0 %419  ;;  %v5768_v3 = vld [vmem:[#allocation2 + $0x168] sm:$0xff]  }
  0xe9   :  { %5356 = vst [vmem:[#allocation2 + $0xe0] sm:$0xff] %v4862_v17   ;;  %v432_v19 = vmul.f32 %v4049_v52, %v422_v18  ;;  %v431_v20 = vmul.f32 %v4049_v52, %v420_v2  ;;  %5506 = vmatprep.subr.bf16.mxu0 %v5768_v3 }
  0xeb   :  { %v4822_v21 = vpack.c.bf16 %v432_v19, %v431_v20 }
  0xec   :  { %v846_v22 = vpop.permute.xlu1 %845  ;;  %v844_v23 = vpop.permute.xlu0 %843  ;;  %v5769_v24 = vld [vmem:[#allocation2 + $0x128] sm:$0xff]  }
  0xed   :  { %5348 = vst [vmem:[#allocation2 + $0xa0] sm:$0xff] %v4822_v21   ;;  %v856_v25 = vmul.f32 %v4109_v59, %v846_v22  ;;  %v855_v26 = vmul.f32 %v4109_v59, %v844_v23  ;;  %5507 = vmatpush3.bf16.msra.mxu0 %v5769_v24  ;;  %v6263_v21 = vld [vmem:[%s6807_s1 + $0x8] ss:$0 sm:$0xff] }
  0xee   :  { %v5782_v23 = vld [vmem:[#allocation2 + $0xc8] sm:$0xff]  }
  0xef   :  { %v4942_v27 = vpack.c.bf16 %v856_v25, %v855_v26 }
  0xf0   :  { %v702_v28 = vpop.permute.xlu1 %701  ;;  %v700_v29 = vpop.permute.xlu0 %699  ;;  %v5770_v30 = vld [vmem:[#allocation2 + $0xe0] sm:$0xff]  }
  0xf1   :  { %5372 = vst [vmem:[#allocation2 + $0x160] sm:$0xff] %v4942_v27   ;;  %v712_v31 = vmul.f32 %v4089_v6, %v702_v28  ;;  %v711_v32 = vmul.f32 %v4089_v6, %v700_v29  ;;  %5480 = vmatprep.subr.bf16.mxu1 %v5770_v30  ;;  %v4099_v29 = vld [vmem:[%s6807_s1 + $0x14] ss:$0 sm:$0xff] }
  0xf3   :  { %v4902_v34 = vpack.c.bf16 %v712_v31, %v711_v32 }
  0xf4   :  { %v526_v35 = vpop.permute.xlu1 %525  ;;  %v524_v36 = vpop.permute.xlu0 %523  ;;  %v5771_v37 = vld [vmem:[#allocation2 + $0xa0] sm:$0xff]  }
  0xf5   :  { %5364 = vst [vmem:[#allocation2 + $0x120] sm:$0xff] %v4902_v34   ;;  %v534_v38 = vmul.f32 %v6239_v33, %v526_v35  ;;  %v533_v39 = vmul.f32 %v6239_v33, %v524_v36  ;;  %5481 = vmatpush3.bf16.msra.mxu1 %v5771_v37  ;;  %v6273_v37 = vld [vmem:[%s6807_s1 + $0x10] ss:$0 sm:$0xff] }
  0xf7   :  { %v4857_v41 = vpack.c.bf16 %v534_v38, %v533_v39 }
  0xf8   :  { %v390_v42 = vpop.permute.xlu1 %389  ;;  %v388_v43 = vpop.permute.xlu0 %387  ;;  %v5772_v44 = vld [vmem:[#allocation2 + $0x160] sm:$0xff]  }
  0xf9   :  { %5355 = vst [vmem:[#allocation2 + $0xd8] sm:$0xff] %v4857_v41   ;;  %v398_v45 = vmul.f32 %v4044_v40, %v390_v42  ;;  %v397_v46 = vmul.f32 %v4044_v40, %v388_v43  ;;  %5508 = vmatprep.subr.bf16.mxu0 %v5772_v44 }
  0xfb   :  { %v4817_v48 = vpack.c.bf16 %v398_v45, %v397_v46  ;;  %v5786_v45 = vld [vmem:[#allocation2 + $0xc0] sm:$0xff]  }
  0xfc   :  { %v814_v49 = vpop.permute.xlu1 %813  ;;  %v812_v50 = vpop.permute.xlu0 %811  ;;  %v5773_v51 = vld [vmem:[#allocation2 + $0x120] sm:$0xff]  }
  0xfd   :  { %5347 = vst [vmem:[#allocation2 + $0x98] sm:$0xff] %v4817_v48   ;;  %v822_v52 = vmul.f32 %v4104_v47, %v814_v49  ;;  %v821_v53 = vmul.f32 %v4104_v47, %v812_v50  ;;  %5509 = vmatpush3.bf16.msra.mxu0 %v5773_v51 }
  0xff   :  { %v4937_v55 = vpack.c.bf16 %v822_v52, %v821_v53 }
 0x100   :  { %v670_v56 = vpop.permute.xlu1 %669  ;;  %v668_v57 = vpop.permute.xlu0 %667  ;;  %v5774_v58 = vld [vmem:[#allocation2 + $0xd8] sm:$0xff]  }
 0x101   :  { %5371 = vst [vmem:[#allocation2 + $0x158] sm:$0xff] %v4937_v55   ;;  %v678_v59 = vmul.f32 %v6252_v54, %v670_v56  ;;  %v677_v60 = vmul.f32 %v6252_v54, %v668_v57  ;;  %5482 = vmatprep.subr.bf16.mxu1 %v5774_v58 }
 0x103   :  { %v4897_v61 = vpack.c.bf16 %v678_v59, %v677_v60 }
 0x104   :  { %v522_v62 = vpop.permute.xlu1 %521  ;;  %v520_v63 = vpop.permute.xlu0 %519  ;;  %v5775_v4 = vld [vmem:[#allocation2 + $0x98] sm:$0xff]  }
 0x105   :  { %5363 = vst [vmem:[#allocation2 + $0x118] sm:$0xff] %v4897_v61   ;;  %v532_v5 = vmul.f32 %v6239_v33, %v522_v62  ;;  %v531_v6 = vmul.f32 %v6239_v33, %v520_v63  ;;  %5483 = vmatpush3.bf16.msra.mxu1 %v5775_v4  ;;  %v4119_v4 = vld [vmem:[%s6807_s1 + $0x18] ss:$0 sm:$0xff] }
 0x107   :  { %v4852_v7 = vpack.c.bf16 %v532_v5, %v531_v6 }
 0x108   :  { %v386_v8 = vpop.permute.xlu1 %385  ;;  %v384_v9 = vpop.permute.xlu0 %383  ;;  %v5776_v10 = vld [vmem:[#allocation2 + $0x158] sm:$0xff]  }
 0x109   :  { %5354 = vst [vmem:[#allocation2 + $0xd0] sm:$0xff] %v4852_v7   ;;  %v396_v11 = vmul.f32 %v4044_v40, %v386_v8  ;;  %v395_v12 = vmul.f32 %v4044_v40, %v384_v9  ;;  %5510 = vmatprep.subr.bf16.mxu0 %v5776_v10 }
 0x10b   :  { %v4812_v13 = vpack.c.bf16 %v396_v11, %v395_v12  ;;  %v5791_v11 = vld [vmem:[%s6806_s2 + $0x8] ss:$28 sps:$4 sm:$0xff]  }
 0x10c   :  { %v810_v0 = vpop.permute.xlu1 %809  ;;  %v808_v1 = vpop.permute.xlu0 %807  ;;  %v5777_v14 = vld [vmem:[#allocation2 + $0x118] sm:$0xff]   ;;  %v5796_v12 = vld [vmem:[%s6806_s2 + $0x44] ss:$28 sps:$4 sm:$0xff]  }
 0x10d   :  { %5346 = vst [vmem:[#allocation2 + $0x90] sm:$0xff] %v4812_v13   ;;  %v820_v15 = vmul.f32 %v4104_v47, %v810_v0  ;;  %v819_v16 = vmul.f32 %v4104_v47, %v808_v1  ;;  %5511 = vmatpush3.bf16.msra.mxu0 %v5777_v14 }
 0x10f   :  { %v4932_v17 = vpack.c.bf16 %v820_v15, %v819_v16 }
 0x110   :  { %v666_v18 = vpop.permute.xlu1 %665  ;;  %v664_v2 = vpop.permute.xlu0 %663  ;;  %v5778_v3 = vld [vmem:[#allocation2 + $0xd0] sm:$0xff]  }
 0x111   :  { %5370 = vst [vmem:[#allocation2 + $0x150] sm:$0xff] %v4932_v17   ;;  %v676_v19 = vmul.f32 %v6252_v54, %v666_v18  ;;  %v675_v20 = vmul.f32 %v6252_v54, %v664_v2  ;;  %5484 = vmatprep.subr.bf16.mxu1 %v5778_v3  ;;  %v5798_v2 = vld [vmem:[%s6806_s2 + $0x10] ss:$28 sps:$4 sm:$0xff]   ;;  %v5801_v3 = vld [vmem:[%s6806_s2 + $0x40] ss:$28 sps:$4 sm:$0xff]  }
 0x113   :  { %v4892_v22 = vpack.c.bf16 %v676_v19, %v675_v20  ;;  %v5804_v19 = vld [vmem:[%s6806_s2 + $0x4c] ss:$28 sps:$4 sm:$0xff]   ;;  %v5807_v20 = vld [vmem:[%s6806_s2 + $0x18] ss:$28 sps:$4 sm:$0xff]  }
 0x114   :  { %v354_v24 = vpop.permute.xlu1 %353  ;;  %v352_v25 = vpop.permute.xlu0 %351  ;;  %v5779_v26 = vld [vmem:[#allocation2 + $0x90] sm:$0xff]  }
 0x115   :  { %5362 = vst [vmem:[#allocation2 + $0x110] sm:$0xff] %v4892_v22   ;;  %v362_v27 = vmul.f32 %v6263_v21, %v354_v24  ;;  %v361_v28 = vmul.f32 %v6263_v21, %v352_v25  ;;  %5485 = vmatpush3.bf16.msra.mxu1 %v5779_v26  ;;  %v5806_v24 = vld [vmem:[%s6806_s2 + $0x48] ss:$28 sps:$4 sm:$0xff]   ;;  %v5808_v25 = vld [vmem:[%s6806_s2 + $0x50] ss:$28 sps:$4 sm:$0xff]  }
 0x116   :  { %5486 = vmatprep.subr.bf16.mxu1 %v5782_v23 }
 0x117   :  { %v4807_v30 = vpack.c.bf16 %v362_v27, %v361_v28 }
 0x118   :  { %v778_v31 = vpop.permute.xlu1 %777  ;;  %v776_v32 = vpop.permute.xlu0 %775  ;;  %v5780_v34 = vld [vmem:[#allocation2 + $0x150] sm:$0xff]  }
 0x119   :  { %5345 = vst [vmem:[#allocation2 + $0x88] sm:$0xff] %v4807_v30   ;;  %v786_v35 = vmul.f32 %v4099_v29, %v778_v31  ;;  %v785_v36 = vmul.f32 %v4099_v29, %v776_v32  ;;  %5512 = vmatprep.subr.bf16.mxu0 %v5780_v34 }
 0x11b   :  { %v4927_v38 = vpack.c.bf16 %v786_v35, %v785_v36 }
 0x11c   :  { %v634_v39 = vpop.permute.xlu1 %633  ;;  %v632_v40 = vpop.permute.xlu0 %631  ;;  %v5781_v41 = vld [vmem:[#allocation2 + $0x110] sm:$0xff]  }
 0x11d   :  { %5369 = vst [vmem:[#allocation2 + $0x148] sm:$0xff] %v4927_v38   ;;  %v642_v42 = vmul.f32 %v6273_v37, %v634_v39  ;;  %v641_v43 = vmul.f32 %v6273_v37, %v632_v40  ;;  %5513 = vmatpush3.bf16.msra.mxu0 %v5781_v41 }
 0x11f   :  { %v4887_v44 = vpack.c.bf16 %v642_v42, %v641_v43 }
 0x120   :  { %v350_v46 = vpop.permute.xlu1 %349  ;;  %v348_v47 = vpop.permute.xlu0 %347  ;;  %v5783_v48 = vld [vmem:[#allocation2 + $0x88] sm:$0xff]  }
 0x121   :  { %5361 = vst [vmem:[#allocation2 + $0x108] sm:$0xff] %v4887_v44   ;;  %v360_v49 = vmul.f32 %v6263_v21, %v350_v46  ;;  %v359_v50 = vmul.f32 %v6263_v21, %v348_v47  ;;  %5487 = vmatpush3.bf16.msra.mxu1 %v5783_v48 }
 0x122   :  { %5488 = vmatprep.subr.bf16.mxu1 %v5786_v45  ;;  %v1067_v45 = vld [vmem:[%s6808_s3] sm:$0xff] }
 0x123   :  { %v4802_v51 = vpack.c.bf16 %v360_v49, %v359_v50 }
 0x124   :  { %v774_v52 = vpop.permute.xlu1 %773  ;;  %v772_v53 = vpop.permute.xlu0 %771  ;;  %v5784_v55 = vld [vmem:[#allocation2 + $0x148] sm:$0xff]  }
 0x125   :  { %5344 = vst [vmem:[#allocation2 + $0x80] sm:$0xff] %v4802_v51   ;;  %v784_v56 = vmul.f32 %v4099_v29, %v774_v52  ;;  %v783_v57 = vmul.f32 %v4099_v29, %v772_v53  ;;  %5514 = vmatprep.subr.bf16.mxu0 %v5784_v55  ;;  %v1069_v52 = vld [vmem:[%s6808_s3 + $0x10] sm:$0xff] }
 0x127   :  { %v4922_v58 = vpack.c.bf16 %v784_v56, %v783_v57  ;;  %v1068_v57 = vld [vmem:[%s6808_s3 + $0x8] sm:$0xff] }
 0x128   :  { %v630_v59 = vpop.permute.xlu1 %629  ;;  %v628_v60 = vpop.permute.xlu0 %627  ;;  %v5785_v61 = vld [vmem:[#allocation2 + $0x108] sm:$0xff]  }
 0x129   :  { %5368 = vst [vmem:[#allocation2 + $0x140] sm:$0xff] %v4922_v58   ;;  %v640_v62 = vmul.f32 %v6273_v37, %v630_v59  ;;  %v639_v63 = vmul.f32 %v6273_v37, %v628_v60  ;;  %5515 = vmatpush3.bf16.msra.mxu0 %v5785_v61 }
 0x12b   :  { %v4882_v5 = vpack.c.bf16 %v640_v62, %v639_v63 }
 0x12c   :  { %v922_v6 = vpop.permute.xlu1 %921  ;;  %v920_v7 = vpop.permute.xlu0 %919  ;;  %v5787_v8 = vld [vmem:[#allocation2 + $0x80] sm:$0xff]  }
 0x12d   :  { %5360 = vst [vmem:[#allocation2 + $0x100] sm:$0xff] %v4882_v5   ;;  %v930_v9 = vmul.f32 %v4119_v4, %v922_v6  ;;  %v929_v10 = vmul.f32 %v4119_v4, %v920_v7  ;;  %5489 = vmatpush3.bf16.msra.mxu1 %v5787_v8  ;;  %v1070_v6 = vld [vmem:[%s6808_s3 + $0x18] sm:$0xff] }
 0x12f   :  { %v4967_v13 = vpack.c.bf16 %v930_v9, %v929_v10 }
 0x130   :  { %v918_v0 = vpop.permute.xlu1 %917  ;;  %v916_v1 = vpop.permute.xlu0 %915  ;;  %v5794_v14 = vld [vmem:[#allocation2 + $0x140] sm:$0xff]   ;;  %1530 = vmatmul.mubr.bf16.vlgmr.msra.gmra.mxu1 %v5791_v11 }
 0x131   :  { %5377 = vst [vmem:[#allocation2 + $0x188] sm:$0xff] %v4967_v13   ;;  %v928_v15 = vmul.f32 %v4119_v4, %v918_v0  ;;  %v927_v16 = vmul.f32 %v4119_v4, %v916_v1  ;;  %5516 = vmatprep.subr.bf16.mxu0 %v5794_v14  ;;  %1537 = vmatprep.mubr.bf16.mxu1 %v5796_v12 }
 0x133   :  { %v4962_v17 = vpack.c.bf16 %v928_v15, %v927_v16 }
 0x134   :  { %v5795_v18 = vld [vmem:[#allocation2 + $0x100] sm:$0xff]  }
 0x135   :  { %5376 = vst [vmem:[#allocation2 + $0x180] sm:$0xff] %v4962_v17   ;;  %5517 = vmatpush3.bf16.msra.mxu0 %v5795_v18 }
 0x138   :  { %v5802_v22 = vld [vmem:[#allocation2 + $0x188] sm:$0xff]   ;;  %1538 = vmatmul.mubr.bf16.gmra.mxu1 %v5801_v3  ;;  %1579 = vmatmul.mubr.bf16.vlgmr.msra.gmra.mxu0 %v5798_v2 }
 0x139   :  { %5665 = vmatprep.subr.bf16.mxu1 %v5802_v22  ;;  %1586 = vmatprep.mubr.bf16.mxu0 %v5804_v19 }
 0x13a   :  { %5666 = vmatpush3.bf16.msra.mxu1 %v5802_v22  ;;  %5669 = vmatprep.mubr.msk.bf16.mxu1 %vm1441_vm0, %v5807_v20 }
 0x13c   :  { %v5803_v23 = vld [vmem:[#allocation2 + $0x180] sm:$0xff]  }
 0x13d   :  { %5667 = vmatprep.subr.bf16.mxu1 %v5803_v23 }
 0x13e   :  { %5668 = vmatpush3.bf16.msra.mxu1 %v5803_v23 }
 0x140   :  { %1587 = vmatmul.mubr.bf16.gmra.mxu0 %v5806_v24 }
 0x141   :  { %5670 = vmatmul.mubr.msk.bf16.vlgmr.msra.gmra.mxu1 %vm1441_vm0, %v5808_v25  ;;  %v6326_v25 = vld [vmem:[%s6807_s1 + $0xc] ss:$0 sm:$0xff] }
 0x180   :  { %v5462_v26 = vpop.f32.mrf.mxu0 }
 0x182   :  { %v5463_v27 = vpop.f32.mrf.mxu0 }
 0x183   :  { %v5464_v42 = vadd.f32 %v5463_v27, %v5462_v26 }
 0x184   :  { %v5465_v28 = vpop.f32.mrf.mxu0 }
 0x185   :  { %v1483_v50 = vadd.f32 %v5464_v42, %v1067_v45 }
 0x186   :  { %v5466_v29 = vpop.f32.mrf.mxu0 }
 0x187   :  { %v5467_v51 = vadd.f32 %v5466_v29, %v5465_v28 }
 0x188   :  { %v5468_v30 = vpop.f32.mrf.mxu0 }
 0x189   :  { %v1486_v5 = vadd.f32 %v5467_v51, %v1068_v57 }
 0x18a   :  { %v5469_v31 = vpop.f32.mrf.mxu0 }
 0x18b   :  { %v5470_v49 = vadd.f32 %v5469_v31, %v5468_v30 }
 0x18c   :  { %v5471_v34 = vpop.f32.mrf.mxu0 }
 0x18d   :  { %v1491_v62 = vadd.f32 %v5470_v49, %v1069_v52 }
 0x18e   :  { %v5472_v38 = vpop.f32.mrf.mxu0 }
 0x18f   :  { %v5473_v63 = vadd.f32 %v5472_v38, %v5471_v34  ;;  %v5827_v34 = vld [vmem:[%s6809_s4 + $0x4] ss:$12 sps:$4 sm:$0xff]  }
 0x190   :  { %2148 = vmatprep.mubr.bf16.mxu1 %v5827_v34 }
 0x191   :  { %v1494_v15 = vadd.f32 %v5473_v63, %v1070_v6 }
 0x1f0   :  { %v5490_v32 = vpop.f32.mrf.mxu1 }
 0x1f2   :  { %v5491_v35 = vpop.f32.mrf.mxu1 }
 0x1f3   :  { %v5492_v46 = vadd.f32 %v5491_v35, %v5490_v32 }
 0x1f4   :  { %v5493_v36 = vpop.f32.mrf.mxu1 }
 0x1f5   :  { %v1532_v59 = vadd.f32 %v5492_v46, %v1483_v50 }
 0x1f6   :  { %v5494_v39 = vpop.f32.mrf.mxu1 }
 0x1f7   :  { %v5495_v60 = vadd.f32 %v5494_v39, %v5493_v36 }
 0x1f8   :  { %v5496_v40 = vpop.f32.mrf.mxu1  ;;  %v5518_v41 = vpop.f32.mrf.mxu0 }
 0x1f9   :  { %v1535_v0 = vadd.f32 %v5495_v60, %v1486_v5 }
 0x1fa   :  { %v5497_v43 = vpop.f32.mrf.mxu1  ;;  %v5519_v44 = vpop.f32.mrf.mxu0 }
 0x1fb   :  { %v5520_v53 = vadd.f32 %v5519_v44, %v5518_v41  ;;  %v5498_v58 = vadd.f32 %v5497_v43, %v5496_v40  ;;  %v6371_v44 = vld [vmem:[%s6807_s1 + $0xb] ss:$0 sm:$0xff] }
 0x1fc   :  { %v5499_v47 = vpop.f32.mrf.mxu1  ;;  %v5521_v48 = vpop.f32.mrf.mxu0 }
 0x1fd   :  { %v1581_v9 = vadd.f32 %v5520_v53, %v1532_v59  ;;  %v1540_v10 = vadd.f32 %v5498_v58, %v1491_v62 }
 0x1fe   :  { %v5500_v55 = vpop.f32.mrf.mxu1  ;;  %v5522_v56 = vpop.f32.mrf.mxu0 }
 0x1ff   :  { %v5523_v7 = vadd.f32 %v5522_v56, %v5521_v48  ;;  %v5501_v11 = vadd.f32 %v5500_v55, %v5499_v47 }
 0x200   :  { %v5524_v61 = vpop.f32.mrf.mxu0 }
 0x201   :  { %v5671_v4 = vpop.f32.mrf.mxu1  ;;  %v1584_v2 = vadd.f32 %v5523_v7, %v1535_v0  ;;  %v1543_v3 = vadd.f32 %v5501_v11, %v1494_v15 }
 0x202   :  { %v5525_v8 = vpop.f32.mrf.mxu0 }
 0x203   :  { %v5526_v12 = vadd.f32 %v5525_v8, %v5524_v61  ;;  %v1629_v13 = vpop.f32.mrf.mxu1 }
 0x204   :  { %v1630_v1 = vadd.f32 %v1629_v13, %v1581_v9  ;;  %v5527_v14 = vpop.f32.mrf.mxu0 }
 0x205   :  { %v1589_v16 = vadd.f32 %v5526_v12, %v1540_v10  ;;  %v5672_v17 = vpop.f32.mrf.mxu1 }
 0x206   :  { %v5528_v18 = vpop.f32.mrf.mxu0  ;;  %1860 = vrot.lane.b32.xlu0 %v1630_v1, %s5951_s20  ;;  %v1772_v26 = vmul.f32 %v6326_v25, %v1630_v1 }
 0x207   :  { %v5529_v19 = vadd.f32 %v5528_v18, %v5527_v14  ;;  %v1632_v20 = vpop.f32.mrf.mxu1  ;;  %v1638_v23 = vadd.f32 %v5671_v4, %v1589_v16 }
 0x208   :  { %v1633_v22 = vadd.f32 %v1632_v20, %v1584_v2 }
 0x209   :  { %v1592_v24 = vadd.f32 %v5529_v19, %v1543_v3  ;;  %v1774_v30 = vmul.f32 %v6326_v25, %v1638_v23 }
 0x20a   :  { %v1773_v27 = vmul.f32 %v6326_v25, %v1633_v22  ;;  %1862 = vrot.lane.b32.xlu1 %v1633_v22, %s5951_s20  ;;  %1740 = vrot.lane.b32.xlu0 %v1630_v1, %s5941_s21 }
 0x20b   :  { %v1641_v28 = vadd.f32 %v5672_v17, %v1592_v24 }
 0x20c   :  { %v5012_v29 = vpack.c.bf16 %v1773_v27, %v1772_v26 }
 0x20d   :  { %v1775_v31 = vmul.f32 %v6326_v25, %v1641_v28 }
 0x20e   :  { %5385 = vst [vmem:[#allocation2 + $0x40] sm:$0xff] %v5012_v29   ;;  %1742 = vrot.lane.b32.xlu1 %v1633_v22, %s5941_s21  ;;  %1828 = vrot.lane.b32.xlu0 %v1630_v1, %s5954_s16 }
 0x20f   :  { %v5017_v32 = vpack.c.bf16 %v1775_v31, %v1774_v30 }
 0x211   :  { %5386 = vst [vmem:[#allocation2 + $0x48] sm:$0xff] %v5017_v32  }
 0x212   :  { %1830 = vrot.lane.b32.xlu1 %v1633_v22, %s5954_s16  ;;  %1708 = vrot.lane.b32.xlu0 %v1630_v1, %s5952_s28 }
 0x216   :  { %1710 = vrot.lane.b32.xlu1 %v1633_v22, %s5952_s28  ;;  %1796 = vrot.lane.b32.xlu0 %v1630_v1, %s5948_s13 }
 0x21a   :  { %1798 = vrot.lane.b32.xlu1 %v1633_v22, %s5948_s13  ;;  %1864 = vrot.lane.b32.xlu0 %v1638_v23, %s5951_s20 }
 0x21e   :  { %1866 = vrot.lane.b32.xlu1 %v1641_v28, %s5951_s20  ;;  %1744 = vrot.lane.b32.xlu0 %v1638_v23, %s5941_s21 }
 0x222   :  { %1746 = vrot.lane.b32.xlu1 %v1641_v28, %s5941_s21  ;;  %1832 = vrot.lane.b32.xlu0 %v1638_v23, %s5954_s16 }
 0x226   :  { %1834 = vrot.lane.b32.xlu1 %v1641_v28, %s5954_s16  ;;  %1712 = vrot.lane.b32.xlu0 %v1638_v23, %s5952_s28 }
 0x22a   :  { %1714 = vrot.lane.b32.xlu1 %v1641_v28, %s5952_s28  ;;  %1800 = vrot.lane.b32.xlu0 %v1638_v23, %s5948_s13 }
 0x22e   :  { %1802 = vrot.lane.b32.xlu1 %v1641_v28, %s5948_s13  ;;  %1680 = vrot.lane.b32.xlu0 %v1638_v23, %s5933_s30 }
 0x232   :  { %1682 = vrot.lane.b32.xlu1 %v1641_v28, %s5933_s30  ;;  %1676 = vrot.lane.b32.xlu0 %v1630_v1, %s5933_s30 }
 0x236   :  { %1678 = vrot.lane.b32.xlu1 %v1633_v22, %s5933_s30  ;;  %1648 = vrot.lane.b32.xlu0 %v1638_v23, %s5934_s15 }
 0x23a   :  { %1650 = vrot.lane.b32.xlu1 %v1641_v28, %s5934_s15  ;;  %1644 = vrot.lane.b32.xlu0 %v1630_v1, %s5934_s15 }
 0x23e   :  { %1646 = vrot.lane.b32.xlu1 %v1633_v22, %s5934_s15  ;;  %1896 = vrot.lane.b32.xlu0 %v1638_v23, %s5947_s29 }
 0x242   :  { %1898 = vrot.lane.b32.xlu1 %v1641_v28, %s5947_s29  ;;  %1892 = vrot.lane.b32.xlu0 %v1630_v1, %s5947_s29 }
 0x246   :  { %1894 = vrot.lane.b32.xlu1 %v1633_v22, %s5947_s29 }
 0x278   :  { %v1861_v35 = vpop.permute.xlu0 %1860 }
 0x279   :  { %v1868_v39 = vmul.f32 %v6252_v54, %v1861_v35 }
 0x27c   :  { %v1863_v36 = vpop.permute.xlu1 %1862  ;;  %v1741_v38 = vpop.permute.xlu0 %1740 }
 0x27d   :  { %v1869_v40 = vmul.f32 %v6252_v54, %v1863_v36  ;;  %v1748_v45 = vmul.f32 %v6371_v44, %v1741_v38 }
 0x27f   :  { %v5042_v41 = vpack.c.bf16 %v1869_v40, %v1868_v39 }
 0x280   :  { %v1743_v42 = vpop.permute.xlu1 %1742  ;;  %v1829_v43 = vpop.permute.xlu0 %1828 }
 0x281   :  { %5391 = vst [vmem:[#allocation2 + $0x70] sm:$0xff] %v5042_v41   ;;  %v1749_v46 = vmul.f32 %v6371_v44, %v1743_v42  ;;  %v1836_v50 = vmul.f32 %v6273_v37, %v1829_v43 }
 0x283   :  { %v5002_v47 = vpack.c.bf16 %v1749_v46, %v1748_v45 }
 0x284   :  { %v1831_v48 = vpop.permute.xlu1 %1830  ;;  %v1709_v49 = vpop.permute.xlu0 %1708 }
 0x285   :  { %5383 = vst [vmem:[#allocation2 + $0x30] sm:$0xff] %v5002_v47   ;;  %v1837_v51 = vmul.f32 %v6273_v37, %v1831_v48  ;;  %v1716_v56 = vmul.f32 %v6263_v21, %v1709_v49  ;;  %v6403_v49 = vld [vmem:[%s6807_s1 + $0x6] ss:$0 sm:$0xff] }
 0x287   :  { %v5032_v52 = vpack.c.bf16 %v1837_v51, %v1836_v50 }
 0x288   :  { %v1711_v53 = vpop.permute.xlu1 %1710  ;;  %v1797_v55 = vpop.permute.xlu0 %1796  ;;  %v5811_v27 = vld [vmem:[#allocation2 + $0x70] sm:$0xff]  }
 0x289   :  { %5389 = vst [vmem:[#allocation2 + $0x60] sm:$0xff] %v5032_v52   ;;  %v1717_v57 = vmul.f32 %v6263_v21, %v1711_v53  ;;  %v1804_v61 = vmul.f32 %v6239_v33, %v1797_v55 }
 0x28b   :  { %v4992_v58 = vpack.c.bf16 %v1717_v57, %v1716_v56 }
 0x28c   :  { %v1799_v59 = vpop.permute.xlu1 %1798  ;;  %v1865_v60 = vpop.permute.xlu0 %1864  ;;  %v5812_v29 = vld [vmem:[#allocation2 + $0x30] sm:$0xff]  }
 0x28d   :  { %5381 = vst [vmem:[#allocation2 + $0x20] sm:$0xff] %v4992_v58   ;;  %v1805_v62 = vmul.f32 %v6239_v33, %v1799_v59  ;;  %v1870_v6 = vmul.f32 %v6252_v54, %v1865_v60 }
 0x28f   :  { %v5022_v63 = vpack.c.bf16 %v1805_v62, %v1804_v61 }
 0x290   :  { %v1867_v4 = vpop.permute.xlu1 %1866  ;;  %v1745_v5 = vpop.permute.xlu0 %1744  ;;  %v5815_v42 = vld [vmem:[#allocation2 + $0x60] sm:$0xff]  }
 0x291   :  { %5387 = vst [vmem:[#allocation2 + $0x50] sm:$0xff] %v5022_v63   ;;  %v1871_v7 = vmul.f32 %v6252_v54, %v1867_v4  ;;  %v1750_v11 = vmul.f32 %v6371_v44, %v1745_v5  ;;  %v6412_v63 = vld [vmem:[%s6807_s1 + $0x12] ss:$0 sm:$0xff] }
 0x293   :  { %v5047_v8 = vpack.c.bf16 %v1871_v7, %v1870_v6  ;;  %v5821_v6 = vld [vmem:[#allocation2 + $0x48] sm:$0xff]  }
 0x294   :  { %v1747_v9 = vpop.permute.xlu1 %1746  ;;  %v1833_v10 = vpop.permute.xlu0 %1832  ;;  %v5816_v45 = vld [vmem:[#allocation2 + $0x20] sm:$0xff]  }
 0x295   :  { %5392 = vst [vmem:[#allocation2 + $0x78] sm:$0xff] %v5047_v8   ;;  %v1751_v12 = vmul.f32 %v6371_v44, %v1747_v9  ;;  %v1838_v14 = vmul.f32 %v6273_v37, %v1833_v10 }
 0x297   :  { %v5007_v13 = vpack.c.bf16 %v1751_v12, %v1750_v11 }
 0x298   :  { %v1835_v0 = vpop.permute.xlu1 %1834  ;;  %v1713_v1 = vpop.permute.xlu0 %1712  ;;  %v5819_v59 = vld [vmem:[#allocation2 + $0x50] sm:$0xff]  }
 0x299   :  { %5384 = vst [vmem:[#allocation2 + $0x38] sm:$0xff] %v5007_v13   ;;  %v1839_v15 = vmul.f32 %v6273_v37, %v1835_v0  ;;  %v1718_v2 = vmul.f32 %v6263_v21, %v1713_v1  ;;  %v5823_v13 = vld [vmem:[#allocation2 + $0x40] sm:$0xff]  }
 0x29b   :  { %v5037_v16 = vpack.c.bf16 %v1839_v15, %v1838_v14  ;;  %v5825_v14 = vld [vmem:[%s6809_s4] ss:$12 sps:$4 sm:$0xff]   ;;  %v5830_v15 = vld [vmem:[%s6809_s4 + $0x1c] ss:$12 sps:$4 sm:$0xff]  }
 0x29c   :  { %v1715_v17 = vpop.permute.xlu1 %1714  ;;  %v1801_v18 = vpop.permute.xlu0 %1800  ;;  %v5809_v54 = vld [vmem:[#allocation2 + $0x78] sm:$0xff]  }
 0x29d   :  { %5390 = vst [vmem:[#allocation2 + $0x68] sm:$0xff] %v5037_v16   ;;  %v1719_v3 = vmul.f32 %v6263_v21, %v1715_v17  ;;  %5534 = vmatprep.subr.bf16.mxu1 %v5809_v54  ;;  %v1806_v24 = vmul.f32 %v6239_v33, %v1801_v18  ;;  %v6394_v21 = vld [vmem:[%s6807_s1 + $0x7] ss:$0 sm:$0xff]  ;;  %v5833_v54 = vld [vmem:[%s6809_s4 + $0x8] ss:$12 sps:$4 sm:$0xff]  }
 0x29e   :  { %v5832_v18 = vld [vmem:[%s6809_s4 + $0x18] ss:$12 sps:$4 sm:$0xff]  }
 0x29f   :  { %v4997_v19 = vpack.c.bf16 %v1719_v3, %v1718_v2  ;;  %v5834_v2 = vld [vmem:[%s6809_s4 + $0x20] ss:$12 sps:$4 sm:$0xff]  }
 0x2a0   :  { %v1803_v20 = vpop.permute.xlu1 %1802  ;;  %v1681_v22 = vpop.permute.xlu0 %1680  ;;  %v5810_v23 = vld [vmem:[#allocation2 + $0x38] sm:$0xff]  }
 0x2a1   :  { %5382 = vst [vmem:[#allocation2 + $0x28] sm:$0xff] %v4997_v19   ;;  %v1807_v26 = vmul.f32 %v6239_v33, %v1803_v20  ;;  %5535 = vmatpush3.bf16.msra.mxu1 %v5810_v23  ;;  %v1686_v34 = vmul.f32 %v6394_v21, %v1681_v22 }
 0x2a2   :  { %5536 = vmatprep.subr.bf16.mxu1 %v5811_v27 }
 0x2a3   :  { %v5027_v28 = vpack.c.bf16 %v1807_v26, %v1806_v24 }
 0x2a4   :  { %v1683_v30 = vpop.permute.xlu1 %1682  ;;  %v1677_v31 = vpop.permute.xlu0 %1676  ;;  %v5813_v32 = vld [vmem:[#allocation2 + $0x68] sm:$0xff]  }
 0x2a5   :  { %5388 = vst [vmem:[#allocation2 + $0x58] sm:$0xff] %v5027_v28   ;;  %v1687_v35 = vmul.f32 %v6394_v21, %v1683_v30  ;;  %5537 = vmatpush3.bf16.msra.mxu1 %v5812_v29  ;;  %v1684_v40 = vmul.f32 %v6394_v21, %v1677_v31  ;;  %v1970_v28 = vld [vmem:[%s6810_s5 + $0x10] sm:$0xff]  ;;  %v1968_v31 = vld [vmem:[%s6810_s5] sm:$0xff] }
 0x2a6   :  { %5538 = vmatprep.subr.bf16.mxu1 %v5813_v32 }
 0x2a7   :  { %v4987_v33 = vpack.c.bf16 %v1687_v35, %v1686_v34 }
 0x2a8   :  { %v1679_v36 = vpop.permute.xlu1 %1678  ;;  %v1649_v38 = vpop.permute.xlu0 %1648  ;;  %v5814_v39 = vld [vmem:[#allocation2 + $0x28] sm:$0xff]  }
 0x2a9   :  { %5380 = vst [vmem:[#allocation2 + $0x18] sm:$0xff] %v4987_v33   ;;  %v1685_v41 = vmul.f32 %v6394_v21, %v1679_v36  ;;  %5539 = vmatpush3.bf16.msra.mxu1 %v5814_v39  ;;  %v1654_v50 = vmul.f32 %v6403_v49, %v1649_v38  ;;  %v1971_v33 = vld [vmem:[%s6810_s5 + $0x18] sm:$0xff] }
 0x2aa   :  { %5540 = vmatprep.subr.bf16.mxu1 %v5815_v42 }
 0x2ab   :  { %v4982_v43 = vpack.c.bf16 %v1685_v41, %v1684_v40  ;;  %v1969_v41 = vld [vmem:[%s6810_s5 + $0x8] sm:$0xff] }
 0x2ac   :  { %v1651_v46 = vpop.permute.xlu1 %1650  ;;  %v1645_v47 = vpop.permute.xlu0 %1644  ;;  %v5817_v48 = vld [vmem:[#allocation2 + $0x58] sm:$0xff]  }
 0x2ad   :  { %5379 = vst [vmem:[#allocation2 + $0x10] sm:$0xff] %v4982_v43   ;;  %v1655_v51 = vmul.f32 %v6403_v49, %v1651_v46  ;;  %5541 = vmatpush3.bf16.msra.mxu1 %v5816_v45  ;;  %v1652_v57 = vmul.f32 %v6403_v49, %v1645_v47 }
 0x2ae   :  { %5542 = vmatprep.subr.bf16.mxu1 %v5817_v48 }
 0x2af   :  { %v4977_v52 = vpack.c.bf16 %v1655_v51, %v1654_v50 }
 0x2b0   :  { %v1647_v53 = vpop.permute.xlu1 %1646  ;;  %v1897_v55 = vpop.permute.xlu0 %1896  ;;  %v5818_v56 = vld [vmem:[#allocation2 + $0x18] sm:$0xff]  }
 0x2b1   :  { %5378 = vst [vmem:[#allocation2 + $0x8] sm:$0xff] %v4977_v52   ;;  %v1653_v58 = vmul.f32 %v6403_v49, %v1647_v53  ;;  %5543 = vmatpush3.bf16.msra.mxu1 %v5818_v56  ;;  %v1902_v4 = vmul.f32 %v6412_v63, %v1897_v55 }
 0x2b2   :  { %5544 = vmatprep.subr.bf16.mxu1 %v5819_v59 }
 0x2b3   :  { %v4972_v60 = vpack.c.bf16 %v1653_v58, %v1652_v57 }
 0x2b4   :  { %v1899_v61 = vpop.permute.xlu1 %1898  ;;  %v5820_v62 = vld [vmem:[#allocation2 + $0x10] sm:$0xff]   ;;  %v1893_v7 = vpop.permute.xlu0 %1892 }
 0x2b5   :  { %4973 = vst [vmem:[#allocation2] sm:$0xff] %v4972_v60   ;;  %v1903_v5 = vmul.f32 %v6412_v63, %v1899_v61  ;;  %5545 = vmatpush3.bf16.msra.mxu1 %v5820_v62  ;;  %v1900_v11 = vmul.f32 %v6412_v63, %v1893_v7  ;;  %v5859_v62 = vld [vmem:[%s6809_s4 + $0x38] ss:$12 sps:$4 sm:$0xff]   ;;  %v6493_v7 = vld [vmem:[%s6807_s1 + $0x11] ss:$0 sm:$0xff] }
 0x2b6   :  { %5546 = vmatprep.subr.bf16.mxu1 %v5821_v6 }
 0x2b7   :  { %v5057_v8 = vpack.c.bf16 %v1903_v5, %v1902_v4 }
 0x2b8   :  { %v1895_v9 = vpop.permute.xlu1 %1894  ;;  %v5822_v10 = vld [vmem:[#allocation2 + $0x8] sm:$0xff]  }
 0x2b9   :  { %5394 = vst [vmem:[#allocation2 + $0x88] sm:$0xff] %v5057_v8   ;;  %v1901_v12 = vmul.f32 %v6412_v63, %v1895_v9  ;;  %5547 = vmatpush3.bf16.msra.mxu1 %v5822_v10 }
 0x2ba   :  { %5548 = vmatprep.subr.bf16.mxu1 %v5823_v13 }
 0x2bb   :  { %v5052_v0 = vpack.c.bf16 %v1901_v12, %v1900_v11 }
 0x2bc   :  { %v5824_v1 = vld [vmem:[#allocation2] sm:$0xff]  }
 0x2bd   :  { %5393 = vst [vmem:[#allocation2 + $0x80] sm:$0xff] %v5052_v0   ;;  %5549 = vmatpush3.bf16.msra.mxu1 %v5824_v1 }
 0x2c0   :  { %v5828_v16 = vld [vmem:[#allocation2 + $0x88] sm:$0xff]   ;;  %2149 = vmatmul.mubr.bf16.vlgmr.msra.gmra.mxu1 %v5825_v14 }
 0x2c1   :  { %5673 = vmatprep.subr.bf16.mxu1 %v5828_v16  ;;  %2156 = vmatprep.mubr.bf16.mxu1 %v5830_v15 }
 0x2c2   :  { %5674 = vmatpush3.bf16.msra.mxu1 %v5828_v16 }
 0x2c4   :  { %v5829_v17 = vld [vmem:[#allocation2 + $0x80] sm:$0xff]  }
 0x2c5   :  { %5675 = vmatprep.subr.bf16.mxu1 %v5829_v17 }
 0x2c6   :  { %5676 = vmatpush3.bf16.msra.mxu1 %v5829_v17 }
 0x2c8   :  { %2157 = vmatmul.mubr.bf16.gmra.mxu1 %v5832_v18 }
 0x2c9   :  { %5677 = vmatprep.mubr.msk.bf16.mxu1 %vm1441_vm0, %v5833_v54 }
 0x2d0   :  { %5678 = vmatmul.mubr.msk.bf16.vlgmr.msra.gmra.mxu1 %vm1441_vm0, %v5834_v2 }
 0x2d1   :  { %5685 = vmatprep.mubr.msk.bf16.mxu1 %vm1441_vm0, %v5859_v62 }
 0x380   :  { %v5550_v3 = vpop.f32.mrf.mxu1 }
 0x382   :  { %v5551_v19 = vpop.f32.mrf.mxu1 }
 0x383   :  { %v5552_v29 = vadd.f32 %v5551_v19, %v5550_v3  ;;  %v6504_v19 = vld [vmem:[%s6807_s1 + $0x8] ss:$0 sm:$0xff] }
 0x384   :  { %v5553_v20 = vpop.f32.mrf.mxu1 }
 0x385   :  { %v2151_v39 = vadd.f32 %v5552_v29, %v1968_v31 }
 0x386   :  { %v5554_v22 = vpop.f32.mrf.mxu1 }
 0x387   :  { %v5555_v36 = vadd.f32 %v5554_v22, %v5553_v20 }
 0x388   :  { %v5556_v23 = vpop.f32.mrf.mxu1 }
 0x389   :  { %v2154_v48 = vadd.f32 %v5555_v36, %v1969_v41 }
 0x38a   :  { %v5557_v24 = vpop.f32.mrf.mxu1 }
 0x38b   :  { %v5558_v26 = vadd.f32 %v5557_v24, %v5556_v23 }
 0x38c   :  { %v5559_v27 = vpop.f32.mrf.mxu1 }
 0x38d   :  { %v2159_v34 = vadd.f32 %v5558_v26, %v1970_v28 }
 0x38e   :  { %v5560_v30 = vpop.f32.mrf.mxu1 }
 0x38f   :  { %v5561_v32 = vadd.f32 %v5560_v30, %v5559_v27 }
 0x390   :  { %v5679_v35 = vpop.f32.mrf.mxu1 }
 0x391   :  { %v2208_v38 = vadd.f32 %v5679_v35, %v2159_v34  ;;  %v2162_v45 = vadd.f32 %v5561_v32, %v1971_v33 }
 0x392   :  { %v2199_v40 = vpop.f32.mrf.mxu1 }
 0x393   :  { %v2216_v42 = vmax.f32 %v2208_v38, 0.0  ;;  %v2200_v43 = vadd.f32 %v2199_v40, %v2151_v39 }
 0x394   :  { %v5680_v46 = vpop.f32.mrf.mxu1 }
 0x395   :  { %v2211_v47 = vadd.f32 %v5680_v46, %v2162_v45  ;;  %2438 = vrot.lane.b32.xlu0 %v2216_v42, %s5951_s20  ;;  %v2214_v51 = vmax.f32 %v2200_v43, 0.0  ;;  %v2348_v55 = vmul.f32 %v6326_v25, %v2216_v42 }
 0x396   :  { %v2202_v50 = vpop.f32.mrf.mxu1 }
 0x397   :  { %v2217_v52 = vmax.f32 %v2211_v47, 0.0  ;;  %v2203_v53 = vadd.f32 %v2202_v50, %v2154_v48  ;;  %v2346_v58 = vmul.f32 %v6326_v25, %v2214_v51 }
 0x399   :  { %v2349_v56 = vmul.f32 %v6326_v25, %v2217_v52  ;;  %v2215_v57 = vmax.f32 %v2203_v53, 0.0  ;;  %2440 = vrot.lane.b32.xlu1 %v2217_v52, %s5951_s20  ;;  %2318 = vrot.lane.b32.xlu0 %v2216_v42, %s5941_s21 }
 0x39b   :  { %v5107_v59 = vpack.c.bf16 %v2349_v56, %v2348_v55  ;;  %v2347_v60 = vmul.f32 %v6326_v25, %v2215_v57  ;;  %v5853_v25 = vld [vmem:[%s6809_s4 + $0x34] ss:$12 sps:$4 sm:$0xff]  }
 0x39c   :  { %2724 = vmatprep.mubr.bf16.mxu0 %v5853_v25 }
 0x39d   :  { %5403 = vst [vmem:[#allocation2 + $0x48] sm:$0xff] %v5107_v59   ;;  %v5102_v61 = vpack.c.bf16 %v2347_v60, %v2346_v58  ;;  %2320 = vrot.lane.b32.xlu1 %v2217_v52, %s5941_s21  ;;  %2406 = vrot.lane.b32.xlu0 %v2216_v42, %s5954_s16 }
 0x39f   :  { %5402 = vst [vmem:[#allocation2 + $0x40] sm:$0xff] %v5102_v61  }
 0x3a1   :  { %2408 = vrot.lane.b32.xlu1 %v2217_v52, %s5954_s16  ;;  %2286 = vrot.lane.b32.xlu0 %v2216_v42, %s5952_s28 }
 0x3a5   :  { %2288 = vrot.lane.b32.xlu1 %v2217_v52, %s5952_s28  ;;  %2374 = vrot.lane.b32.xlu0 %v2216_v42, %s5948_s13 }
 0x3a9   :  { %2376 = vrot.lane.b32.xlu1 %v2217_v52, %s5948_s13  ;;  %2254 = vrot.lane.b32.xlu0 %v2216_v42, %s5933_s30 }
 0x3ad   :  { %2256 = vrot.lane.b32.xlu1 %v2217_v52, %s5933_s30  ;;  %2434 = vrot.lane.b32.xlu0 %v2214_v51, %s5951_s20 }
 0x3b1   :  { %2436 = vrot.lane.b32.xlu1 %v2215_v57, %s5951_s20  ;;  %2314 = vrot.lane.b32.xlu0 %v2214_v51, %s5941_s21 }
 0x3b5   :  { %2316 = vrot.lane.b32.xlu1 %v2215_v57, %s5941_s21  ;;  %2402 = vrot.lane.b32.xlu0 %v2214_v51, %s5954_s16 }
 0x3b9   :  { %2404 = vrot.lane.b32.xlu1 %v2215_v57, %s5954_s16  ;;  %2282 = vrot.lane.b32.xlu0 %v2214_v51, %s5952_s28 }
 0x3bd   :  { %2284 = vrot.lane.b32.xlu1 %v2215_v57, %s5952_s28  ;;  %2370 = vrot.lane.b32.xlu0 %v2214_v51, %s5948_s13 }
 0x3c1   :  { %2372 = vrot.lane.b32.xlu1 %v2215_v57, %s5948_s13  ;;  %2250 = vrot.lane.b32.xlu0 %v2214_v51, %s5933_s30 }
 0x3c5   :  { %2252 = vrot.lane.b32.xlu1 %v2215_v57, %s5933_s30  ;;  %2222 = vrot.lane.b32.xlu0 %v2216_v42, %s5934_s15 }
 0x3c9   :  { %2224 = vrot.lane.b32.xlu1 %v2217_v52, %s5934_s15  ;;  %2218 = vrot.lane.b32.xlu0 %v2214_v51, %s5934_s15 }
 0x3cd   :  { %2220 = vrot.lane.b32.xlu1 %v2215_v57, %s5934_s15  ;;  %2470 = vrot.lane.b32.xlu0 %v2216_v42, %s5947_s29 }
 0x3d1   :  { %2472 = vrot.lane.b32.xlu1 %v2217_v52, %s5947_s29  ;;  %2466 = vrot.lane.b32.xlu0 %v2214_v51, %s5947_s29  ;;  %v6524_v51 = vld [vmem:[%s6807_s1 + $0x10] ss:$0 sm:$0xff] }
 0x3d5   :  { %2468 = vrot.lane.b32.xlu1 %v2215_v57, %s5947_s29 }
 0x407   :  { %v2439_v4 = vpop.permute.xlu0 %2438 }
 0x408   :  { %v2444_v8 = vmul.f32 %v6493_v7, %v2439_v4 }
 0x40b   :  { %v2441_v5 = vpop.permute.xlu1 %2440  ;;  %v2319_v6 = vpop.permute.xlu0 %2318 }
 0x40c   :  { %v2445_v9 = vmul.f32 %v6493_v7, %v2441_v5  ;;  %v2324_v13 = vmul.f32 %v6371_v44, %v2319_v6 }
 0x40e   :  { %v5137_v10 = vpack.c.bf16 %v2445_v9, %v2444_v8 }
 0x40f   :  { %v2321_v11 = vpop.permute.xlu1 %2320  ;;  %v2407_v12 = vpop.permute.xlu0 %2406 }
 0x410   :  { %5409 = vst [vmem:[#allocation2 + $0x78] sm:$0xff] %v5137_v10   ;;  %v2325_v0 = vmul.f32 %v6371_v44, %v2321_v11  ;;  %v2412_v16 = vmul.f32 %v6273_v37, %v2407_v12 }
 0x412   :  { %v5097_v1 = vpack.c.bf16 %v2325_v0, %v2324_v13 }
 0x413   :  { %v2409_v14 = vpop.permute.xlu1 %2408  ;;  %v2287_v15 = vpop.permute.xlu0 %2286 }
 0x414   :  { %5401 = vst [vmem:[#allocation2 + $0x38] sm:$0xff] %v5097_v1   ;;  %v2413_v17 = vmul.f32 %v6273_v37, %v2409_v14  ;;  %v2292_v20 = vmul.f32 %v6504_v19, %v2287_v15  ;;  %v6511_v37 = vld [vmem:[%s6807_s1 + $0xd] ss:$0 sm:$0xff] }
 0x416   :  { %v5127_v18 = vpack.c.bf16 %v2413_v17, %v2412_v16 }
 0x417   :  { %v2289_v54 = vpop.permute.xlu1 %2288  ;;  %v2375_v2 = vpop.permute.xlu0 %2374  ;;  %v5835_v3 = vld [vmem:[#allocation2 + $0x78] sm:$0xff]  }
 0x418   :  { %5407 = vst [vmem:[#allocation2 + $0x68] sm:$0xff] %v5127_v18   ;;  %v2293_v22 = vmul.f32 %v6504_v19, %v2289_v54  ;;  %5566 = vmatprep.subr.bf16.mxu0 %v5835_v3  ;;  %v2380_v28 = vmul.f32 %v6511_v37, %v2375_v2 }
 0x41a   :  { %v5087_v23 = vpack.c.bf16 %v2293_v22, %v2292_v20 }
 0x41b   :  { %v2377_v24 = vpop.permute.xlu1 %2376  ;;  %v2255_v26 = vpop.permute.xlu0 %2254  ;;  %v5836_v27 = vld [vmem:[#allocation2 + $0x38] sm:$0xff]  }
 0x41c   :  { %5399 = vst [vmem:[#allocation2 + $0x28] sm:$0xff] %v5087_v23   ;;  %v2381_v29 = vmul.f32 %v6511_v37, %v2377_v24  ;;  %5567 = vmatpush3.bf16.msra.mxu0 %v5836_v27  ;;  %v2260_v34 = vmul.f32 %v6394_v21, %v2255_v26 }
 0x41e   :  { %v5117_v30 = vpack.c.bf16 %v2381_v29, %v2380_v28 }
 0x41f   :  { %v2257_v31 = vpop.permute.xlu1 %2256  ;;  %v2435_v32 = vpop.permute.xlu0 %2434  ;;  %v5839_v8 = vld [vmem:[#allocation2 + $0x68] sm:$0xff]  }
 0x420   :  { %5405 = vst [vmem:[#allocation2 + $0x58] sm:$0xff] %v5117_v30   ;;  %v2261_v35 = vmul.f32 %v6394_v21, %v2257_v31  ;;  %v2442_v39 = vmul.f32 %v6493_v7, %v2435_v32 }
 0x422   :  { %v5077_v33 = vpack.c.bf16 %v2261_v35, %v2260_v34  ;;  %v5847_v34 = vld [vmem:[#allocation2 + $0x48] sm:$0xff]  }
 0x423   :  { %v2437_v36 = vpop.permute.xlu1 %2436  ;;  %v2315_v38 = vpop.permute.xlu0 %2314  ;;  %v5840_v10 = vld [vmem:[#allocation2 + $0x28] sm:$0xff]  }
 0x424   :  { %5397 = vst [vmem:[#allocation2 + $0x18] sm:$0xff] %v5077_v33   ;;  %v2443_v40 = vmul.f32 %v6493_v7, %v2437_v36  ;;  %v2322_v45 = vmul.f32 %v6371_v44, %v2315_v38 }
 0x426   :  { %v5132_v41 = vpack.c.bf16 %v2443_v40, %v2442_v39 }
 0x427   :  { %v2317_v42 = vpop.permute.xlu1 %2316  ;;  %v2403_v43 = vpop.permute.xlu0 %2402  ;;  %v5843_v2 = vld [vmem:[#allocation2 + $0x58] sm:$0xff]  }
 0x428   :  { %5408 = vst [vmem:[#allocation2 + $0x70] sm:$0xff] %v5132_v41   ;;  %v2323_v46 = vmul.f32 %v6371_v44, %v2317_v42  ;;  %v2410_v52 = vmul.f32 %v6524_v51, %v2403_v43  ;;  %v5849_v41 = vld [vmem:[#allocation2 + $0x40] sm:$0xff]  }
 0x42a   :  { %v5092_v47 = vpack.c.bf16 %v2323_v46, %v2322_v45  ;;  %v5851_v45 = vld [vmem:[%s6809_s4 + $0x30] ss:$12 sps:$4 sm:$0xff]   ;;  %v5856_v46 = vld [vmem:[%s6809_s4 + $0x4c] ss:$12 sps:$4 sm:$0xff]  }
 0x42b   :  { %v2405_v48 = vpop.permute.xlu1 %2404  ;;  %v2283_v50 = vpop.permute.xlu0 %2282  ;;  %v5844_v20 = vld [vmem:[#allocation2 + $0x18] sm:$0xff]  }
 0x42c   :  { %5400 = vst [vmem:[#allocation2 + $0x30] sm:$0xff] %v5092_v47   ;;  %v2411_v53 = vmul.f32 %v6524_v51, %v2405_v48  ;;  %v2290_v59 = vmul.f32 %v6504_v19, %v2283_v50  ;;  %v5858_v50 = vld [vmem:[%s6809_s4 + $0x48] ss:$12 sps:$4 sm:$0xff]  }
 0x42e   :  { %v5122_v55 = vpack.c.bf16 %v2411_v53, %v2410_v52  ;;  %v5860_v52 = vld [vmem:[%s6809_s4 + $0x50] ss:$12 sps:$4 sm:$0xff]  }
 0x42f   :  { %v2285_v56 = vpop.permute.xlu1 %2284  ;;  %v2371_v57 = vpop.permute.xlu0 %2370  ;;  %v5837_v58 = vld [vmem:[#allocation2 + $0x70] sm:$0xff]  }
 0x430   :  { %5406 = vst [vmem:[#allocation2 + $0x60] sm:$0xff] %v5122_v55   ;;  %v2291_v60 = vmul.f32 %v6504_v19, %v2285_v56  ;;  %5568 = vmatprep.subr.bf16.mxu0 %v5837_v58  ;;  %v2378_v5 = vmul.f32 %v6511_v37, %v2371_v57 }
 0x432   :  { %v5082_v61 = vpack.c.bf16 %v2291_v60, %v2290_v59  ;;  %v4296_v59 = vld [vmem:[%s6810_s5 + $0x20] sm:$0xff] }
 0x433   :  { %v2373_v25 = vpop.permute.xlu1 %2372  ;;  %v2251_v62 = vpop.permute.xlu0 %2250  ;;  %v5838_v4 = vld [vmem:[#allocation2 + $0x30] sm:$0xff]  }
 0x434   :  { %5398 = vst [vmem:[#allocation2 + $0x20] sm:$0xff] %v5082_v61   ;;  %v2379_v6 = vmul.f32 %v6511_v37, %v2373_v25  ;;  %5569 = vmatpush3.bf16.msra.mxu0 %v5838_v4  ;;  %v2258_v0 = vmul.f32 %v6394_v21, %v2251_v62  ;;  %v4298_v62 = vld [vmem:[%s6810_s5 + $0x30] sm:$0xff] }
 0x435   :  { %5570 = vmatprep.subr.bf16.mxu0 %v5839_v8 }
 0x436   :  { %v5112_v9 = vpack.c.bf16 %v2379_v6, %v2378_v5 }
 0x437   :  { %v2253_v11 = vpop.permute.xlu1 %2252  ;;  %v2223_v12 = vpop.permute.xlu0 %2222  ;;  %v5841_v13 = vld [vmem:[#allocation2 + $0x60] sm:$0xff]  }
 0x438   :  { %5404 = vst [vmem:[#allocation2 + $0x50] sm:$0xff] %v5112_v9   ;;  %v2259_v1 = vmul.f32 %v6394_v21, %v2253_v11  ;;  %5571 = vmatpush3.bf16.msra.mxu0 %v5840_v10  ;;  %v2228_v18 = vmul.f32 %v6403_v49, %v2223_v12  ;;  %v4297_v9 = vld [vmem:[%s6810_s5 + $0x28] sm:$0xff] }
 0x439   :  { %5572 = vmatprep.subr.bf16.mxu0 %v5841_v13 }
 0x43a   :  { %v5072_v14 = vpack.c.bf16 %v2259_v1, %v2258_v0  ;;  %v4299_v1 = vld [vmem:[%s6810_s5 + $0x38] sm:$0xff] }
 0x43b   :  { %v2225_v15 = vpop.permute.xlu1 %2224  ;;  %v2219_v16 = vpop.permute.xlu0 %2218  ;;  %v5842_v17 = vld [vmem:[#allocation2 + $0x20] sm:$0xff]  }
 0x43c   :  { %5396 = vst [vmem:[#allocation2 + $0x10] sm:$0xff] %v5072_v14   ;;  %v2229_v54 = vmul.f32 %v6403_v49, %v2225_v15  ;;  %5573 = vmatpush3.bf16.msra.mxu0 %v5842_v17  ;;  %v2226_v26 = vmul.f32 %v6403_v49, %v2219_v16 }
 0x43d   :  { %5574 = vmatprep.subr.bf16.mxu0 %v5843_v2 }
 0x43e   :  { %v5067_v3 = vpack.c.bf16 %v2229_v54, %v2228_v18 }
 0x43f   :  { %v2221_v22 = vpop.permute.xlu1 %2220  ;;  %v2471_v23 = vpop.permute.xlu0 %2470  ;;  %v5845_v24 = vld [vmem:[#allocation2 + $0x50] sm:$0xff]  }
 0x440   :  { %5395 = vst [vmem:[#allocation2 + $0x8] sm:$0xff] %v5067_v3   ;;  %v2227_v27 = vmul.f32 %v6403_v49, %v2221_v22  ;;  %5575 = vmatpush3.bf16.msra.mxu0 %v5844_v20  ;;  %v2476_v31 = vmul.f32 %v6412_v63, %v2471_v23  ;;  %v6571_v23 = vld [vmem:[%s6807_s1 + $0xc] ss:$0 sm:$0xff] }
 0x441   :  { %5576 = vmatprep.subr.bf16.mxu0 %v5845_v24 }
 0x442   :  { %v5062_v28 = vpack.c.bf16 %v2227_v27, %v2226_v26 }
 0x443   :  { %v2473_v29 = vpop.permute.xlu1 %2472  ;;  %v5846_v30 = vld [vmem:[#allocation2 + $0x10] sm:$0xff]   ;;  %v2467_v35 = vpop.permute.xlu0 %2466 }
 0x444   :  { %5063 = vst [vmem:[#allocation2] sm:$0xff] %v5062_v28   ;;  %v2477_v32 = vmul.f32 %v6412_v63, %v2473_v29  ;;  %5577 = vmatpush3.bf16.msra.mxu0 %v5846_v30  ;;  %v2474_v39 = vmul.f32 %v6412_v63, %v2467_v35 }
 0x445   :  { %5578 = vmatprep.subr.bf16.mxu0 %v5847_v34  ;;  %v5885_v34 = vld [vmem:[%s6809_s4 + $0x68] ss:$12 sps:$4 sm:$0xff]  }
 0x446   :  { %v5147_v33 = vpack.c.bf16 %v2477_v32, %v2476_v31  ;;  %v5879_v32 = vld [vmem:[%s6809_s4 + $0x64] ss:$12 sps:$4 sm:$0xff]  }
 0x447   :  { %v2469_v36 = vpop.permute.xlu1 %2468  ;;  %v5848_v38 = vld [vmem:[#allocation2 + $0x8] sm:$0xff]  }
 0x448   :  { %5411 = vst [vmem:[#allocation2 + $0x88] sm:$0xff] %v5147_v33   ;;  %v2475_v40 = vmul.f32 %v6412_v63, %v2469_v36  ;;  %5579 = vmatpush3.bf16.msra.mxu0 %v5848_v38 }
 0x449   :  { %5580 = vmatprep.subr.bf16.mxu0 %v5849_v41 }
 0x44a   :  { %v5142_v42 = vpack.c.bf16 %v2475_v40, %v2474_v39 }
 0x44b   :  { %v5850_v43 = vld [vmem:[#allocation2] sm:$0xff]  }
 0x44c   :  { %5410 = vst [vmem:[#allocation2 + $0x80] sm:$0xff] %v5142_v42   ;;  %5581 = vmatpush3.bf16.msra.mxu0 %v5850_v43 }
 0x44f   :  { %v5854_v47 = vld [vmem:[#allocation2 + $0x88] sm:$0xff]   ;;  %2725 = vmatmul.mubr.bf16.vlgmr.msra.gmra.mxu0 %v5851_v45 }
 0x450   :  { %5681 = vmatprep.subr.bf16.mxu1 %v5854_v47  ;;  %2732 = vmatprep.mubr.bf16.mxu0 %v5856_v46  ;;  %v6621_v45 = vld [vmem:[%s6807_s1 + $0xb] ss:$0 sm:$0xff] }
 0x451   :  { %5682 = vmatpush3.bf16.msra.mxu1 %v5854_v47 }
 0x453   :  { %v5855_v48 = vld [vmem:[#allocation2 + $0x80] sm:$0xff]  }
 0x454   :  { %5683 = vmatprep.subr.bf16.mxu1 %v5855_v48 }
 0x455   :  { %5684 = vmatpush3.bf16.msra.mxu1 %v5855_v48 }
 0x457   :  { %2733 = vmatmul.mubr.bf16.gmra.mxu0 %v5858_v50 }
 0x458   :  { %5686 = vmatmul.mubr.msk.bf16.vlgmr.msra.gmra.mxu1 %vm1441_vm0, %v5860_v52  ;;  %5693 = vmatprep.mubr.msk.bf16.mxu0 %vm1441_vm0, %v5885_v34 }
 0x459   :  { %3300 = vmatprep.mubr.bf16.mxu1 %v5879_v32 }
 0x50f   :  { %v5582_v53 = vpop.f32.mrf.mxu0 }
 0x511   :  { %v5583_v55 = vpop.f32.mrf.mxu0 }
 0x512   :  { %v5584_v57 = vadd.f32 %v5583_v55, %v5582_v53 }
 0x513   :  { %v5585_v56 = vpop.f32.mrf.mxu0 }
 0x514   :  { %v2727_v5 = vadd.f32 %v5584_v57, %v4296_v59 }
 0x515   :  { %v5586_v58 = vpop.f32.mrf.mxu0 }
 0x516   :  { %v5587_v25 = vadd.f32 %v5586_v58, %v5585_v56 }
 0x517   :  { %v5588_v60 = vpop.f32.mrf.mxu0 }
 0x518   :  { %v5687_v61 = vpop.f32.mrf.mxu1  ;;  %v2730_v15 = vadd.f32 %v5587_v25, %v4297_v9 }
 0x519   :  { %v5589_v4 = vpop.f32.mrf.mxu0 }
 0x51a   :  { %v5590_v6 = vadd.f32 %v5589_v4, %v5588_v60  ;;  %v2775_v8 = vpop.f32.mrf.mxu1 }
 0x51b   :  { %v2776_v10 = vadd.f32 %v2775_v8, %v2727_v5  ;;  %v5591_v11 = vpop.f32.mrf.mxu0 }
 0x51c   :  { %v2735_v12 = vadd.f32 %v5590_v6, %v4298_v62  ;;  %v5688_v13 = vpop.f32.mrf.mxu1 }
 0x51d   :  { %v2790_v0 = vmax.f32 %v2776_v10, 0.0  ;;  %v5592_v14 = vpop.f32.mrf.mxu0 }
 0x51e   :  { %v2784_v16 = vadd.f32 %v5687_v61, %v2735_v12  ;;  %v5593_v17 = vadd.f32 %v5592_v14, %v5591_v11  ;;  %v2778_v18 = vpop.f32.mrf.mxu1 }
 0x51f   :  { %v2779_v54 = vadd.f32 %v2778_v18, %v2730_v15  ;;  %3010 = vrot.lane.b32.xlu0 %v2790_v0, %s5951_s20  ;;  %v2922_v24 = vmul.f32 %v6571_v23, %v2790_v0 }
 0x520   :  { %v2738_v2 = vadd.f32 %v5593_v17, %v4299_v1  ;;  %v2792_v20 = vmax.f32 %v2784_v16, 0.0 }
 0x521   :  { %v2791_v3 = vmax.f32 %v2779_v54, 0.0 }
 0x522   :  { %v2787_v22 = vadd.f32 %v5688_v13, %v2738_v2  ;;  %v2924_v29 = vmul.f32 %v6571_v23, %v2792_v20 }
 0x523   :  { %v2923_v26 = vmul.f32 %v6571_v23, %v2791_v3  ;;  %3012 = vrot.lane.b32.xlu1 %v2791_v3, %s5951_s20  ;;  %2890 = vrot.lane.b32.xlu0 %v2790_v0, %s5941_s21 }
 0x524   :  { %v2793_v27 = vmax.f32 %v2787_v22, 0.0 }
 0x525   :  { %v5192_v28 = vpack.c.bf16 %v2923_v26, %v2922_v24 }
 0x526   :  { %v2925_v30 = vmul.f32 %v6571_v23, %v2793_v27 }
 0x527   :  { %5419 = vst [vmem:[#allocation2 + $0x40] sm:$0xff] %v5192_v28   ;;  %2892 = vrot.lane.b32.xlu1 %v2791_v3, %s5941_s21  ;;  %2978 = vrot.lane.b32.xlu0 %v2790_v0, %s5954_s16 }
 0x528   :  { %v5197_v31 = vpack.c.bf16 %v2925_v30, %v2924_v29 }
 0x52a   :  { %5420 = vst [vmem:[#allocation2 + $0x48] sm:$0xff] %v5197_v31  }
 0x52b   :  { %2980 = vrot.lane.b32.xlu1 %v2791_v3, %s5954_s16  ;;  %2858 = vrot.lane.b32.xlu0 %v2790_v0, %s5952_s28 }
 0x52f   :  { %2860 = vrot.lane.b32.xlu1 %v2791_v3, %s5952_s28  ;;  %2946 = vrot.lane.b32.xlu0 %v2790_v0, %s5948_s13 }
 0x533   :  { %2948 = vrot.lane.b32.xlu1 %v2791_v3, %s5948_s13  ;;  %3014 = vrot.lane.b32.xlu0 %v2792_v20, %s5951_s20 }
 0x537   :  { %3016 = vrot.lane.b32.xlu1 %v2793_v27, %s5951_s20  ;;  %2894 = vrot.lane.b32.xlu0 %v2792_v20, %s5941_s21 }
 0x53b   :  { %2896 = vrot.lane.b32.xlu1 %v2793_v27, %s5941_s21  ;;  %2982 = vrot.lane.b32.xlu0 %v2792_v20, %s5954_s16 }
 0x53f   :  { %2984 = vrot.lane.b32.xlu1 %v2793_v27, %s5954_s16  ;;  %2862 = vrot.lane.b32.xlu0 %v2792_v20, %s5952_s28 }
 0x543   :  { %2864 = vrot.lane.b32.xlu1 %v2793_v27, %s5952_s28  ;;  %2950 = vrot.lane.b32.xlu0 %v2792_v20, %s5948_s13 }
 0x547   :  { %2952 = vrot.lane.b32.xlu1 %v2793_v27, %s5948_s13  ;;  %2830 = vrot.lane.b32.xlu0 %v2792_v20, %s5933_s30 }
 0x54b   :  { %2832 = vrot.lane.b32.xlu1 %v2793_v27, %s5933_s30  ;;  %2826 = vrot.lane.b32.xlu0 %v2790_v0, %s5933_s30 }
 0x54f   :  { %2828 = vrot.lane.b32.xlu1 %v2791_v3, %s5933_s30  ;;  %2798 = vrot.lane.b32.xlu0 %v2792_v20, %s5934_s15 }
 0x553   :  { %2800 = vrot.lane.b32.xlu1 %v2793_v27, %s5934_s15  ;;  %2794 = vrot.lane.b32.xlu0 %v2790_v0, %s5934_s15 }
 0x557   :  { %2796 = vrot.lane.b32.xlu1 %v2791_v3, %s5934_s15  ;;  %3046 = vrot.lane.b32.xlu0 %v2792_v20, %s5947_s29 }
 0x55b   :  { %3048 = vrot.lane.b32.xlu1 %v2793_v27, %s5947_s29  ;;  %3042 = vrot.lane.b32.xlu0 %v2790_v0, %s5947_s29 }
 0x55f   :  { %3044 = vrot.lane.b32.xlu1 %v2791_v3, %s5947_s29 }
 0x591   :  { %v3011_v35 = vpop.permute.xlu0 %3010 }
 0x592   :  { %v3018_v38 = vmul.f32 %v6493_v7, %v3011_v35 }
 0x595   :  { %v3013_v33 = vpop.permute.xlu1 %3012  ;;  %v2891_v36 = vpop.permute.xlu0 %2890 }
 0x596   :  { %v3019_v39 = vmul.f32 %v6493_v7, %v3013_v33  ;;  %v2898_v43 = vmul.f32 %v6371_v44, %v2891_v36 }
 0x598   :  { %v5222_v40 = vpack.c.bf16 %v3019_v39, %v3018_v38  ;;  %v6644_v39 = vld [vmem:[%s6807_s1 + $0x7] ss:$0 sm:$0xff] }
 0x599   :  { %v2893_v41 = vpop.permute.xlu1 %2892  ;;  %v2979_v42 = vpop.permute.xlu0 %2978 }
 0x59a   :  { %5425 = vst [vmem:[#allocation2 + $0x70] sm:$0xff] %v5222_v40   ;;  %v2899_v46 = vmul.f32 %v6621_v45, %v2893_v41  ;;  %v2986_v52 = vmul.f32 %v6524_v51, %v2979_v42 }
 0x59c   :  { %v5182_v47 = vpack.c.bf16 %v2899_v46, %v2898_v43 }
 0x59d   :  { %v2981_v48 = vpop.permute.xlu1 %2980  ;;  %v2859_v50 = vpop.permute.xlu0 %2858 }
 0x59e   :  { %5417 = vst [vmem:[#allocation2 + $0x30] sm:$0xff] %v5182_v47   ;;  %v2987_v53 = vmul.f32 %v6524_v51, %v2981_v48  ;;  %v2866_v44 = vmul.f32 %v6504_v19, %v2859_v50 }
 0x5a0   :  { %v5212_v55 = vpack.c.bf16 %v2987_v53, %v2986_v52 }
 0x5a1   :  { %v2861_v56 = vpop.permute.xlu1 %2860  ;;  %v2947_v57 = vpop.permute.xlu0 %2946  ;;  %v5863_v31 = vld [vmem:[#allocation2 + $0x70] sm:$0xff]  }
 0x5a2   :  { %5423 = vst [vmem:[#allocation2 + $0x60] sm:$0xff] %v5212_v55   ;;  %v2867_v58 = vmul.f32 %v6504_v19, %v2861_v56  ;;  %v2954_v25 = vmul.f32 %v6511_v37, %v2947_v57 }
 0x5a4   :  { %v5172_v59 = vpack.c.bf16 %v2867_v58, %v2866_v44  ;;  %v6653_v44 = vld [vmem:[%s6807_s1 + $0x6] ss:$0 sm:$0xff] }
 0x5a5   :  { %v2949_v60 = vpop.permute.xlu1 %2948  ;;  %v3015_v61 = vpop.permute.xlu0 %3014  ;;  %v5864_v34 = vld [vmem:[#allocation2 + $0x30] sm:$0xff]  }
 0x5a6   :  { %5415 = vst [vmem:[#allocation2 + $0x20] sm:$0xff] %v5172_v59   ;;  %v2955_v62 = vmul.f32 %v6511_v37, %v2949_v60  ;;  %v3020_v8 = vmul.f32 %v6493_v7, %v3015_v61 }
 0x5a8   :  { %v5202_v4 = vpack.c.bf16 %v2955_v62, %v2954_v25 }
 0x5a9   :  { %v3017_v5 = vpop.permute.xlu1 %3016  ;;  %v2895_v6 = vpop.permute.xlu0 %2894  ;;  %v5867_v50 = vld [vmem:[#allocation2 + $0x60] sm:$0xff]  }
 0x5aa   :  { %5421 = vst [vmem:[#allocation2 + $0x50] sm:$0xff] %v5202_v4   ;;  %v3021_v9 = vmul.f32 %v6493_v7, %v3017_v5  ;;  %v2900_v13 = vmul.f32 %v6621_v45, %v2895_v6 }
 0x5ac   :  { %v5227_v10 = vpack.c.bf16 %v3021_v9, %v3020_v8 }
 0x5ad   :  { %v2897_v11 = vpop.permute.xlu1 %2896  ;;  %v2983_v12 = vpop.permute.xlu0 %2982  ;;  %v5868_v52 = vld [vmem:[#allocation2 + $0x20] sm:$0xff]  }
 0x5ae   :  { %5426 = vst [vmem:[#allocation2 + $0x78] sm:$0xff] %v5227_v10   ;;  %v2901_v0 = vmul.f32 %v6621_v45, %v2897_v11  ;;  %v2988_v16 = vmul.f32 %v6524_v51, %v2983_v12  ;;  %v6662_v10 = vld [vmem:[%s6807_s1 + $0x12] ss:$0 sm:$0xff]  ;;  %v5873_v12 = vld [vmem:[#allocation2 + $0x48] sm:$0xff]  }
 0x5b0   :  { %v5187_v1 = vpack.c.bf16 %v2901_v0, %v2900_v13 }
 0x5b1   :  { %v2985_v14 = vpop.permute.xlu1 %2984  ;;  %v2863_v15 = vpop.permute.xlu0 %2862  ;;  %v5871_v5 = vld [vmem:[#allocation2 + $0x50] sm:$0xff]  }
 0x5b2   :  { %5418 = vst [vmem:[#allocation2 + $0x38] sm:$0xff] %v5187_v1   ;;  %v2989_v17 = vmul.f32 %v6524_v51, %v2985_v14  ;;  %v2868_v20 = vmul.f32 %v6504_v19, %v2863_v15 }
 0x5b4   :  { %v5217_v18 = vpack.c.bf16 %v2989_v17, %v2988_v16 }
 0x5b5   :  { %v2865_v54 = vpop.permute.xlu1 %2864  ;;  %v2951_v2 = vpop.permute.xlu0 %2950  ;;  %v5861_v3 = vld [vmem:[#allocation2 + $0x78] sm:$0xff]  }
 0x5b6   :  { %5424 = vst [vmem:[#allocation2 + $0x68] sm:$0xff] %v5217_v18   ;;  %v2869_v22 = vmul.f32 %v6504_v19, %v2865_v54  ;;  %5598 = vmatprep.subr.bf16.mxu1 %v5861_v3  ;;  %v2956_v29 = vmul.f32 %v6511_v37, %v2951_v2  ;;  %v5877_v54 = vld [vmem:[%s6809_s4 + $0x60] ss:$12 sps:$4 sm:$0xff]   ;;  %v5882_v2 = vld [vmem:[%s6809_s4 + $0x7c] ss:$12 sps:$4 sm:$0xff]  }
 0x5b8   :  { %v5177_v24 = vpack.c.bf16 %v2869_v22, %v2868_v20  ;;  %v5884_v22 = vld [vmem:[%s6809_s4 + $0x78] ss:$12 sps:$4 sm:$0xff]  }
 0x5b9   :  { %v2953_v26 = vpop.permute.xlu1 %2952  ;;  %v2831_v27 = vpop.permute.xlu0 %2830  ;;  %v5862_v28 = vld [vmem:[#allocation2 + $0x38] sm:$0xff]  }
 0x5ba   :  { %5416 = vst [vmem:[#allocation2 + $0x28] sm:$0xff] %v5177_v24   ;;  %v2957_v30 = vmul.f32 %v6511_v37, %v2953_v26  ;;  %5599 = vmatpush3.bf16.msra.mxu1 %v5862_v28  ;;  %v2836_v38 = vmul.f32 %v6394_v21, %v2831_v27  ;;  %v5886_v24 = vld [vmem:[%s6809_s4 + $0x80] ss:$12 sps:$4 sm:$0xff]  }
 0x5bb   :  { %5600 = vmatprep.subr.bf16.mxu1 %v5863_v31  ;;  %v4370_v31 = vld [vmem:[%s6810_s5 + $0x40] sm:$0xff] }
 0x5bc   :  { %v5207_v32 = vpack.c.bf16 %v2957_v30, %v2956_v29 }
 0x5bd   :  { %v2833_v35 = vpop.permute.xlu1 %2832  ;;  %v2827_v33 = vpop.permute.xlu0 %2826  ;;  %v5865_v36 = vld [vmem:[#allocation2 + $0x68] sm:$0xff]  }
 0x5be   :  { %5422 = vst [vmem:[#allocation2 + $0x58] sm:$0xff] %v5207_v32   ;;  %v2837_v40 = vmul.f32 %v6644_v39, %v2833_v35  ;;  %5601 = vmatpush3.bf16.msra.mxu1 %v5864_v34  ;;  %v2834_v47 = vmul.f32 %v6644_v39, %v2827_v33  ;;  %v4372_v33 = vld [vmem:[%s6810_s5 + $0x50] sm:$0xff] }
 0x5bf   :  { %5602 = vmatprep.subr.bf16.mxu1 %v5865_v36 }
 0x5c0   :  { %v5167_v41 = vpack.c.bf16 %v2837_v40, %v2836_v38 }
 0x5c1   :  { %v2829_v42 = vpop.permute.xlu1 %2828  ;;  %v2799_v43 = vpop.permute.xlu0 %2798  ;;  %v5866_v46 = vld [vmem:[#allocation2 + $0x28] sm:$0xff]  }
 0x5c2   :  { %5414 = vst [vmem:[#allocation2 + $0x18] sm:$0xff] %v5167_v41   ;;  %v2835_v48 = vmul.f32 %v6644_v39, %v2829_v42  ;;  %5603 = vmatpush3.bf16.msra.mxu1 %v5866_v46  ;;  %v2804_v57 = vmul.f32 %v6403_v49, %v2799_v43  ;;  %v4371_v42 = vld [vmem:[%s6810_s5 + $0x48] sm:$0xff] }
 0x5c3   :  { %5604 = vmatprep.subr.bf16.mxu1 %v5867_v50 }
 0x5c4   :  { %v5162_v21 = vpack.c.bf16 %v2835_v48, %v2834_v47 }
 0x5c5   :  { %v2801_v53 = vpop.permute.xlu1 %2800  ;;  %v2795_v55 = vpop.permute.xlu0 %2794  ;;  %v5869_v56 = vld [vmem:[#allocation2 + $0x58] sm:$0xff]  }
 0x5c6   :  { %5413 = vst [vmem:[#allocation2 + $0x10] sm:$0xff] %v5162_v21   ;;  %v2805_v58 = vmul.f32 %v6653_v44, %v2801_v53  ;;  %5605 = vmatpush3.bf16.msra.mxu1 %v5868_v52  ;;  %v2802_v62 = vmul.f32 %v6653_v44, %v2795_v55  ;;  %v4373_v21 = vld [vmem:[%s6810_s5 + $0x58] sm:$0xff] }
 0x5c7   :  { %5606 = vmatprep.subr.bf16.mxu1 %v5869_v56 }
 0x5c8   :  { %v5157_v59 = vpack.c.bf16 %v2805_v58, %v2804_v57 }
 0x5c9   :  { %v2797_v60 = vpop.permute.xlu1 %2796  ;;  %v3047_v61 = vpop.permute.xlu0 %3046  ;;  %v5870_v25 = vld [vmem:[#allocation2 + $0x18] sm:$0xff]  }
 0x5ca   :  { %5412 = vst [vmem:[#allocation2 + $0x8] sm:$0xff] %v5157_v59   ;;  %v2803_v4 = vmul.f32 %v6653_v44, %v2797_v60  ;;  %5607 = vmatpush3.bf16.msra.mxu1 %v5870_v25  ;;  %v3052_v9 = vmul.f32 %v6412_v63, %v3047_v61  ;;  %v5875_v63 = vld [vmem:[#allocation2 + $0x40] sm:$0xff]  }
 0x5cb   :  { %5608 = vmatprep.subr.bf16.mxu1 %v5871_v5 }
 0x5cc   :  { %v5152_v49 = vpack.c.bf16 %v2803_v4, %v2802_v62 }
 0x5cd   :  { %v3049_v6 = vpop.permute.xlu1 %3048  ;;  %v5872_v8 = vld [vmem:[#allocation2 + $0x10] sm:$0xff]   ;;  %v3043_v13 = vpop.permute.xlu0 %3042 }
 0x5ce   :  { %5153 = vst [vmem:[#allocation2] sm:$0xff] %v5152_v49   ;;  %v3053_v11 = vmul.f32 %v6662_v10, %v3049_v6  ;;  %5609 = vmatpush3.bf16.msra.mxu1 %v5872_v8  ;;  %v3050_v15 = vmul.f32 %v6662_v10, %v3043_v13 }
 0x5cf   :  { %5610 = vmatprep.subr.bf16.mxu1 %v5873_v12 }
 0x5d0   :  { %v5237_v0 = vpack.c.bf16 %v3053_v11, %v3052_v9  ;;  %v5911_v11 = vld [vmem:[%s6809_s4 + $0x98] ss:$12 sps:$4 sm:$0xff]  }
 0x5d1   :  { %v3045_v1 = vpop.permute.xlu1 %3044  ;;  %v5874_v14 = vld [vmem:[#allocation2 + $0x8] sm:$0xff]  }
 0x5d2   :  { %5428 = vst [vmem:[#allocation2 + $0x88] sm:$0xff] %v5237_v0   ;;  %v3051_v16 = vmul.f32 %v6662_v10, %v3045_v1  ;;  %5611 = vmatpush3.bf16.msra.mxu1 %v5874_v14 }
 0x5d3   :  { %5612 = vmatprep.subr.bf16.mxu1 %v5875_v63 }
 0x5d4   :  { %v5232_v17 = vpack.c.bf16 %v3051_v16, %v3050_v15 }
 0x5d5   :  { %v5876_v18 = vld [vmem:[#allocation2] sm:$0xff]  }
 0x5d6   :  { %5427 = vst [vmem:[#allocation2 + $0x80] sm:$0xff] %v5232_v17   ;;  %5613 = vmatpush3.bf16.msra.mxu1 %v5876_v18 }
 0x5d9   :  { %v5880_v3 = vld [vmem:[#allocation2 + $0x88] sm:$0xff]   ;;  %3301 = vmatmul.mubr.bf16.vlgmr.msra.gmra.mxu1 %v5877_v54 }
 0x5da   :  { %5689 = vmatprep.subr.bf16.mxu0 %v5880_v3  ;;  %3308 = vmatprep.mubr.bf16.mxu1 %v5882_v2 }
 0x5db   :  { %5690 = vmatpush3.bf16.msra.mxu0 %v5880_v3 }
 0x5dd   :  { %v5881_v20 = vld [vmem:[#allocation2 + $0x80] sm:$0xff]  }
 0x5de   :  { %5691 = vmatprep.subr.bf16.mxu0 %v5881_v20 }
 0x5df   :  { %5692 = vmatpush3.bf16.msra.mxu0 %v5881_v20 }
 0x5e1   :  { %3309 = vmatmul.mubr.bf16.gmra.mxu1 %v5884_v22 }
 0x5e2   :  { %5694 = vmatmul.mubr.msk.bf16.vlgmr.msra.gmra.mxu0 %vm1441_vm0, %v5886_v24  ;;  %5701 = vmatprep.mubr.msk.bf16.mxu1 %vm1441_vm0, %v5911_v11 }
 0x699   :  { %v5614_v26 = vpop.f32.mrf.mxu1 }
 0x69b   :  { %v5615_v27 = vpop.f32.mrf.mxu1 }
 0x69c   :  { %v5616_v29 = vadd.f32 %v5615_v27, %v5614_v26 }
 0x69d   :  { %v5617_v28 = vpop.f32.mrf.mxu1 }
 0x69e   :  { %v3303_v38 = vadd.f32 %v5616_v29, %v4370_v31 }
 0x69f   :  { %v5618_v30 = vpop.f32.mrf.mxu1 }
 0x6a0   :  { %v5619_v35 = vadd.f32 %v5618_v30, %v5617_v28 }
 0x6a1   :  { %v5620_v32 = vpop.f32.mrf.mxu1 }
 0x6a2   :  { %v5695_v34 = vpop.f32.mrf.mxu0  ;;  %v3306_v53 = vadd.f32 %v5619_v35, %v4371_v42 }
 0x6a3   :  { %v5621_v36 = vpop.f32.mrf.mxu1 }
 0x6a4   :  { %v5622_v40 = vadd.f32 %v5621_v36, %v5620_v32  ;;  %v3351_v41 = vpop.f32.mrf.mxu0 }
 0x6a5   :  { %v3352_v43 = vadd.f32 %v3351_v41, %v3303_v38  ;;  %v5623_v46 = vpop.f32.mrf.mxu1  ;;  %v5929_v38 = vld [vmem:[%s6807_s1 + $0x11] ss:$0 sm:$0xff] }
 0x6a6   :  { %v3311_v47 = vadd.f32 %v5622_v40, %v4372_v33  ;;  %v5696_v48 = vpop.f32.mrf.mxu0 }
 0x6a7   :  { %v3366_v50 = vmax.f32 %v3352_v43, 0.0  ;;  %v5624_v52 = vpop.f32.mrf.mxu1 }
 0x6a8   :  { %v3360_v55 = vadd.f32 %v5695_v34, %v3311_v47  ;;  %v5625_v56 = vadd.f32 %v5624_v52, %v5623_v46  ;;  %v3354_v57 = vpop.f32.mrf.mxu0 }
 0x6a9   :  { %v3355_v58 = vadd.f32 %v3354_v57, %v3306_v53  ;;  %3586 = vrot.lane.b32.xlu0 %v3366_v50, %s5951_s20  ;;  %v3498_v62 = vmul.f32 %v6571_v23, %v3366_v50 }
 0x6aa   :  { %v3314_v59 = vadd.f32 %v5625_v56, %v4373_v21  ;;  %v3368_v61 = vmax.f32 %v3360_v55, 0.0 }
 0x6ab   :  { %v3367_v60 = vmax.f32 %v3355_v58, 0.0  ;;  %v5930_v58 = vld [vmem:[%s6807_s1 + $0x8] ss:$0 sm:$0xff] }
 0x6ac   :  { %v3363_v25 = vadd.f32 %v5696_v48, %v3314_v59  ;;  %v3500_v6 = vmul.f32 %v6571_v23, %v3368_v61 }
 0x6ad   :  { %v3499_v4 = vmul.f32 %v6571_v23, %v3367_v60  ;;  %3588 = vrot.lane.b32.xlu1 %v3367_v60, %s5951_s20  ;;  %3466 = vrot.lane.b32.xlu0 %v3366_v50, %s5941_s21 }
 0x6ae   :  { %v3369_v5 = vmax.f32 %v3363_v25, 0.0 }
 0x6af   :  { %v5282_v49 = vpack.c.bf16 %v3499_v4, %v3498_v62 }
 0x6b0   :  { %v3501_v8 = vmul.f32 %v6571_v23, %v3369_v5  ;;  %v5905_v23 = vld [vmem:[%s6809_s4 + $0x94] ss:$12 sps:$4 sm:$0xff]  }
 0x6b1   :  { %5436 = vst [vmem:[#allocation2 + $0x40] sm:$0xff] %v5282_v49   ;;  %3468 = vrot.lane.b32.xlu1 %v3367_v60, %s5941_s21  ;;  %3554 = vrot.lane.b32.xlu0 %v3366_v50, %s5954_s16 }
 0x6b2   :  { %v5287_v9 = vpack.c.bf16 %v3501_v8, %v3500_v6  ;;  %3876 = vmatprep.mubr.bf16.mxu0 %v5905_v23 }
 0x6b4   :  { %5437 = vst [vmem:[#allocation2 + $0x48] sm:$0xff] %v5287_v9  }
 0x6b5   :  { %3556 = vrot.lane.b32.xlu1 %v3367_v60, %s5954_s16  ;;  %3434 = vrot.lane.b32.xlu0 %v3366_v50, %s5952_s28 }
 0x6b9   :  { %3436 = vrot.lane.b32.xlu1 %v3367_v60, %s5952_s28  ;;  %3522 = vrot.lane.b32.xlu0 %v3366_v50, %s5948_s13 }
 0x6bd   :  { %3524 = vrot.lane.b32.xlu1 %v3367_v60, %s5948_s13  ;;  %3590 = vrot.lane.b32.xlu0 %v3368_v61, %s5951_s20 }
 0x6c1   :  { %3592 = vrot.lane.b32.xlu1 %v3369_v5, %s5951_s20  ;;  %3470 = vrot.lane.b32.xlu0 %v3368_v61, %s5941_s21 }
 0x6c5   :  { %3472 = vrot.lane.b32.xlu1 %v3369_v5, %s5941_s21  ;;  %3558 = vrot.lane.b32.xlu0 %v3368_v61, %s5954_s16 }
 0x6c9   :  { %3560 = vrot.lane.b32.xlu1 %v3369_v5, %s5954_s16  ;;  %3438 = vrot.lane.b32.xlu0 %v3368_v61, %s5952_s28 }
 0x6cd   :  { %3440 = vrot.lane.b32.xlu1 %v3369_v5, %s5952_s28  ;;  %3526 = vrot.lane.b32.xlu0 %v3368_v61, %s5948_s13 }
 0x6d1   :  { %3528 = vrot.lane.b32.xlu1 %v3369_v5, %s5948_s13  ;;  %3406 = vrot.lane.b32.xlu0 %v3368_v61, %s5933_s30 }
 0x6d5   :  { %3408 = vrot.lane.b32.xlu1 %v3369_v5, %s5933_s30  ;;  %3402 = vrot.lane.b32.xlu0 %v3366_v50, %s5933_s30 }
 0x6d9   :  { %3404 = vrot.lane.b32.xlu1 %v3367_v60, %s5933_s30  ;;  %3374 = vrot.lane.b32.xlu0 %v3368_v61, %s5934_s15 }
 0x6dd   :  { %3376 = vrot.lane.b32.xlu1 %v3369_v5, %s5934_s15  ;;  %3370 = vrot.lane.b32.xlu0 %v3366_v50, %s5934_s15 }
 0x6e1   :  { %3372 = vrot.lane.b32.xlu1 %v3367_v60, %s5934_s15  ;;  %3622 = vrot.lane.b32.xlu0 %v3368_v61, %s5947_s29 }
 0x6e5   :  { %3624 = vrot.lane.b32.xlu1 %v3369_v5, %s5947_s29  ;;  %3618 = vrot.lane.b32.xlu0 %v3366_v50, %s5947_s29 }
 0x6e9   :  { %3620 = vrot.lane.b32.xlu1 %v3367_v60, %s5947_s29 }
 0x71b   :  { %v3587_v12 = vpop.permute.xlu0 %3586 }
 0x71c   :  { %v3594_v1 = vmul.f32 %v6493_v7, %v3587_v12 }
 0x71f   :  { %v3589_v13 = vpop.permute.xlu1 %3588  ;;  %v3467_v0 = vpop.permute.xlu0 %3466 }
 0x720   :  { %v3595_v14 = vmul.f32 %v6493_v7, %v3589_v13  ;;  %v3474_v17 = vmul.f32 %v6621_v45, %v3467_v0 }
 0x722   :  { %v5312_v15 = vpack.c.bf16 %v3595_v14, %v3594_v1 }
 0x723   :  { %v3469_v16 = vpop.permute.xlu1 %3468  ;;  %v3555_v63 = vpop.permute.xlu0 %3554 }
 0x724   :  { %5442 = vst [vmem:[#allocation2 + $0x70] sm:$0xff] %v5312_v15   ;;  %v3475_v18 = vmul.f32 %v6621_v45, %v3469_v16  ;;  %v3562_v20 = vmul.f32 %v6524_v51, %v3555_v63 }
 0x726   :  { %v5272_v54 = vpack.c.bf16 %v3475_v18, %v3474_v17 }
 0x727   :  { %v3557_v2 = vpop.permute.xlu1 %3556  ;;  %v3435_v3 = vpop.permute.xlu0 %3434 }
 0x728   :  { %5434 = vst [vmem:[#allocation2 + $0x30] sm:$0xff] %v5272_v54   ;;  %v3563_v22 = vmul.f32 %v6524_v51, %v3557_v2  ;;  %v3442_v7 = vmul.f32 %v6504_v19, %v3435_v3 }
 0x72a   :  { %v5302_v24 = vpack.c.bf16 %v3563_v22, %v3562_v20 }
 0x72b   :  { %v3437_v26 = vpop.permute.xlu1 %3436  ;;  %v3523_v27 = vpop.permute.xlu0 %3522  ;;  %v5889_v49 = vld [vmem:[#allocation2 + $0x70] sm:$0xff]  }
 0x72c   :  { %5440 = vst [vmem:[#allocation2 + $0x60] sm:$0xff] %v5302_v24   ;;  %v3443_v28 = vmul.f32 %v6504_v19, %v3437_v26  ;;  %v3530_v32 = vmul.f32 %v6511_v37, %v3523_v27 }
 0x72e   :  { %v5262_v29 = vpack.c.bf16 %v3443_v28, %v3442_v7 }
 0x72f   :  { %v3525_v30 = vpop.permute.xlu1 %3524  ;;  %v3591_v31 = vpop.permute.xlu0 %3590  ;;  %v5890_v8 = vld [vmem:[#allocation2 + $0x30] sm:$0xff]  }
 0x730   :  { %5432 = vst [vmem:[#allocation2 + $0x20] sm:$0xff] %v5262_v29   ;;  %v3531_v34 = vmul.f32 %v6511_v37, %v3525_v30  ;;  %v3596_v40 = vmul.f32 %v5929_v38, %v3591_v31 }
 0x732   :  { %v5292_v35 = vpack.c.bf16 %v3531_v34, %v3530_v32 }
 0x733   :  { %v3593_v33 = vpop.permute.xlu1 %3592  ;;  %v3471_v36 = vpop.permute.xlu0 %3470  ;;  %v5893_v17 = vld [vmem:[#allocation2 + $0x60] sm:$0xff]  }
 0x734   :  { %5438 = vst [vmem:[#allocation2 + $0x50] sm:$0xff] %v5292_v35   ;;  %v3597_v41 = vmul.f32 %v5929_v38, %v3593_v33  ;;  %v3476_v46 = vmul.f32 %v6621_v45, %v3471_v36  ;;  %v5899_v36 = vld [vmem:[#allocation2 + $0x48] sm:$0xff]  }
 0x736   :  { %v5317_v42 = vpack.c.bf16 %v3597_v41, %v3596_v40 }
 0x737   :  { %v3473_v19 = vpop.permute.xlu1 %3472  ;;  %v3559_v43 = vpop.permute.xlu0 %3558  ;;  %v5894_v54 = vld [vmem:[#allocation2 + $0x20] sm:$0xff]  }
 0x738   :  { %5443 = vst [vmem:[#allocation2 + $0x78] sm:$0xff] %v5317_v42   ;;  %v3477_v47 = vmul.f32 %v6621_v45, %v3473_v19  ;;  %v3564_v21 = vmul.f32 %v6524_v51, %v3559_v43  ;;  %v5901_v43 = vld [vmem:[#allocation2 + $0x40] sm:$0xff]  }
 0x73a   :  { %v5277_v48 = vpack.c.bf16 %v3477_v47, %v3476_v46 }
 0x73b   :  { %v3561_v37 = vpop.permute.xlu1 %3560  ;;  %v3439_v50 = vpop.permute.xlu0 %3438  ;;  %v5897_v30 = vld [vmem:[#allocation2 + $0x50] sm:$0xff]  }
 0x73c   :  { %5435 = vst [vmem:[#allocation2 + $0x38] sm:$0xff] %v5277_v48   ;;  %v3565_v52 = vmul.f32 %v6524_v51, %v3561_v37  ;;  %v3444_v59 = vmul.f32 %v5930_v58, %v3439_v50  ;;  %v5931_v51 = vld [vmem:[%s6807_s1 + $0xd] ss:$0 sm:$0xff]  ;;  %v5903_v48 = vld [vmem:[%s6809_s4 + $0x90] ss:$12 sps:$4 sm:$0xff]  }
 0x73d   :  { %v5908_v37 = vld [vmem:[%s6809_s4 + $0xac] ss:$12 sps:$4 sm:$0xff]  }
 0x73e   :  { %v5307_v53 = vpack.c.bf16 %v3565_v52, %v3564_v21  ;;  %v5910_v21 = vld [vmem:[%s6809_s4 + $0xa8] ss:$12 sps:$4 sm:$0xff]   ;;  %v5912_v52 = vld [vmem:[%s6809_s4 + $0xb0] ss:$12 sps:$4 sm:$0xff]  }
 0x73f   :  { %v3441_v55 = vpop.permute.xlu1 %3440  ;;  %v3527_v56 = vpop.permute.xlu0 %3526  ;;  %v5887_v57 = vld [vmem:[#allocation2 + $0x78] sm:$0xff]  }
 0x740   :  { %5441 = vst [vmem:[#allocation2 + $0x68] sm:$0xff] %v5307_v53   ;;  %v3445_v60 = vmul.f32 %v5930_v58, %v3441_v55  ;;  %5630 = vmatprep.subr.bf16.mxu0 %v5887_v57  ;;  %v3532_v4 = vmul.f32 %v5931_v51, %v3527_v56  ;;  %v5956_v53 = vmov 0.0  }
 0x742   :  { %v5267_v45 = vpack.c.bf16 %v3445_v60, %v3444_v59 }
 0x743   :  { %v3529_v61 = vpop.permute.xlu1 %3528  ;;  %v3407_v25 = vpop.permute.xlu0 %3406  ;;  %v5888_v62 = vld [vmem:[#allocation2 + $0x38] sm:$0xff]  }
 0x744   :  { %5433 = vst [vmem:[#allocation2 + $0x28] sm:$0xff] %v5267_v45   ;;  %v3533_v5 = vmul.f32 %v5931_v51, %v3529_v61  ;;  %5631 = vmatpush3.bf16.msra.mxu0 %v5888_v62  ;;  %v3412_v12 = vmul.f32 %v6644_v39, %v3407_v25  ;;  %v4446_v45 = vld [vmem:[%s6810_s5 + $0x70] sm:$0xff] }
 0x745   :  { %5632 = vmatprep.subr.bf16.mxu0 %v5889_v49 }
 0x746   :  { %v5297_v6 = vpack.c.bf16 %v3533_v5, %v3532_v4 }
 0x747   :  { %v3409_v9 = vpop.permute.xlu1 %3408  ;;  %v3403_v23 = vpop.permute.xlu0 %3402  ;;  %v5891_v11 = vld [vmem:[#allocation2 + $0x68] sm:$0xff]  }
 0x748   :  { %5439 = vst [vmem:[#allocation2 + $0x58] sm:$0xff] %v5297_v6   ;;  %v3413_v13 = vmul.f32 %v6644_v39, %v3409_v9  ;;  %5633 = vmatpush3.bf16.msra.mxu0 %v5890_v8  ;;  %v3410_v16 = vmul.f32 %v6644_v39, %v3403_v23  ;;  %v4447_v6 = vld [vmem:[%s6810_s5 + $0x78] sm:$0xff]  ;;  %v4445_v9 = vld [vmem:[%s6810_s5 + $0x68] sm:$0xff] }
 0x749   :  { %5634 = vmatprep.subr.bf16.mxu0 %v5891_v11 }
 0x74a   :  { %v5257_v0 = vpack.c.bf16 %v3413_v13, %v3412_v12  ;;  %v4444_v12 = vld [vmem:[%s6810_s5 + $0x60] sm:$0xff] }
 0x74b   :  { %v3405_v1 = vpop.permute.xlu1 %3404  ;;  %v3375_v14 = vpop.permute.xlu0 %3374  ;;  %v5892_v15 = vld [vmem:[#allocation2 + $0x28] sm:$0xff]  }
 0x74c   :  { %5431 = vst [vmem:[#allocation2 + $0x18] sm:$0xff] %v5257_v0   ;;  %v3411_v63 = vmul.f32 %v6644_v39, %v3405_v1  ;;  %5635 = vmatpush3.bf16.msra.mxu0 %v5892_v15  ;;  %v3380_v22 = vmul.f32 %v6653_v44, %v3375_v14 }
 0x74d   :  { %5636 = vmatprep.subr.bf16.mxu0 %v5893_v17 }
 0x74e   :  { %v5252_v18 = vpack.c.bf16 %v3411_v63, %v3410_v16 }
 0x74f   :  { %v3377_v2 = vpop.permute.xlu1 %3376  ;;  %v3371_v3 = vpop.permute.xlu0 %3370  ;;  %v5895_v20 = vld [vmem:[#allocation2 + $0x58] sm:$0xff]  }
 0x750   :  { %5430 = vst [vmem:[#allocation2 + $0x10] sm:$0xff] %v5252_v18   ;;  %v3381_v24 = vmul.f32 %v6653_v44, %v3377_v2  ;;  %5637 = vmatpush3.bf16.msra.mxu0 %v5894_v54  ;;  %v3378_v39 = vmul.f32 %v6653_v44, %v3371_v3 }
 0x751   :  { %5638 = vmatprep.subr.bf16.mxu0 %v5895_v20 }
 0x752   :  { %v5247_v26 = vpack.c.bf16 %v3381_v24, %v3380_v22  ;;  %v3946_v24 = vld [vmem:[%s6811_s6] sm:$0xf] }
 0x753   :  { %v3373_v27 = vpop.permute.xlu1 %3372  ;;  %v3623_v7 = vpop.permute.xlu0 %3622  ;;  %v5896_v28 = vld [vmem:[#allocation2 + $0x18] sm:$0xff]  }
 0x754   :  { %5429 = vst [vmem:[#allocation2 + $0x8] sm:$0xff] %v5247_v26   ;;  %v3379_v29 = vmul.f32 %v6653_v44, %v3373_v27  ;;  %5639 = vmatpush3.bf16.msra.mxu0 %v5896_v28  ;;  %v3628_v35 = vmul.f32 %v6662_v10, %v3623_v7  ;;  %v3949_v26 = vld [vmem:[%s6812_s7] sm:$0xff] }
 0x755   :  { %5640 = vmatprep.subr.bf16.mxu0 %v5897_v30 }
 0x756   :  { %v5242_v31 = vpack.c.bf16 %v3379_v29, %v3378_v39 }
 0x757   :  { %v3625_v32 = vpop.permute.xlu1 %3624  ;;  %v5898_v34 = vld [vmem:[#allocation2 + $0x10] sm:$0xff]   ;;  %v3619_v38 = vpop.permute.xlu0 %3618 }
 0x758   :  { %5243 = vst [vmem:[#allocation2] sm:$0xff] %v5242_v31   ;;  %v3629_v33 = vmul.f32 %v6662_v10, %v3625_v32  ;;  %5641 = vmatpush3.bf16.msra.mxu0 %v5898_v34  ;;  %v3626_v44 = vmul.f32 %v6662_v10, %v3619_v38 }
 0x759   :  { %5642 = vmatprep.subr.bf16.mxu0 %v5899_v36 }
 0x75a   :  { %v5327_v40 = vpack.c.bf16 %v3629_v33, %v3628_v35 }
 0x75b   :  { %v3621_v41 = vpop.permute.xlu1 %3620  ;;  %v5900_v42 = vld [vmem:[#allocation2 + $0x8] sm:$0xff]  }
 0x75c   :  { %5445 = vst [vmem:[#allocation2 + $0x88] sm:$0xff] %v5327_v40   ;;  %v3627_v19 = vmul.f32 %v6662_v10, %v3621_v41  ;;  %5643 = vmatpush3.bf16.msra.mxu0 %v5900_v42 }
 0x75d   :  { %5644 = vmatprep.subr.bf16.mxu0 %v5901_v43 }
 0x75e   :  { %v5322_v46 = vpack.c.bf16 %v3627_v19, %v3626_v44 }
 0x75f   :  { %v5902_v47 = vld [vmem:[#allocation2] sm:$0xff]  }
 0x760   :  { %5444 = vst [vmem:[#allocation2 + $0x80] sm:$0xff] %v5322_v46   ;;  %5645 = vmatpush3.bf16.msra.mxu0 %v5902_v47 }
 0x763   :  { %v5906_v50 = vld [vmem:[#allocation2 + $0x88] sm:$0xff]   ;;  %3877 = vmatmul.mubr.bf16.vlgmr.msra.gmra.mxu0 %v5903_v48 }
 0x764   :  { %5697 = vmatprep.subr.bf16.mxu1 %v5906_v50  ;;  %3884 = vmatprep.mubr.bf16.mxu0 %v5908_v37 }
 0x765   :  { %5698 = vmatpush3.bf16.msra.mxu1 %v5906_v50 }
 0x767   :  { %v5907_v10 = vld [vmem:[#allocation2 + $0x80] sm:$0xff]  }
 0x768   :  { %5699 = vmatprep.subr.bf16.mxu1 %v5907_v10 }
 0x769   :  { %5700 = vmatpush3.bf16.msra.mxu1 %v5907_v10 }
 0x76a   :  { %5705 = vmatprep.subr.bf16.mxu1 %v5956_v53 }
 0x76b   :  { %3885 = vmatmul.mubr.bf16.gmra.mxu0 %v5910_v21 }
 0x76c   :  { %5702 = vmatmul.mubr.msk.bf16.vlgmr.msra.gmra.mxu1 %vm1441_vm0, %v5912_v52 }
 0x76d   :  { %5709 = vmatprep.mubr.msk.bf16.mxu1 %vm5957_vm1, %v5956_v53 }
 0x823   :  { %v5646_v55 = vpop.f32.mrf.mxu0 }
 0x825   :  { %v5647_v56 = vpop.f32.mrf.mxu0 }
 0x826   :  { %v5648_v23 = vadd.f32 %v5647_v56, %v5646_v55 }
 0x827   :  { %v5649_v57 = vpop.f32.mrf.mxu0 }
 0x828   :  { %v3879_v15 = vadd.f32 %v5648_v23, %v4444_v12 }
 0x829   :  { %v5650_v58 = vpop.f32.mrf.mxu0 }
 0x82a   :  { %v5651_v4 = vadd.f32 %v5650_v58, %v5649_v57 }
 0x82b   :  { %v5652_v59 = vpop.f32.mrf.mxu0 }
 0x82c   :  { %v5703_v60 = vpop.f32.mrf.mxu1  ;;  %v3882_v14 = vadd.f32 %v5651_v4, %v4445_v9 }
 0x82d   :  { %v5653_v61 = vpop.f32.mrf.mxu0 }
 0x82e   :  { %v5654_v25 = vadd.f32 %v5653_v61, %v5652_v59  ;;  %v3927_v62 = vpop.f32.mrf.mxu1 }
 0x82f   :  { %v5655_v51 = vpop.f32.mrf.mxu0  ;;  %v3928_v18 = vadd.f32 %v3927_v62, %v3879_v15 }
 0x830   :  { %v3887_v5 = vadd.f32 %v5654_v25, %v4446_v45  ;;  %v5704_v49 = vpop.f32.mrf.mxu1 }
 0x831   :  { %v5656_v8 = vpop.f32.mrf.mxu0  ;;  %v3942_v20 = vmax.f32 %v3928_v18, 0.0 }
 0x832   :  { %v5657_v11 = vadd.f32 %v5656_v8, %v5655_v51  ;;  %v3930_v13 = vpop.f32.mrf.mxu1  ;;  %v3936_v0 = vadd.f32 %v5703_v60, %v3887_v5 }
 0x833   :  { %v3931_v63 = vadd.f32 %v3930_v13, %v3882_v14 }
 0x834   :  { %v3890_v1 = vadd.f32 %v5657_v11, %v4447_v6  ;;  %v3944_v17 = vmax.f32 %v3936_v0, 0.0 }
 0x835   :  { %v3943_v3 = vmax.f32 %v3931_v63, 0.0 }
 0x836   :  { %v3939_v16 = vadd.f32 %v5704_v49, %v3890_v1 }
 0x837   :  { %v3947_v22 = vpack.c.bf16 %v3943_v3, %v3942_v20 }
 0x838   :  { %v3945_v54 = vmax.f32 %v3939_v16, 0.0 }
 0x83a   :  { %v3948_v2 = vpack.c.bf16 %v3945_v54, %v3944_v17 }
 0x83c   :  { %5706 = vmatpush3.bf16.msra.mxu1 %v3948_v2 }
 0x83d   :  { %5707 = vmatprep.subr.bf16.mxu1 %v5956_v53 }
 0x840   :  { %5708 = vmatpush3.bf16.msra.mxu1 %v3947_v22 }
 0x843   :  { %5710 = vmatmul.mubr.msk.bf16.vlgmr.msra.gmra.mxu1 %vm1441_vm0, %v3946_v24 }
 0x903   :  { %v3987_v27 = vpop.f32.mrf.mxu1 }
 0x904   :  { %v3988_v7 = vadd.f32 %v3987_v27, %v3949_v26 }
 0x905   :  { %v5711_v28 = vpop.f32.mrf.mxu1 }
 0x906   :  { %5913 = vtanh.f32 %v3988_v7 }
 0x907   :  { %v3990_v39 = vpop.f32.mrf.mxu1 }
 0x909   :  { %v5712_v29 = vpop.f32.mrf.mxu1 }
 0x913   :  { %v5914_v30 = vpop.eup %5913 }
 0x914   :  { %3994 = vst [vmem:[%s6813_s8] sm:$0xff] %v5914_v30 }

</bundles_post_ra>
